<compile_context>
chip_gen: v7x
topology: tpu7x:2x2x1
jax: 0.10.0
libtpu: 0.0.40
codegen_flags: <defaults>
</compile_context>

<pallas_src>
import functools
import math

import numpy as np
import jax
import jax.numpy as jnp
from jax.experimental import pallas as pl
from jax.experimental.pallas import tpu as pltpu

PREDICTED_TYPES = ['type', 'bar', 'pos', 'tempo', 'structure', 'chord',
                   'track', 'pitch', 'duration']
EVENT_CLASS_NUM = {'type': 6, 'bar': 8, 'pos': 17, 'tempo': 94, 'structure': 15,
                   'chord': 322, 'track': 4, 'pitch': 83, 'duration': 81}
EMB_SIZES = {'type': 64, 'bar': 64, 'pos': 128, 'tempo': 256, 'structure': 256,
             'chord': 512, 'track': 64, 'pitch': 512, 'duration': 512}

NEG_INF = -1e30


# ----------------------------- in-kernel helpers -----------------------------

def _ln_f32(x, g, b, eps):
    mu = jnp.mean(x, axis=-1, keepdims=True)
    xc = x - mu
    var = jnp.mean(xc * xc, axis=-1, keepdims=True)
    return xc * jax.lax.rsqrt(var + eps) * g + b


def _gelu(y):
    # tanh-approx GELU (torch F.gelu uses exact erf; difference < 1e-3)
    c = math.sqrt(2.0 / math.pi)
    return 0.5 * y * (1.0 + jnp.tanh(c * (y + 0.044715 * y * y * y)))


# ----------------------------- Pallas kernels -----------------------------

def _linear_kernel(x_ref, w_ref, b_ref, o_ref):
    """y = x @ w + b  (bf16 MXU operands, f32 accumulation)."""
    o_ref[...] = jnp.dot(x_ref[...].astype(jnp.bfloat16), w_ref[...],
                         preferred_element_type=jnp.float32) + b_ref[...]


def linear(x, w, b):
    lead = x.shape[:-1]
    K = x.shape[-1]
    N = w.shape[-1]
    M = int(np.prod(lead)) if lead else 1
    out = pl.pallas_call(
        _linear_kernel,
        out_shape=jax.ShapeDtypeStruct((M, N), jnp.float32),
        in_specs=[pl.BlockSpec(memory_space=pltpu.MemorySpace.VMEM)] * 3,
        out_specs=pl.BlockSpec(memory_space=pltpu.MemorySpace.VMEM),
    )(x.reshape(M, K), w, b)
    return out.reshape(*lead, N)


def _layernorm_kernel(x_ref, g_ref, b_ref, o_ref, *, eps):
    o_ref[...] = _ln_f32(x_ref[...], g_ref[...], b_ref[...], eps)


def layer_norm(x, g, b, eps=1e-5):
    lead = x.shape[:-1]
    D = x.shape[-1]
    M = int(np.prod(lead)) if lead else 1
    out = pl.pallas_call(
        functools.partial(_layernorm_kernel, eps=eps),
        out_shape=jax.ShapeDtypeStruct((M, D), jnp.float32),
        in_specs=[pl.BlockSpec(memory_space=pltpu.MemorySpace.VMEM)] * 3,
        out_specs=pl.BlockSpec(memory_space=pltpu.MemorySpace.VMEM),
    )(x.reshape(M, D), g, b)
    return out.reshape(*lead, D)


def _attn_block_kernel(lens_ref, x_ref, wqkv_ref, bqkv_ref, wo_ref, bo_ref,
                       g_ref, be_ref, o_ref, *, n_heads, eps):
    """Fused attention sublayer for one batch item:
       x -> QKV (one matmul) -> per-head causal/length-masked softmax attention
         -> output projection -> residual -> LayerNorm."""
    b = pl.program_id(0)
    x = x_ref[...]                                   # (L, D) f32
    L, D = x.shape
    Dh = D // n_heads
    scale = 1.0 / math.sqrt(Dh)

    qkv = jnp.dot(x.astype(jnp.bfloat16), wqkv_ref[...],
                  preferred_element_type=jnp.float32) + bqkv_ref[...]   # (L, 3D)

    # causal AND key-index < length mask, built in-kernel (lengths come from SMEM)
    length = lens_ref[b]
    row = jax.lax.broadcasted_iota(jnp.int32, (L, L), 0)
    col = jax.lax.broadcasted_iota(jnp.int32, (L, L), 1)
    bias = jnp.where((col <= row) & (col < length), 0.0, NEG_INF)

    outs = []
    for h in range(n_heads):
        q = qkv[:, h * Dh:(h + 1) * Dh] * scale                  # fold 1/sqrt(Dh) into q
        k = qkv[:, D + h * Dh:D + (h + 1) * Dh]
        v = qkv[:, 2 * D + h * Dh:2 * D + (h + 1) * Dh]
        s = jax.lax.dot_general(q.astype(jnp.bfloat16), k.astype(jnp.bfloat16),
                                (((1,), (1,)), ((), ())),
                                preferred_element_type=jnp.float32) + bias
        s = s - jnp.max(s, axis=-1, keepdims=True)
        p = jnp.exp(s)
        p = p * pl.reciprocal(jnp.sum(p, axis=-1, keepdims=True), approx=True)
        outs.append(jnp.dot(p.astype(jnp.bfloat16), v.astype(jnp.bfloat16),
                            preferred_element_type=jnp.float32))
    attn = jnp.concatenate(outs, axis=-1)            # (L, D)

    a = jnp.dot(attn.astype(jnp.bfloat16), wo_ref[...],
                preferred_element_type=jnp.float32) + bo_ref[...]
    o_ref[...] = _ln_f32(x + a, g_ref[...], be_ref[...], eps)


def attention_block(x, lengths, lp, n_heads):
    B, L, D = x.shape
    grid_spec = pltpu.PrefetchScalarGridSpec(
        num_scalar_prefetch=1,
        grid=(B,),
        in_specs=[
            pl.BlockSpec((pl.Squeezed(), L, D), lambda b, lens: (b, 0, 0)),   # x
            pl.BlockSpec((D, 3 * D), lambda b, lens: (0, 0)),                 # wqkv
            pl.BlockSpec((1, 3 * D), lambda b, lens: (0, 0)),                 # bqkv
            pl.BlockSpec((D, D), lambda b, lens: (0, 0)),                     # wo
            pl.BlockSpec((1, D), lambda b, lens: (0, 0)),                     # bo
            pl.BlockSpec((1, D), lambda b, lens: (0, 0)),                     # ln1_g
            pl.BlockSpec((1, D), lambda b, lens: (0, 0)),                     # ln1_b
        ],
        out_specs=pl.BlockSpec((pl.Squeezed(), L, D), lambda b, lens: (b, 0, 0)),
    )
    return pl.pallas_call(
        functools.partial(_attn_block_kernel, n_heads=n_heads, eps=1e-5),
        out_shape=jax.ShapeDtypeStruct((B, L, D), jnp.float32),
        grid_spec=grid_spec,
        compiler_params=pltpu.CompilerParams(dimension_semantics=("parallel",)),
    )(lengths, x, lp['wqkv'], lp['bqkv'], lp['wo'], lp['bo'],
      lp['ln1_g'], lp['ln1_b'])


def _ffn_block_kernel(x_ref, w1_ref, b1_ref, w2_ref, b2_ref, g_ref, be_ref,
                      fg_ref, fb_ref, o_ref, *, eps, final):
    """Fused FFN sublayer: linear1 + GELU + linear2 + residual + LayerNorm
       (+ the encoder-stack final LayerNorm when `final`)."""
    x = x_ref[...]                                   # (M, D) f32
    y = jnp.dot(x.astype(jnp.bfloat16), w1_ref[...],
                preferred_element_type=jnp.float32) + b1_ref[...]
    y = _gelu(y)
    y = jnp.dot(y.astype(jnp.bfloat16), w2_ref[...],
                preferred_element_type=jnp.float32) + b2_ref[...]
    h = _ln_f32(x + y, g_ref[...], be_ref[...], eps)
    if final:
        h = _ln_f32(h, fg_ref[...], fb_ref[...], eps)
    o_ref[...] = h


def ffn_block(x, lp, final_g, final_b, final):
    B, L, D = x.shape
    M = B * L
    out = pl.pallas_call(
        functools.partial(_ffn_block_kernel, eps=1e-5, final=final),
        out_shape=jax.ShapeDtypeStruct((M, D), jnp.float32),
        in_specs=[pl.BlockSpec(memory_space=pltpu.MemorySpace.VMEM)] * 9,
        out_specs=pl.BlockSpec(memory_space=pltpu.MemorySpace.VMEM),
    )(x.reshape(M, D), lp['w1'], lp['b1'], lp['w2'], lp['b2'],
      lp['ln2_g'], lp['ln2_b'], final_g, final_b)
    return out.reshape(B, L, D)


def _heads_kernel(xs_ref, te_ref, tw_ref, tb_ref, hw_ref, hb_ref, o_ref):
    """TypeLinear + all 9 output-head projections fused into one kernel.
       The fused head weight is block-diagonal: head 0 ('type') reads x_song,
       heads 1..8 read the TypeLinear output. Output is lane-dense (640 cols)."""
    xs = xs_ref[...]                                 # (M, D)
    te = te_ref[...]                                 # (M, E_type)
    xc = jnp.concatenate([xs, te], axis=-1).astype(jnp.bfloat16)
    ycat = jnp.dot(xc, tw_ref[...], preferred_element_type=jnp.float32) + tb_ref[...]
    hin = jnp.concatenate([xs, ycat], axis=-1).astype(jnp.bfloat16)     # (M, 2D)
    o_ref[...] = jnp.dot(hin, hw_ref[...],
                         preferred_element_type=jnp.float32) + hb_ref[...]


def output_heads(x_song, y_type_emb, params):
    B, L, D = x_song.shape
    M = B * L
    Np = params['heads_w'].shape[1]
    out = pl.pallas_call(
        _heads_kernel,
        out_shape=jax.ShapeDtypeStruct((M, Np), jnp.float32),
        in_specs=[pl.BlockSpec(memory_space=pltpu.MemorySpace.VMEM)] * 6,
        out_specs=pl.BlockSpec(memory_space=pltpu.MemorySpace.VMEM),
    )(x_song.reshape(M, D), y_type_emb.reshape(M, -1),
      params['type_w'], params['type_b'], params['heads_w'], params['heads_b'])
    return out.reshape(B, L, Np)


# --------------------- transformer encoder (fast_transformers style) ---------------------
# post-norm layer: x = norm1(x + attn(x)); out = norm2(x + FFN(x)); final LayerNorm on stack.

def transformer_encoder(x, lengths, tparams, n_heads):
    n_layers = len(tparams['layers'])
    if n_layers == 0:
        return layer_norm(x, tparams['final_g'], tparams['final_b'])
    for li, lp in enumerate(tparams['layers']):
        x = attention_block(x, lengths, lp, n_heads)
        x = ffn_block(x, lp, tparams['final_g'], tparams['final_b'],
                      final=(li == n_layers - 1))
    return x


# ----------------------------- parameter init -----------------------------

def _dense(key, shape):
    return 0.02 * jax.random.normal(key, shape, dtype=jnp.float32)


def init_transformer_params(key, n_layers, D, d_ff):
    layers = []
    if n_layers > 0:
        keys = jax.random.split(key, n_layers)
        for lk in keys:
            ks = jax.random.split(lk, 6)
            wqkv = jnp.concatenate([_dense(ks[0], (D, D)), _dense(ks[1], (D, D)),
                                    _dense(ks[2], (D, D))], axis=1)
            layers.append({
                'wqkv': wqkv.astype(jnp.bfloat16),
                'bqkv': jnp.zeros((1, 3 * D), jnp.float32),
                'wo': _dense(ks[3], (D, D)).astype(jnp.bfloat16),
                'bo': jnp.zeros((1, D), jnp.float32),
                'w1': _dense(ks[4], (D, d_ff)).astype(jnp.bfloat16),
                'b1': jnp.zeros((1, d_ff), jnp.float32),
                'w2': _dense(ks[5], (d_ff, D)).astype(jnp.bfloat16),
                'b2': jnp.zeros((1, D), jnp.float32),
                'ln1_g': jnp.ones((1, D), jnp.float32),
                'ln1_b': jnp.zeros((1, D), jnp.float32),
                'ln2_g': jnp.ones((1, D), jnp.float32),
                'ln2_b': jnp.zeros((1, D), jnp.float32),
            })
    return {'layers': layers,
            'final_g': jnp.ones((1, D), jnp.float32),
            'final_b': jnp.zeros((1, D), jnp.float32)}


def sinusoid_pe(max_len, d_model):
    pe = np.zeros((max_len, d_model), np.float32)
    position = np.arange(max_len, dtype=np.float32)[:, None]
    div_term = np.exp(np.arange(0, d_model, 2, dtype=np.float32)
                      * (-math.log(10000.0) / d_model))
    pe[:, 0::2] = np.sin(position * div_term)
    pe[:, 1::2] = np.cos(position * div_term)
    return jnp.asarray(pe)


def init_form_model_params(key, D, song_layers, cp_layers, form_layers, mlp):
    keys = jax.random.split(key, 8)
    emb_keys = jax.random.split(keys[0], len(PREDICTED_TYPES))
    token_emb = {k: _dense(ek, (EVENT_CLASS_NUM[k], EMB_SIZES[k]))
                 for k, ek in zip(PREDICTED_TYPES, emb_keys)}
    total_emb = sum(EMB_SIZES.values())

    # fused output-head weight (block-diagonal), padded lane-dense to a multiple of 128
    total_cls = sum(EVENT_CLASS_NUM.values())                 # 630
    total_pad = ((total_cls + 127) // 128) * 128              # 640
    proj_keys = jax.random.split(keys[7], len(PREDICTED_TYPES))
    hw = np.zeros((2 * D, total_pad), np.float32)
    off = 0
    for i, (k, pk) in enumerate(zip(PREDICTED_TYPES, proj_keys)):
        n = EVENT_CLASS_NUM[k]
        row0 = 0 if i == 0 else D
        hw[row0:row0 + D, off:off + n] = np.asarray(_dense(pk, (D, n)))
        off += n

    return {
        'token_emb': token_emb,
        'enc_emb_w': _dense(keys[1], (total_emb, D)).astype(jnp.bfloat16),
        'enc_emb_b': jnp.zeros((1, D), jnp.float32),
        'type_w': _dense(keys[2], (D + EMB_SIZES['type'], D)).astype(jnp.bfloat16),
        'type_b': jnp.zeros((1, D), jnp.float32),
        'heads_w': jnp.asarray(hw).astype(jnp.bfloat16),
        'heads_b': jnp.zeros((1, total_pad), jnp.float32),
        'bottom': init_transformer_params(keys[3], song_layers, D, mlp),
        'cp': init_transformer_params(keys[4], cp_layers, D, mlp),
        'form': init_transformer_params(keys[5], form_layers, D, mlp),
        'up': init_transformer_params(keys[6], song_layers, D, mlp),
        'pe': sinusoid_pe(512, D),
    }


# ----------------------------- forward pass (fully jitted) -----------------------------

def forward_emb(params, x_tokens):
    embs = []
    for i, k in enumerate(PREDICTED_TYPES):
        table = params['token_emb'][k]
        e = jnp.take(table, x_tokens[..., i], axis=0) * math.sqrt(table.shape[1])
        embs.append(e)
    cat = jnp.concatenate(embs, axis=-1)
    return linear(cat, params['enc_emb_w'], params['enc_emb_b'])


@functools.partial(jax.jit, static_argnames=('n_heads',))
def form_model_forward_training(params, x, y_gt, form_index,
                                form_index_section_len, form_index_chord_len,
                                n_heads):
    bs, max_seq, _ = x.shape
    max_section = form_index.shape[1]
    max_chord = form_index.shape[2] - 1
    pe = params['pe']
    D = pe.shape[-1]

    form_index = form_index.astype(jnp.int32)
    sec_len = form_index_section_len.astype(jnp.int32)
    chord_len = form_index_chord_len.astype(jnp.int32)

    # ---- bottom song transformer ----
    x_event = forward_emb(params, x)
    x_song = x_event + pe[None, :max_seq, :]
    song_lens = jnp.full((bs,), max_seq, jnp.int32)
    x_song = transformer_encoder(x_song, song_lens, params['bottom'], n_heads)

    # ---- gather section / chord encodings (batched; padded sections masked to zero) ----
    sec_idx = form_index[:, :, 0]                                 # (bs, S)
    chord_idx = form_index[:, :, 1:]                              # (bs, S, C)
    gather = jax.vmap(lambda seq, idx: seq[idx])
    section_encode = gather(x_song, sec_idx)                      # (bs, S, D)
    chord_gather = gather(x_song, chord_idx.reshape(bs, -1)).reshape(
        bs, max_section, max_chord, D)
    sec_valid = jnp.arange(max_section)[None, :] < sec_len[:, None]     # (bs, S)
    chord_encode = jnp.where(sec_valid[:, :, None, None], chord_gather, 0.0)
    cp_encode = chord_encode + section_encode[:, :, None, :]

    # ---- chord-progression transformer: all bs*max_section sections in one batched call ----
    cp_lens = jnp.maximum(chord_len, 1).reshape(bs * max_section)
    cp_in = (cp_encode + pe[None, None, :max_chord, :]).reshape(
        bs * max_section, max_chord, D)
    cp_out = transformer_encoder(cp_in, cp_lens, params['cp'], n_heads)
    cp_out = cp_out.reshape(bs, max_section, max_chord, D)
    cp_encode = jnp.where(sec_valid[:, :, None, None], cp_out, cp_encode)

    # ---- form transformer over sections ----
    form_encode = cp_encode[:, :, -1, :] + pe[None, :max_section, :]
    form_encode = transformer_encoder(form_encode, sec_len, params['form'], n_heads)

    section_encode = section_encode.at[:, 1:, :].add(form_encode[:, :-1, :])
    chord_encode = chord_encode + section_encode[:, :, None, :]
    chord_encode = chord_encode.at[:, :, 1:, :].add(cp_encode[:, :, :-1, :])

    # ---- scatter back into the song sequence (invalid slots routed out of bounds + dropped) ----
    scatter = jax.vmap(lambda seq, idx, val: seq.at[idx].set(val, mode='drop'))
    sec_tgt = jnp.where(sec_valid, sec_idx, max_seq)
    x_song = scatter(x_song, sec_tgt, section_encode)
    chord_valid = sec_valid[:, :, None] & (
        jnp.arange(max_chord)[None, None, :] < chord_len[:, :, None])
    chord_tgt = jnp.where(chord_valid, chord_idx, max_seq).reshape(bs, -1)
    x_song = scatter(x_song, chord_tgt, chord_encode.reshape(bs, -1, D))

    # ---- upper song transformer ----
    x_song = x_song + pe[None, :max_seq, :]
    x_song = transformer_encoder(x_song, song_lens, params['up'], n_heads)

    # ---- fused output heads (TypeLinear + 9 projections in one lane-dense kernel) ----
    type_table = params['token_emb']['type']
    y_type_emb = jnp.take(type_table, y_gt[:, :, 0], axis=0) * math.sqrt(type_table.shape[1])
    heads_out = output_heads(x_song, y_type_emb, params)          # (bs, L, 640)

    y_events = []
    off = 0
    for k in PREDICTED_TYPES:
        n = EVENT_CLASS_NUM[k]
        y_events.append(heads_out[..., off:off + n])
        off += n
    return y_events


# ----------------------------- main -----------------------------

if __name__ == "__main__":
    D = 64
    N_HEADS = 4
    MLP = 128
    SONG_LAYERS = 1       # args.song_transformer_n_layer=2 // 2
    CP_LAYERS = 1
    FORM_LAYERS = 1

    bs, max_seq = 2, 8
    max_section, max_chord = 2, 3

    root = jax.random.PRNGKey(0)
    k_params, k_x, k_y = jax.random.split(root, 3)
    params = init_form_model_params(k_params, D, SONG_LAYERS, CP_LAYERS,
                                    FORM_LAYERS, MLP)

    # deterministic token inputs, per-event vocabulary bounds
    xk = jax.random.split(k_x, len(PREDICTED_TYPES))
    yk = jax.random.split(k_y, len(PREDICTED_TYPES))
    x_cols, y_cols = [], []
    for i, k in enumerate(PREDICTED_TYPES):
        x_cols.append(jax.random.randint(xk[i], (bs, max_seq), 0, EVENT_CLASS_NUM[k]))
        y_cols.append(jax.random.randint(yk[i], (bs, max_seq), 0, EVENT_CLASS_NUM[k]))
    x = jnp.stack(x_cols, axis=-1).astype(jnp.int32)         # (bs, max_seq, 9)
    y_gt = jnp.stack(y_cols, axis=-1).astype(jnp.int32)       # (bs, max_seq, 9)

    # hierarchical form structure (metadata, now device arrays inside the jit)
    form_index = jnp.array([[[0, 1, 2, 3], [4, 5, 6, 0]],
                            [[0, 1, 2, 3], [0, 0, 0, 0]]], dtype=jnp.int32)
    form_index_section_len = jnp.array([2, 1], dtype=jnp.int32)
    form_index_chord_len = jnp.array([[3, 2], [3, 0]], dtype=jnp.int32)

    y_events = form_model_forward_training(
        params, x, y_gt, form_index, form_index_section_len,
        form_index_chord_len, n_heads=N_HEADS)
    y_events = jax.block_until_ready(y_events)

    assert len(y_events) == len(PREDICTED_TYPES)
    for k, ye in zip(PREDICTED_TYPES, y_events):
        assert ye.shape == (bs, max_seq, EVENT_CLASS_NUM[k])
        assert bool(jnp.all(jnp.isfinite(ye)))
    print("KERNEL_OK")
</pallas_src>

<mosaic_0001>
module attributes {stable_mosaic.version = 11 : i64} {
  func.func @_linear_kernel(%arg0: memref<16x2368xf32, #tpu.memory_space<vmem>>, %arg1: memref<2368x64xbf16, #tpu.memory_space<vmem>>, %arg2: memref<1x64xf32, #tpu.memory_space<vmem>>, %arg3: memref<16x64xf32, #tpu.memory_space<vmem>>) attributes {dimension_semantics = [], scalar_prefetch = 0 : i64, scratch_operands = 0 : i64, tpu.core_type = #tpu.core_type<tc>} {
    %c0 = arith.constant 0 : index
    %c0_0 = arith.constant 0 : index
    %0 = vector.load %arg0[%c0, %c0_0] : memref<16x2368xf32, #tpu.memory_space<vmem>>, vector<16x2368xf32>
    %1 = arith.truncf %0 : vector<16x2368xf32> to vector<16x2368xbf16>
    %c0_1 = arith.constant 0 : index
    %c0_2 = arith.constant 0 : index
    %2 = vector.load %arg1[%c0_1, %c0_2] : memref<2368x64xbf16, #tpu.memory_space<vmem>>, vector<2368x64xbf16>
    %cst = arith.constant dense<0.000000e+00> : vector<16x64xf32>
    %3 = tpu.matmul %1, %2, %cst {dimension_numbers = #tpu.dot_dimension_numbers<[1], [0], [0], [1], [0, 0, 1, 1], [], []>} : vector<16x2368xbf16>, vector<2368x64xbf16>, vector<16x64xf32> -> vector<16x64xf32>
    %c0_3 = arith.constant 0 : index
    %c0_4 = arith.constant 0 : index
    %4 = vector.load %arg2[%c0_3, %c0_4] : memref<1x64xf32, #tpu.memory_space<vmem>>, vector<1x64xf32>
    %5 = vector.broadcast %4 : vector<1x64xf32> to vector<16x64xf32>
    %6 = arith.addf %3, %5 : vector<16x64xf32>
    %c0_5 = arith.constant 0 : index
    %c0_6 = arith.constant 0 : index
    %7 = vector.load %arg3[%c0_5, %c0_6] : memref<16x64xf32, #tpu.memory_space<vmem>>, vector<16x64xf32>
    tpu.vector_store %arg3[%c0_5, %c0_6], %6 {strides = array<i32>} : memref<16x64xf32, #tpu.memory_space<vmem>>, vector<16x64xf32>,
    return
  }
}

module attributes {stable_mosaic.version = 11 : i64} {
  func.func @_ffn_block_kernel(%arg0: memref<16x64xf32, #tpu.memory_space<vmem>>, %arg1: memref<64x128xbf16, #tpu.memory_space<vmem>>, %arg2: memref<1x128xf32, #tpu.memory_space<vmem>>, %arg3: memref<128x64xbf16, #tpu.memory_space<vmem>>, %arg4: memref<1x64xf32, #tpu.memory_space<vmem>>, %arg5: memref<1x64xf32, #tpu.memory_space<vmem>>, %arg6: memref<1x64xf32, #tpu.memory_space<vmem>>, %arg7: memref<1x64xf32, #tpu.memory_space<vmem>>, %arg8: memref<1x64xf32, #tpu.memory_space<vmem>>, %arg9: memref<16x64xf32, #tpu.memory_space<vmem>>) attributes {dimension_semantics = [], scalar_prefetch = 0 : i64, scratch_operands = 0 : i64, tpu.core_type = #tpu.core_type<tc>} {
    %c0 = arith.constant 0 : index
    %c0_0 = arith.constant 0 : index
    %0 = vector.load %arg0[%c0, %c0_0] : memref<16x64xf32, #tpu.memory_space<vmem>>, vector<16x64xf32>
    %1 = arith.truncf %0 : vector<16x64xf32> to vector<16x64xbf16>
    %c0_1 = arith.constant 0 : index
    %c0_2 = arith.constant 0 : index
    %2 = vector.load %arg1[%c0_1, %c0_2] : memref<64x128xbf16, #tpu.memory_space<vmem>>, vector<64x128xbf16>
    %cst = arith.constant dense<0.000000e+00> : vector<16x128xf32>
    %3 = tpu.matmul %1, %2, %cst {dimension_numbers = #tpu.dot_dimension_numbers<[1], [0], [0], [1], [0, 0, 1, 1], [], []>} : vector<16x64xbf16>, vector<64x128xbf16>, vector<16x128xf32> -> vector<16x128xf32>
    %c0_3 = arith.constant 0 : index
    %c0_4 = arith.constant 0 : index
    %4 = vector.load %arg2[%c0_3, %c0_4] : memref<1x128xf32, #tpu.memory_space<vmem>>, vector<1x128xf32>
    %5 = vector.broadcast %4 : vector<1x128xf32> to vector<16x128xf32>
    %6 = arith.addf %3, %5 : vector<16x128xf32>
    %cst_5 = arith.constant 5.000000e-01 : f32
    %7 = vector.broadcast %cst_5 : f32 to vector<16x128xf32>
    %8 = arith.mulf %7, %6 : vector<16x128xf32>
    %cst_6 = arith.constant 4.471500e-02 : f32
    %9 = vector.broadcast %cst_6 : f32 to vector<16x128xf32>
    %10 = arith.mulf %9, %6 : vector<16x128xf32>
    %11 = arith.mulf %10, %6 : vector<16x128xf32>
    %12 = arith.mulf %11, %6 : vector<16x128xf32>
    %13 = arith.addf %6, %12 : vector<16x128xf32>
    %cst_7 = arith.constant 0.797884583 : f32
    %14 = vector.broadcast %cst_7 : f32 to vector<16x128xf32>
    %15 = arith.mulf %14, %13 : vector<16x128xf32>
    %16 = math.tanh %15 : vector<16x128xf32>
    %cst_8 = arith.constant 1.000000e+00 : f32
    %17 = vector.broadcast %cst_8 : f32 to vector<16x128xf32>
    %18 = arith.addf %17, %16 : vector<16x128xf32>
    %19 = arith.mulf %8, %18 : vector<16x128xf32>
    %20 = arith.truncf %19 : vector<16x128xf32> to vector<16x128xbf16>
    %c0_9 = arith.constant 0 : index
    %c0_10 = arith.constant 0 : index
    %21 = vector.load %arg3[%c0_9, %c0_10] : memref<128x64xbf16, #tpu.memory_space<vmem>>, vector<128x64xbf16>
    %cst_11 = arith.constant dense<0.000000e+00> : vector<16x64xf32>
    %22 = tpu.matmul %20, %21, %cst_11 {dimension_numbers = #tpu.dot_dimension_numbers<[1], [0], [0], [1], [0, 0, 1, 1], [], []>} : vector<16x128xbf16>, vector<128x64xbf16>, vector<16x64xf32> -> vector<16x64xf32>
    %c0_12 = arith.constant 0 : index
    %c0_13 = arith.constant 0 : index
    %23 = vector.load %arg4[%c0_12, %c0_13] : memref<1x64xf32, #tpu.memory_space<vmem>>, vector<1x64xf32>
    %24 = vector.broadcast %23 : vector<1x64xf32> to vector<16x64xf32>
    %25 = arith.addf %22, %24 : vector<16x64xf32>
    %26 = arith.addf %0, %25 : vector<16x64xf32>
    %c0_14 = arith.constant 0 : index
    %c0_15 = arith.constant 0 : index
    %27 = vector.load %arg5[%c0_14, %c0_15] : memref<1x64xf32, #tpu.memory_space<vmem>>, vector<1x64xf32>
    %c0_16 = arith.constant 0 : index
    %c0_17 = arith.constant 0 : index
    %28 = vector.load %arg6[%c0_16, %c0_17] : memref<1x64xf32, #tpu.memory_space<vmem>>, vector<1x64xf32>
    %cst_18 = arith.constant dense<0.000000e+00> : vector<16xf32>
    %29 = vector.multi_reduction <add>, %26, %cst_18 [1] : vector<16x64xf32> to vector<16xf32>
    %30 = vector.shape_cast %29 : vector<16xf32> to vector<16x1xf32>
    %cst_19 = arith.constant 6.400000e+01 : f32
    %31 = vector.broadcast %cst_19 : f32 to vector<16x1xf32>
    %32 = arith.divf %30, %31 : vector<16x1xf32>
    %33 = vector.broadcast %32 : vector<16x1xf32> to vector<16x64xf32>
    %34 = arith.subf %26, %33 : vector<16x64xf32>
    %35 = arith.mulf %34, %34 : vector<16x64xf32>
    %cst_20 = arith.constant dense<0.000000e+00> : vector<16xf32>
    %36 = vector.multi_reduction <add>, %35, %cst_20 [1] : vector<16x64xf32> to vector<16xf32>
    %37 = vector.shape_cast %36 : vector<16xf32> to vector<16x1xf32>
    %cst_21 = arith.constant 6.400000e+01 : f32
    %38 = vector.broadcast %cst_21 : f32 to vector<16x1xf32>
    %39 = arith.divf %37, %38 : vector<16x1xf32>
    %cst_22 = arith.constant 9.99999974E-6 : f32
    %40 = vector.broadcast %cst_22 : f32 to vector<16x1xf32>
    %41 = arith.addf %39, %40 : vector<16x1xf32>
    %42 = math.rsqrt %41 : vector<16x1xf32>
    %43 = vector.broadcast %42 : vector<16x1xf32> to vector<16x64xf32>
    %44 = arith.mulf %34, %43 : vector<16x64xf32>
    %45 = vector.broadcast %27 : vector<1x64xf32> to vector<16x64xf32>
    %46 = arith.mulf %44, %45 : vector<16x64xf32>
    %47 = vector.broadcast %28 : vector<1x64xf32> to vector<16x64xf32>
    %48 = arith.addf %46, %47 : vector<16x64xf32>
    %c0_23 = arith.constant 0 : index
    %c0_24 = arith.constant 0 : index
    %49 = vector.load %arg7[%c0_23, %c0_24] : memref<1x64xf32, #tpu.memory_space<vmem>>, vector<1x64xf32>
    %c0_25 = arith.constant 0 : index
    %c0_26 = arith.constant 0 : index
    %50 = vector.load %arg8[%c0_25, %c0_26] : memref<1x64xf32, #tpu.memory_space<vmem>>, vector<1x64xf32>
    %cst_27 = arith.constant dense<0.000000e+00> : vector<16xf32>
    %51 = vector.multi_reduction <add>, %48, %cst_27 [1] : vector<16x64xf32> to vector<16xf32>
    %52 = vector.shape_cast %51 : vector<16xf32> to vector<16x1xf32>
    %cst_28 = arith.constant 6.400000e+01 : f32
    %53 = vector.broadcast %cst_28 : f32 to vector<16x1xf32>
    %54 = arith.divf %52, %53 : vector<16x1xf32>
    %55 = vector.broadcast %54 : vector<16x1xf32> to vector<16x64xf32>
    %56 = arith.subf %48, %55 : vector<16x64xf32>
    %57 = arith.mulf %56, %56 : vector<16x64xf32>
    %cst_29 = arith.constant dense<0.000000e+00> : vector<16xf32>
    %58 = vector.multi_reduction <add>, %57, %cst_29 [1] : vector<16x64xf32> to vector<16xf32>
    %59 = vector.shape_cast %58 : vector<16xf32> to vector<16x1xf32>
    %cst_30 = arith.constant 6.400000e+01 : f32
    %60 = vector.broadcast %cst_30 : f32 to vector<16x1xf32>
    %61 = arith.divf %59, %60 : vector<16x1xf32>
    %cst_31 = arith.constant 9.99999974E-6 : f32
    %62 = vector.broadcast %cst_31 : f32 to vector<16x1xf32>
    %63 = arith.addf %61, %62 : vector<16x1xf32>
    %64 = math.rsqrt %63 : vector<16x1xf32>
    %65 = vector.broadcast %64 : vector<16x1xf32> to vector<16x64xf32>
    %66 = arith.mulf %56, %65 : vector<16x64xf32>
    %67 = vector.broadcast %49 : vector<1x64xf32> to vector<16x64xf32>
    %68 = arith.mulf %66, %67 : vector<16x64xf32>
    %69 = vector.broadcast %50 : vector<1x64xf32> to vector<16x64xf32>
    %70 = arith.addf %68, %69 : vector<16x64xf32>
    %c0_32 = arith.constant 0 : index
    %c0_33 = arith.constant 0 : index
    %71 = vector.load %arg9[%c0_32, %c0_33] : memref<16x64xf32, #tpu.memory_space<vmem>>, vector<16x64xf32>
    tpu.vector_store %arg9[%c0_32, %c0_33], %70 {strides = array<i32>} : memref<16x64xf32, #tpu.memory_space<vmem>>, vector<16x64xf32>,
    return
  }
}

module attributes {stable_mosaic.version = 11 : i64} {
  func.func @_attn_block_kernel(%arg0: i32, %arg1: memref<2xi32, #tpu.memory_space<smem>>, %arg2: memref<1x8x64xf32, #tpu.memory_space<vmem>>, %arg3: memref<64x192xbf16, #tpu.memory_space<vmem>>, %arg4: memref<1x192xf32, #tpu.memory_space<vmem>>, %arg5: memref<64x64xbf16, #tpu.memory_space<vmem>>, %arg6: memref<1x64xf32, #tpu.memory_space<vmem>>, %arg7: memref<1x64xf32, #tpu.memory_space<vmem>>, %arg8: memref<1x64xf32, #tpu.memory_space<vmem>>, %arg9: memref<1x8x64xf32, #tpu.memory_space<vmem>>) attributes {dimension_semantics = [#tpu.dimension_semantics<parallel>], iteration_bounds = array<i64: 2>, scalar_prefetch = 1 : i64, scratch_operands = 0 : i64, tpu.core_type = #tpu.core_type<tc>, window_params = [{transform_indices = @transform_0, window_bounds = array<i64: 1, 8, 64>}, {pipeline_mode = #tpu.pipeline_mode<synchronous>, transform_indices = @transform_1, window_bounds = array<i64: 64, 192>}, {pipeline_mode = #tpu.pipeline_mode<synchronous>, transform_indices = @transform_2, window_bounds = array<i64: 1, 192>}, {pipeline_mode = #tpu.pipeline_mode<synchronous>, transform_indices = @transform_3, window_bounds = array<i64: 64, 64>}, {pipeline_mode = #tpu.pipeline_mode<synchronous>, transform_indices = @transform_4, window_bounds = array<i64: 1, 64>}, {pipeline_mode = #tpu.pipeline_mode<synchronous>, transform_indices = @transform_5, window_bounds = array<i64: 1, 64>}, {pipeline_mode = #tpu.pipeline_mode<synchronous>, transform_indices = @transform_6, window_bounds = array<i64: 1, 64>}, {transform_indices = @transform_7, window_bounds = array<i64: 1, 8, 64>}]} {
    %c0 = arith.constant 0 : index
    %c0_0 = arith.constant 0 : index
    %c0_1 = arith.constant 0 : index
    %0 = vector.load %arg2[%c0, %c0_0, %c0_1] : memref<1x8x64xf32, #tpu.memory_space<vmem>>, vector<1x8x64xf32>
    %1 = vector.shape_cast %0 : vector<1x8x64xf32> to vector<8x64xf32>
    %2 = arith.truncf %1 : vector<8x64xf32> to vector<8x64xbf16>
    %c0_2 = arith.constant 0 : index
    %c0_3 = arith.constant 0 : index
    %3 = vector.load %arg3[%c0_2, %c0_3] : memref<64x192xbf16, #tpu.memory_space<vmem>>, vector<64x192xbf16>
    %cst = arith.constant dense<0.000000e+00> : vector<8x192xf32>
    %4 = tpu.matmul %2, %3, %cst {dimension_numbers = #tpu.dot_dimension_numbers<[1], [0], [0], [1], [0, 0, 1, 1], [], []>} : vector<8x64xbf16>, vector<64x192xbf16>, vector<8x192xf32> -> vector<8x192xf32>
    %c0_4 = arith.constant 0 : index
    %c0_5 = arith.constant 0 : index
    %5 = vector.load %arg4[%c0_4, %c0_5] : memref<1x192xf32, #tpu.memory_space<vmem>>, vector<1x192xf32>
    %6 = vector.broadcast %5 : vector<1x192xf32> to vector<8x192xf32>
    %7 = arith.addf %4, %6 : vector<8x192xf32>
    %8 = arith.index_cast %arg0 : i32 to index
    %9 = memref.load %arg1[%8] : memref<2xi32, #tpu.memory_space<smem>>
    %10 = tpu.iota {dimensions = array<i32: 0>} : vector<8x8xi32>
    %11 = tpu.iota {dimensions = array<i32: 1>} : vector<8x8xi32>
    %12 = arith.cmpi sle, %11, %10 : vector<8x8xi32>
    %13 = vector.broadcast %9 : i32 to vector<8x8xi32>
    %14 = arith.cmpi slt, %11, %13 : vector<8x8xi32>
    %15 = arith.andi %12, %14 : vector<8x8xi1>
    %cst_6 = arith.constant 0.000000e+00 : f32
    %cst_7 = arith.constant -1.000000e+30 : f32
    %16 = vector.broadcast %cst_6 : f32 to vector<8x8xf32>
    %17 = vector.broadcast %cst_7 : f32 to vector<8x8xf32>
    %18 = arith.select %15, %16, %17 : vector<8x8xi1>, vector<8x8xf32>
    %19 = vector.extract_strided_slice %7 {offsets = [0, 0], sizes = [8, 16], strides = [1, 1]} : vector<8x192xf32> to vector<8x16xf32>
    %cst_8 = arith.constant 2.500000e-01 : f32
    %20 = vector.broadcast %cst_8 : f32 to vector<8x16xf32>
    %21 = arith.mulf %19, %20 : vector<8x16xf32>
    %22 = vector.extract_strided_slice %7 {offsets = [0, 64], sizes = [8, 16], strides = [1, 1]} : vector<8x192xf32> to vector<8x16xf32>
    %23 = vector.extract_strided_slice %7 {offsets = [0, 128], sizes = [8, 16], strides = [1, 1]} : vector<8x192xf32> to vector<8x16xf32>
    %24 = arith.truncf %21 : vector<8x16xf32> to vector<8x16xbf16>
    %25 = arith.truncf %22 : vector<8x16xf32> to vector<8x16xbf16>
    %cst_9 = arith.constant dense<0.000000e+00> : vector<8x8xf32>
    %26 = tpu.matmul %24, %25, %cst_9 {dimension_numbers = #tpu.dot_dimension_numbers<[1], [1], [0], [0], [0, 0, 1, 0], [], []>} : vector<8x16xbf16>, vector<8x16xbf16>, vector<8x8xf32> -> vector<8x8xf32>
    %27 = arith.addf %26, %18 : vector<8x8xf32>
    %cst_10 = arith.constant dense<0xFF800000> : vector<8xf32>
    %28 = vector.multi_reduction <maximumf>, %27, %cst_10 [1] : vector<8x8xf32> to vector<8xf32>
    %29 = vector.shape_cast %28 : vector<8xf32> to vector<8x1xf32>
    %30 = vector.broadcast %29 : vector<8x1xf32> to vector<8x8xf32>
    %31 = arith.subf %27, %30 : vector<8x8xf32>
    %32 = math.exp %31 : vector<8x8xf32>
    %cst_11 = arith.constant dense<0.000000e+00> : vector<8xf32>
    %33 = vector.multi_reduction <add>, %32, %cst_11 [1] : vector<8x8xf32> to vector<8xf32>
    %34 = vector.shape_cast %33 : vector<8xf32> to vector<8x1xf32>
    %35 = tpu.reciprocal %34 {approx = true} : vector<8x1xf32> -> vector<8x1xf32>
    %36 = vector.broadcast %35 : vector<8x1xf32> to vector<8x8xf32>
    %37 = arith.mulf %32, %36 : vector<8x8xf32>
    %38 = arith.truncf %37 : vector<8x8xf32> to vector<8x8xbf16>
    %39 = arith.truncf %23 : vector<8x16xf32> to vector<8x16xbf16>
    %cst_12 = arith.constant dense<0.000000e+00> : vector<8x16xf32>
    %40 = tpu.matmul %38, %39, %cst_12 {dimension_numbers = #tpu.dot_dimension_numbers<[1], [0], [0], [1], [0, 0, 1, 1], [], []>} : vector<8x8xbf16>, vector<8x16xbf16>, vector<8x16xf32> -> vector<8x16xf32>
    %41 = vector.extract_strided_slice %7 {offsets = [0, 16], sizes = [8, 16], strides = [1, 1]} : vector<8x192xf32> to vector<8x16xf32>
    %cst_13 = arith.constant 2.500000e-01 : f32
    %42 = vector.broadcast %cst_13 : f32 to vector<8x16xf32>
    %43 = arith.mulf %41, %42 : vector<8x16xf32>
    %44 = vector.extract_strided_slice %7 {offsets = [0, 80], sizes = [8, 16], strides = [1, 1]} : vector<8x192xf32> to vector<8x16xf32>
    %45 = vector.extract_strided_slice %7 {offsets = [0, 144], sizes = [8, 16], strides = [1, 1]} : vector<8x192xf32> to vector<8x16xf32>
    %46 = arith.truncf %43 : vector<8x16xf32> to vector<8x16xbf16>
    %47 = arith.truncf %44 : vector<8x16xf32> to vector<8x16xbf16>
    %cst_14 = arith.constant dense<0.000000e+00> : vector<8x8xf32>
    %48 = tpu.matmul %46, %47, %cst_14 {dimension_numbers = #tpu.dot_dimension_numbers<[1], [1], [0], [0], [0, 0, 1, 0], [], []>} : vector<8x16xbf16>, vector<8x16xbf16>, vector<8x8xf32> -> vector<8x8xf32>
    %49 = arith.addf %48, %18 : vector<8x8xf32>
    %cst_15 = arith.constant dense<0xFF800000> : vector<8xf32>
    %50 = vector.multi_reduction <maximumf>, %49, %cst_15 [1] : vector<8x8xf32> to vector<8xf32>
    %51 = vector.shape_cast %50 : vector<8xf32> to vector<8x1xf32>
    %52 = vector.broadcast %51 : vector<8x1xf32> to vector<8x8xf32>
    %53 = arith.subf %49, %52 : vector<8x8xf32>
    %54 = math.exp %53 : vector<8x8xf32>
    %cst_16 = arith.constant dense<0.000000e+00> : vector<8xf32>
    %55 = vector.multi_reduction <add>, %54, %cst_16 [1] : vector<8x8xf32> to vector<8xf32>
    %56 = vector.shape_cast %55 : vector<8xf32> to vector<8x1xf32>
    %57 = tpu.reciprocal %56 {approx = true} : vector<8x1xf32> -> vector<8x1xf32>
    %58 = vector.broadcast %57 : vector<8x1xf32> to vector<8x8xf32>
    %59 = arith.mulf %54, %58 : vector<8x8xf32>
    %60 = arith.truncf %59 : vector<8x8xf32> to vector<8x8xbf16>
    %61 = arith.truncf %45 : vector<8x16xf32> to vector<8x16xbf16>
    %cst_17 = arith.constant dense<0.000000e+00> : vector<8x16xf32>
    %62 = tpu.matmul %60, %61, %cst_17 {dimension_numbers = #tpu.dot_dimension_numbers<[1], [0], [0], [1], [0, 0, 1, 1], [], []>} : vector<8x8xbf16>, vector<8x16xbf16>, vector<8x16xf32> -> vector<8x16xf32>
    %63 = vector.extract_strided_slice %7 {offsets = [0, 32], sizes = [8, 16], strides = [1, 1]} : vector<8x192xf32> to vector<8x16xf32>
    %cst_18 = arith.constant 2.500000e-01 : f32
    %64 = vector.broadcast %cst_18 : f32 to vector<8x16xf32>
    %65 = arith.mulf %63, %64 : vector<8x16xf32>
    %66 = vector.extract_strided_slice %7 {offsets = [0, 96], sizes = [8, 16], strides = [1, 1]} : vector<8x192xf32> to vector<8x16xf32>
    %67 = vector.extract_strided_slice %7 {offsets = [0, 160], sizes = [8, 16], strides = [1, 1]} : vector<8x192xf32> to vector<8x16xf32>
    %68 = arith.truncf %65 : vector<8x16xf32> to vector<8x16xbf16>
    %69 = arith.truncf %66 : vector<8x16xf32> to vector<8x16xbf16>
    %cst_19 = arith.constant dense<0.000000e+00> : vector<8x8xf32>
    %70 = tpu.matmul %68, %69, %cst_19 {dimension_numbers = #tpu.dot_dimension_numbers<[1], [1], [0], [0], [0, 0, 1, 0], [], []>} : vector<8x16xbf16>, vector<8x16xbf16>, vector<8x8xf32> -> vector<8x8xf32>
    %71 = arith.addf %70, %18 : vector<8x8xf32>
    %cst_20 = arith.constant dense<0xFF800000> : vector<8xf32>
    %72 = vector.multi_reduction <maximumf>, %71, %cst_20 [1] : vector<8x8xf32> to vector<8xf32>
    %73 = vector.shape_cast %72 : vector<8xf32> to vector<8x1xf32>
    %74 = vector.broadcast %73 : vector<8x1xf32> to vector<8x8xf32>
    %75 = arith.subf %71, %74 : vector<8x8xf32>
    %76 = math.exp %75 : vector<8x8xf32>
    %cst_21 = arith.constant dense<0.000000e+00> : vector<8xf32>
    %77 = vector.multi_reduction <add>, %76, %cst_21 [1] : vector<8x8xf32> to vector<8xf32>
    %78 = vector.shape_cast %77 : vector<8xf32> to vector<8x1xf32>
    %79 = tpu.reciprocal %78 {approx = true} : vector<8x1xf32> -> vector<8x1xf32>
    %80 = vector.broadcast %79 : vector<8x1xf32> to vector<8x8xf32>
    %81 = arith.mulf %76, %80 : vector<8x8xf32>
    %82 = arith.truncf %81 : vector<8x8xf32> to vector<8x8xbf16>
    %83 = arith.truncf %67 : vector<8x16xf32> to vector<8x16xbf16>
    %cst_22 = arith.constant dense<0.000000e+00> : vector<8x16xf32>
    %84 = tpu.matmul %82, %83, %cst_22 {dimension_numbers = #tpu.dot_dimension_numbers<[1], [0], [0], [1], [0, 0, 1, 1], [], []>} : vector<8x8xbf16>, vector<8x16xbf16>, vector<8x16xf32> -> vector<8x16xf32>
    %85 = vector.extract_strided_slice %7 {offsets = [0, 48], sizes = [8, 16], strides = [1, 1]} : vector<8x192xf32> to vector<8x16xf32>
    %cst_23 = arith.constant 2.500000e-01 : f32
    %86 = vector.broadcast %cst_23 : f32 to vector<8x16xf32>
    %87 = arith.mulf %85, %86 : vector<8x16xf32>
    %88 = vector.extract_strided_slice %7 {offsets = [0, 112], sizes = [8, 16], strides = [1, 1]} : vector<8x192xf32> to vector<8x16xf32>
    %89 = vector.extract_strided_slice %7 {offsets = [0, 176], sizes = [8, 16], strides = [1, 1]} : vector<8x192xf32> to vector<8x16xf32>
    %90 = arith.truncf %87 : vector<8x16xf32> to vector<8x16xbf16>
    %91 = arith.truncf %88 : vector<8x16xf32> to vector<8x16xbf16>
    %cst_24 = arith.constant dense<0.000000e+00> : vector<8x8xf32>
    %92 = tpu.matmul %90, %91, %cst_24 {dimension_numbers = #tpu.dot_dimension_numbers<[1], [1], [0], [0], [0, 0, 1, 0], [], []>} : vector<8x16xbf16>, vector<8x16xbf16>, vector<8x8xf32> -> vector<8x8xf32>
    %93 = arith.addf %92, %18 : vector<8x8xf32>
    %cst_25 = arith.constant dense<0xFF800000> : vector<8xf32>
    %94 = vector.multi_reduction <maximumf>, %93, %cst_25 [1] : vector<8x8xf32> to vector<8xf32>
    %95 = vector.shape_cast %94 : vector<8xf32> to vector<8x1xf32>
    %96 = vector.broadcast %95 : vector<8x1xf32> to vector<8x8xf32>
    %97 = arith.subf %93, %96 : vector<8x8xf32>
    %98 = math.exp %97 : vector<8x8xf32>
    %cst_26 = arith.constant dense<0.000000e+00> : vector<8xf32>
    %99 = vector.multi_reduction <add>, %98, %cst_26 [1] : vector<8x8xf32> to vector<8xf32>
    %100 = vector.shape_cast %99 : vector<8xf32> to vector<8x1xf32>
    %101 = tpu.reciprocal %100 {approx = true} : vector<8x1xf32> -> vector<8x1xf32>
    %102 = vector.broadcast %101 : vector<8x1xf32> to vector<8x8xf32>
    %103 = arith.mulf %98, %102 : vector<8x8xf32>
    %104 = arith.truncf %103 : vector<8x8xf32> to vector<8x8xbf16>
    %105 = arith.truncf %89 : vector<8x16xf32> to vector<8x16xbf16>
    %cst_27 = arith.constant dense<0.000000e+00> : vector<8x16xf32>
    %106 = tpu.matmul %104, %105, %cst_27 {dimension_numbers = #tpu.dot_dimension_numbers<[1], [0], [0], [1], [0, 0, 1, 1], [], []>} : vector<8x8xbf16>, vector<8x16xbf16>, vector<8x16xf32> -> vector<8x16xf32>
    %107 = tpu.concatenate %40, %62, %84, %106 in 1 : vector<8x16xf32>, vector<8x16xf32>, vector<8x16xf32>, vector<8x16xf32> -> vector<8x64xf32>
    %108 = arith.truncf %107 : vector<8x64xf32> to vector<8x64xbf16>
    %c0_28 = arith.constant 0 : index
    %c0_29 = arith.constant 0 : index
    %109 = vector.load %arg5[%c0_28, %c0_29] : memref<64x64xbf16, #tpu.memory_space<vmem>>, vector<64x64xbf16>
    %cst_30 = arith.constant dense<0.000000e+00> : vector<8x64xf32>
    %110 = tpu.matmul %108, %109, %cst_30 {dimension_numbers = #tpu.dot_dimension_numbers<[1], [0], [0], [1], [0, 0, 1, 1], [], []>} : vector<8x64xbf16>, vector<64x64xbf16>, vector<8x64xf32> -> vector<8x64xf32>
    %c0_31 = arith.constant 0 : index
    %c0_32 = arith.constant 0 : index
    %111 = vector.load %arg6[%c0_31, %c0_32] : memref<1x64xf32, #tpu.memory_space<vmem>>, vector<1x64xf32>
    %112 = vector.broadcast %111 : vector<1x64xf32> to vector<8x64xf32>
    %113 = arith.addf %110, %112 : vector<8x64xf32>
    %114 = arith.addf %1, %113 : vector<8x64xf32>
    %c0_33 = arith.constant 0 : index
    %c0_34 = arith.constant 0 : index
    %115 = vector.load %arg7[%c0_33, %c0_34] : memref<1x64xf32, #tpu.memory_space<vmem>>, vector<1x64xf32>
    %c0_35 = arith.constant 0 : index
    %c0_36 = arith.constant 0 : index
    %116 = vector.load %arg8[%c0_35, %c0_36] : memref<1x64xf32, #tpu.memory_space<vmem>>, vector<1x64xf32>
    %cst_37 = arith.constant dense<0.000000e+00> : vector<8xf32>
    %117 = vector.multi_reduction <add>, %114, %cst_37 [1] : vector<8x64xf32> to vector<8xf32>
    %118 = vector.shape_cast %117 : vector<8xf32> to vector<8x1xf32>
    %cst_38 = arith.constant 6.400000e+01 : f32
    %119 = vector.broadcast %cst_38 : f32 to vector<8x1xf32>
    %120 = arith.divf %118, %119 : vector<8x1xf32>
    %121 = vector.broadcast %120 : vector<8x1xf32> to vector<8x64xf32>
    %122 = arith.subf %114, %121 : vector<8x64xf32>
    %123 = arith.mulf %122, %122 : vector<8x64xf32>
    %cst_39 = arith.constant dense<0.000000e+00> : vector<8xf32>
    %124 = vector.multi_reduction <add>, %123, %cst_39 [1] : vector<8x64xf32> to vector<8xf32>
    %125 = vector.shape_cast %124 : vector<8xf32> to vector<8x1xf32>
    %cst_40 = arith.constant 6.400000e+01 : f32
    %126 = vector.broadcast %cst_40 : f32 to vector<8x1xf32>
    %127 = arith.divf %125, %126 : vector<8x1xf32>
    %cst_41 = arith.constant 9.99999974E-6 : f32
    %128 = vector.broadcast %cst_41 : f32 to vector<8x1xf32>
    %129 = arith.addf %127, %128 : vector<8x1xf32>
    %130 = math.rsqrt %129 : vector<8x1xf32>
    %131 = vector.broadcast %130 : vector<8x1xf32> to vector<8x64xf32>
    %132 = arith.mulf %122, %131 : vector<8x64xf32>
    %133 = vector.broadcast %115 : vector<1x64xf32> to vector<8x64xf32>
    %134 = arith.mulf %132, %133 : vector<8x64xf32>
    %135 = vector.broadcast %116 : vector<1x64xf32> to vector<8x64xf32>
    %136 = arith.addf %134, %135 : vector<8x64xf32>
    %c0_42 = arith.constant 0 : index
    %c0_43 = arith.constant 0 : index
    %c0_44 = arith.constant 0 : index
    %137 = vector.load %arg9[%c0_42, %c0_43, %c0_44] : memref<1x8x64xf32, #tpu.memory_space<vmem>>, vector<1x8x64xf32>
    %138 = vector.shape_cast %137 : vector<1x8x64xf32> to vector<8x64xf32>
    %139 = vector.shape_cast %136 : vector<8x64xf32> to vector<1x8x64xf32>
    tpu.vector_store %arg9[%c0_42, %c0_43, %c0_44], %139 {strides = array<i32>} : memref<1x8x64xf32, #tpu.memory_space<vmem>>, vector<1x8x64xf32>,
    return
  }
  func.func @transform_0(%arg0: i32, %arg1: memref<2xi32, #tpu.memory_space<smem>>) -> (i32, i32, i32) {
    %c0_i32 = arith.constant 0 : i32
    %c0_i32_0 = arith.constant 0 : i32
    %c0_i32_1 = arith.constant 0 : i32
    return %arg0, %c0_i32, %c0_i32_0 : i32, i32, i32
  }
  func.func @transform_1(%arg0: i32, %arg1: memref<2xi32, #tpu.memory_space<smem>>) -> (i32, i32) {
    %c0_i32 = arith.constant 0 : i32
    %c0_i32_0 = arith.constant 0 : i32
    %c0_i32_1 = arith.constant 0 : i32
    return %c0_i32, %c0_i32_0 : i32, i32
  }
  func.func @transform_2(%arg0: i32, %arg1: memref<2xi32, #tpu.memory_space<smem>>) -> (i32, i32) {
    %c0_i32 = arith.constant 0 : i32
    %c0_i32_0 = arith.constant 0 : i32
    %c0_i32_1 = arith.constant 0 : i32
    return %c0_i32, %c0_i32_0 : i32, i32
  }
  func.func @transform_3(%arg0: i32, %arg1: memref<2xi32, #tpu.memory_space<smem>>) -> (i32, i32) {
    %c0_i32 = arith.constant 0 : i32
    %c0_i32_0 = arith.constant 0 : i32
    %c0_i32_1 = arith.constant 0 : i32
    return %c0_i32, %c0_i32_0 : i32, i32
  }
  func.func @transform_4(%arg0: i32, %arg1: memref<2xi32, #tpu.memory_space<smem>>) -> (i32, i32) {
    %c0_i32 = arith.constant 0 : i32
    %c0_i32_0 = arith.constant 0 : i32
    %c0_i32_1 = arith.constant 0 : i32
    return %c0_i32, %c0_i32_0 : i32, i32
  }
  func.func @transform_5(%arg0: i32, %arg1: memref<2xi32, #tpu.memory_space<smem>>) -> (i32, i32) {
    %c0_i32 = arith.constant 0 : i32
    %c0_i32_0 = arith.constant 0 : i32
    %c0_i32_1 = arith.constant 0 : i32
    return %c0_i32, %c0_i32_0 : i32, i32
  }
  func.func @transform_6(%arg0: i32, %arg1: memref<2xi32, #tpu.memory_space<smem>>) -> (i32, i32) {
    %c0_i32 = arith.constant 0 : i32
    %c0_i32_0 = arith.constant 0 : i32
    %c0_i32_1 = arith.constant 0 : i32
    return %c0_i32, %c0_i32_0 : i32, i32
  }
  func.func @transform_7(%arg0: i32, %arg1: memref<2xi32, #tpu.memory_space<smem>>) -> (i32, i32, i32) {
    %c0_i32 = arith.constant 0 : i32
    %c0_i32_0 = arith.constant 0 : i32
    %c0_i32_1 = arith.constant 0 : i32
    return %arg0, %c0_i32, %c0_i32_0 : i32, i32, i32
  }
}

module attributes {stable_mosaic.version = 11 : i64} {
  func.func @_ffn_block_kernel(%arg0: memref<12x64xf32, #tpu.memory_space<vmem>>, %arg1: memref<64x128xbf16, #tpu.memory_space<vmem>>, %arg2: memref<1x128xf32, #tpu.memory_space<vmem>>, %arg3: memref<128x64xbf16, #tpu.memory_space<vmem>>, %arg4: memref<1x64xf32, #tpu.memory_space<vmem>>, %arg5: memref<1x64xf32, #tpu.memory_space<vmem>>, %arg6: memref<1x64xf32, #tpu.memory_space<vmem>>, %arg7: memref<1x64xf32, #tpu.memory_space<vmem>>, %arg8: memref<1x64xf32, #tpu.memory_space<vmem>>, %arg9: memref<12x64xf32, #tpu.memory_space<vmem>>) attributes {dimension_semantics = [], scalar_prefetch = 0 : i64, scratch_operands = 0 : i64, tpu.core_type = #tpu.core_type<tc>} {
    %c0 = arith.constant 0 : index
    %c0_0 = arith.constant 0 : index
    %0 = vector.load %arg0[%c0, %c0_0] : memref<12x64xf32, #tpu.memory_space<vmem>>, vector<12x64xf32>
    %1 = arith.truncf %0 : vector<12x64xf32> to vector<12x64xbf16>
    %c0_1 = arith.constant 0 : index
    %c0_2 = arith.constant 0 : index
    %2 = vector.load %arg1[%c0_1, %c0_2] : memref<64x128xbf16, #tpu.memory_space<vmem>>, vector<64x128xbf16>
    %cst = arith.constant dense<0.000000e+00> : vector<12x128xf32>
    %3 = tpu.matmul %1, %2, %cst {dimension_numbers = #tpu.dot_dimension_numbers<[1], [0], [0], [1], [0, 0, 1, 1], [], []>} : vector<12x64xbf16>, vector<64x128xbf16>, vector<12x128xf32> -> vector<12x128xf32>
    %c0_3 = arith.constant 0 : index
    %c0_4 = arith.constant 0 : index
    %4 = vector.load %arg2[%c0_3, %c0_4] : memref<1x128xf32, #tpu.memory_space<vmem>>, vector<1x128xf32>
    %5 = vector.broadcast %4 : vector<1x128xf32> to vector<12x128xf32>
    %6 = arith.addf %3, %5 : vector<12x128xf32>
    %cst_5 = arith.constant 5.000000e-01 : f32
    %7 = vector.broadcast %cst_5 : f32 to vector<12x128xf32>
    %8 = arith.mulf %7, %6 : vector<12x128xf32>
    %cst_6 = arith.constant 4.471500e-02 : f32
    %9 = vector.broadcast %cst_6 : f32 to vector<12x128xf32>
    %10 = arith.mulf %9, %6 : vector<12x128xf32>
    %11 = arith.mulf %10, %6 : vector<12x128xf32>
    %12 = arith.mulf %11, %6 : vector<12x128xf32>
    %13 = arith.addf %6, %12 : vector<12x128xf32>
    %cst_7 = arith.constant 0.797884583 : f32
    %14 = vector.broadcast %cst_7 : f32 to vector<12x128xf32>
    %15 = arith.mulf %14, %13 : vector<12x128xf32>
    %16 = math.tanh %15 : vector<12x128xf32>
    %cst_8 = arith.constant 1.000000e+00 : f32
    %17 = vector.broadcast %cst_8 : f32 to vector<12x128xf32>
    %18 = arith.addf %17, %16 : vector<12x128xf32>
    %19 = arith.mulf %8, %18 : vector<12x128xf32>
    %20 = arith.truncf %19 : vector<12x128xf32> to vector<12x128xbf16>
    %c0_9 = arith.constant 0 : index
    %c0_10 = arith.constant 0 : index
    %21 = vector.load %arg3[%c0_9, %c0_10] : memref<128x64xbf16, #tpu.memory_space<vmem>>, vector<128x64xbf16>
    %cst_11 = arith.constant dense<0.000000e+00> : vector<12x64xf32>
    %22 = tpu.matmul %20, %21, %cst_11 {dimension_numbers = #tpu.dot_dimension_numbers<[1], [0], [0], [1], [0, 0, 1, 1], [], []>} : vector<12x128xbf16>, vector<128x64xbf16>, vector<12x64xf32> -> vector<12x64xf32>
    %c0_12 = arith.constant 0 : index
    %c0_13 = arith.constant 0 : index
    %23 = vector.load %arg4[%c0_12, %c0_13] : memref<1x64xf32, #tpu.memory_space<vmem>>, vector<1x64xf32>
    %24 = vector.broadcast %23 : vector<1x64xf32> to vector<12x64xf32>
    %25 = arith.addf %22, %24 : vector<12x64xf32>
    %26 = arith.addf %0, %25 : vector<12x64xf32>
    %c0_14 = arith.constant 0 : index
    %c0_15 = arith.constant 0 : index
    %27 = vector.load %arg5[%c0_14, %c0_15] : memref<1x64xf32, #tpu.memory_space<vmem>>, vector<1x64xf32>
    %c0_16 = arith.constant 0 : index
    %c0_17 = arith.constant 0 : index
    %28 = vector.load %arg6[%c0_16, %c0_17] : memref<1x64xf32, #tpu.memory_space<vmem>>, vector<1x64xf32>
    %cst_18 = arith.constant dense<0.000000e+00> : vector<12xf32>
    %29 = vector.multi_reduction <add>, %26, %cst_18 [1] : vector<12x64xf32> to vector<12xf32>
    %30 = vector.shape_cast %29 : vector<12xf32> to vector<12x1xf32>
    %cst_19 = arith.constant 6.400000e+01 : f32
    %31 = vector.broadcast %cst_19 : f32 to vector<12x1xf32>
    %32 = arith.divf %30, %31 : vector<12x1xf32>
    %33 = vector.broadcast %32 : vector<12x1xf32> to vector<12x64xf32>
    %34 = arith.subf %26, %33 : vector<12x64xf32>
    %35 = arith.mulf %34, %34 : vector<12x64xf32>
    %cst_20 = arith.constant dense<0.000000e+00> : vector<12xf32>
    %36 = vector.multi_reduction <add>, %35, %cst_20 [1] : vector<12x64xf32> to vector<12xf32>
    %37 = vector.shape_cast %36 : vector<12xf32> to vector<12x1xf32>
    %cst_21 = arith.constant 6.400000e+01 : f32
    %38 = vector.broadcast %cst_21 : f32 to vector<12x1xf32>
    %39 = arith.divf %37, %38 : vector<12x1xf32>
    %cst_22 = arith.constant 9.99999974E-6 : f32
    %40 = vector.broadcast %cst_22 : f32 to vector<12x1xf32>
    %41 = arith.addf %39, %40 : vector<12x1xf32>
    %42 = math.rsqrt %41 : vector<12x1xf32>
    %43 = vector.broadcast %42 : vector<12x1xf32> to vector<12x64xf32>
    %44 = arith.mulf %34, %43 : vector<12x64xf32>
    %45 = vector.broadcast %27 : vector<1x64xf32> to vector<12x64xf32>
    %46 = arith.mulf %44, %45 : vector<12x64xf32>
    %47 = vector.broadcast %28 : vector<1x64xf32> to vector<12x64xf32>
    %48 = arith.addf %46, %47 : vector<12x64xf32>
    %c0_23 = arith.constant 0 : index
    %c0_24 = arith.constant 0 : index
    %49 = vector.load %arg7[%c0_23, %c0_24] : memref<1x64xf32, #tpu.memory_space<vmem>>, vector<1x64xf32>
    %c0_25 = arith.constant 0 : index
    %c0_26 = arith.constant 0 : index
    %50 = vector.load %arg8[%c0_25, %c0_26] : memref<1x64xf32, #tpu.memory_space<vmem>>, vector<1x64xf32>
    %cst_27 = arith.constant dense<0.000000e+00> : vector<12xf32>
    %51 = vector.multi_reduction <add>, %48, %cst_27 [1] : vector<12x64xf32> to vector<12xf32>
    %52 = vector.shape_cast %51 : vector<12xf32> to vector<12x1xf32>
    %cst_28 = arith.constant 6.400000e+01 : f32
    %53 = vector.broadcast %cst_28 : f32 to vector<12x1xf32>
    %54 = arith.divf %52, %53 : vector<12x1xf32>
    %55 = vector.broadcast %54 : vector<12x1xf32> to vector<12x64xf32>
    %56 = arith.subf %48, %55 : vector<12x64xf32>
    %57 = arith.mulf %56, %56 : vector<12x64xf32>
    %cst_29 = arith.constant dense<0.000000e+00> : vector<12xf32>
    %58 = vector.multi_reduction <add>, %57, %cst_29 [1] : vector<12x64xf32> to vector<12xf32>
    %59 = vector.shape_cast %58 : vector<12xf32> to vector<12x1xf32>
    %cst_30 = arith.constant 6.400000e+01 : f32
    %60 = vector.broadcast %cst_30 : f32 to vector<12x1xf32>
    %61 = arith.divf %59, %60 : vector<12x1xf32>
    %cst_31 = arith.constant 9.99999974E-6 : f32
    %62 = vector.broadcast %cst_31 : f32 to vector<12x1xf32>
    %63 = arith.addf %61, %62 : vector<12x1xf32>
    %64 = math.rsqrt %63 : vector<12x1xf32>
    %65 = vector.broadcast %64 : vector<12x1xf32> to vector<12x64xf32>
    %66 = arith.mulf %56, %65 : vector<12x64xf32>
    %67 = vector.broadcast %49 : vector<1x64xf32> to vector<12x64xf32>
    %68 = arith.mulf %66, %67 : vector<12x64xf32>
    %69 = vector.broadcast %50 : vector<1x64xf32> to vector<12x64xf32>
    %70 = arith.addf %68, %69 : vector<12x64xf32>
    %c0_32 = arith.constant 0 : index
    %c0_33 = arith.constant 0 : index
    %71 = vector.load %arg9[%c0_32, %c0_33] : memref<12x64xf32, #tpu.memory_space<vmem>>, vector<12x64xf32>
    tpu.vector_store %arg9[%c0_32, %c0_33], %70 {strides = array<i32>} : memref<12x64xf32, #tpu.memory_space<vmem>>, vector<12x64xf32>,
    return
  }
}

module attributes {stable_mosaic.version = 11 : i64} {
  func.func @_attn_block_kernel(%arg0: i32, %arg1: memref<4xi32, #tpu.memory_space<smem>>, %arg2: memref<1x3x64xf32, #tpu.memory_space<vmem>>, %arg3: memref<64x192xbf16, #tpu.memory_space<vmem>>, %arg4: memref<1x192xf32, #tpu.memory_space<vmem>>, %arg5: memref<64x64xbf16, #tpu.memory_space<vmem>>, %arg6: memref<1x64xf32, #tpu.memory_space<vmem>>, %arg7: memref<1x64xf32, #tpu.memory_space<vmem>>, %arg8: memref<1x64xf32, #tpu.memory_space<vmem>>, %arg9: memref<1x3x64xf32, #tpu.memory_space<vmem>>) attributes {dimension_semantics = [#tpu.dimension_semantics<parallel>], iteration_bounds = array<i64: 4>, scalar_prefetch = 1 : i64, scratch_operands = 0 : i64, tpu.core_type = #tpu.core_type<tc>, window_params = [{transform_indices = @transform_0, window_bounds = array<i64: 1, 3, 64>}, {pipeline_mode = #tpu.pipeline_mode<synchronous>, transform_indices = @transform_1, window_bounds = array<i64: 64, 192>}, {pipeline_mode = #tpu.pipeline_mode<synchronous>, transform_indices = @transform_2, window_bounds = array<i64: 1, 192>}, {pipeline_mode = #tpu.pipeline_mode<synchronous>, transform_indices = @transform_3, window_bounds = array<i64: 64, 64>}, {pipeline_mode = #tpu.pipeline_mode<synchronous>, transform_indices = @transform_4, window_bounds = array<i64: 1, 64>}, {pipeline_mode = #tpu.pipeline_mode<synchronous>, transform_indices = @transform_5, window_bounds = array<i64: 1, 64>}, {pipeline_mode = #tpu.pipeline_mode<synchronous>, transform_indices = @transform_6, window_bounds = array<i64: 1, 64>}, {transform_indices = @transform_7, window_bounds = array<i64: 1, 3, 64>}]} {
    %c0 = arith.constant 0 : index
    %c0_0 = arith.constant 0 : index
    %c0_1 = arith.constant 0 : index
    %0 = vector.load %arg2[%c0, %c0_0, %c0_1] : memref<1x3x64xf32, #tpu.memory_space<vmem>>, vector<1x3x64xf32>
    %1 = vector.shape_cast %0 : vector<1x3x64xf32> to vector<3x64xf32>
    %2 = arith.truncf %1 : vector<3x64xf32> to vector<3x64xbf16>
    %c0_2 = arith.constant 0 : index
    %c0_3 = arith.constant 0 : index
    %3 = vector.load %arg3[%c0_2, %c0_3] : memref<64x192xbf16, #tpu.memory_space<vmem>>, vector<64x192xbf16>
    %cst = arith.constant dense<0.000000e+00> : vector<3x192xf32>
    %4 = tpu.matmul %2, %3, %cst {dimension_numbers = #tpu.dot_dimension_numbers<[1], [0], [0], [1], [0, 0, 1, 1], [], []>} : vector<3x64xbf16>, vector<64x192xbf16>, vector<3x192xf32> -> vector<3x192xf32>
    %c0_4 = arith.constant 0 : index
    %c0_5 = arith.constant 0 : index
    %5 = vector.load %arg4[%c0_4, %c0_5] : memref<1x192xf32, #tpu.memory_space<vmem>>, vector<1x192xf32>
    %6 = vector.broadcast %5 : vector<1x192xf32> to vector<3x192xf32>
    %7 = arith.addf %4, %6 : vector<3x192xf32>
    %8 = arith.index_cast %arg0 : i32 to index
    %9 = memref.load %arg1[%8] : memref<4xi32, #tpu.memory_space<smem>>
    %10 = tpu.iota {dimensions = array<i32: 0>} : vector<3x3xi32>
    %11 = tpu.iota {dimensions = array<i32: 1>} : vector<3x3xi32>
    %12 = arith.cmpi sle, %11, %10 : vector<3x3xi32>
    %13 = vector.broadcast %9 : i32 to vector<3x3xi32>
    %14 = arith.cmpi slt, %11, %13 : vector<3x3xi32>
    %15 = arith.andi %12, %14 : vector<3x3xi1>
    %cst_6 = arith.constant 0.000000e+00 : f32
    %cst_7 = arith.constant -1.000000e+30 : f32
    %16 = vector.broadcast %cst_6 : f32 to vector<3x3xf32>
    %17 = vector.broadcast %cst_7 : f32 to vector<3x3xf32>
    %18 = arith.select %15, %16, %17 : vector<3x3xi1>, vector<3x3xf32>
    %19 = vector.extract_strided_slice %7 {offsets = [0, 0], sizes = [3, 16], strides = [1, 1]} : vector<3x192xf32> to vector<3x16xf32>
    %cst_8 = arith.constant 2.500000e-01 : f32
    %20 = vector.broadcast %cst_8 : f32 to vector<3x16xf32>
    %21 = arith.mulf %19, %20 : vector<3x16xf32>
    %22 = vector.extract_strided_slice %7 {offsets = [0, 64], sizes = [3, 16], strides = [1, 1]} : vector<3x192xf32> to vector<3x16xf32>
    %23 = vector.extract_strided_slice %7 {offsets = [0, 128], sizes = [3, 16], strides = [1, 1]} : vector<3x192xf32> to vector<3x16xf32>
    %24 = arith.truncf %21 : vector<3x16xf32> to vector<3x16xbf16>
    %25 = arith.truncf %22 : vector<3x16xf32> to vector<3x16xbf16>
    %cst_9 = arith.constant dense<0.000000e+00> : vector<3x3xf32>
    %26 = tpu.matmul %24, %25, %cst_9 {dimension_numbers = #tpu.dot_dimension_numbers<[1], [1], [0], [0], [0, 0, 1, 0], [], []>} : vector<3x16xbf16>, vector<3x16xbf16>, vector<3x3xf32> -> vector<3x3xf32>
    %27 = arith.addf %26, %18 : vector<3x3xf32>
    %cst_10 = arith.constant dense<0xFF800000> : vector<3xf32>
    %28 = vector.multi_reduction <maximumf>, %27, %cst_10 [1] : vector<3x3xf32> to vector<3xf32>
    %29 = vector.shape_cast %28 : vector<3xf32> to vector<3x1xf32>
    %30 = vector.broadcast %29 : vector<3x1xf32> to vector<3x3xf32>
    %31 = arith.subf %27, %30 : vector<3x3xf32>
    %32 = math.exp %31 : vector<3x3xf32>
    %cst_11 = arith.constant dense<0.000000e+00> : vector<3xf32>
    %33 = vector.multi_reduction <add>, %32, %cst_11 [1] : vector<3x3xf32> to vector<3xf32>
    %34 = vector.shape_cast %33 : vector<3xf32> to vector<3x1xf32>
    %35 = tpu.reciprocal %34 {approx = true} : vector<3x1xf32> -> vector<3x1xf32>
    %36 = vector.broadcast %35 : vector<3x1xf32> to vector<3x3xf32>
    %37 = arith.mulf %32, %36 : vector<3x3xf32>
    %38 = arith.truncf %37 : vector<3x3xf32> to vector<3x3xbf16>
    %39 = arith.truncf %23 : vector<3x16xf32> to vector<3x16xbf16>
    %cst_12 = arith.constant dense<0.000000e+00> : vector<3x16xf32>
    %40 = tpu.matmul %38, %39, %cst_12 {dimension_numbers = #tpu.dot_dimension_numbers<[1], [0], [0], [1], [0, 0, 1, 1], [], []>} : vector<3x3xbf16>, vector<3x16xbf16>, vector<3x16xf32> -> vector<3x16xf32>
    %41 = vector.extract_strided_slice %7 {offsets = [0, 16], sizes = [3, 16], strides = [1, 1]} : vector<3x192xf32> to vector<3x16xf32>
    %cst_13 = arith.constant 2.500000e-01 : f32
    %42 = vector.broadcast %cst_13 : f32 to vector<3x16xf32>
    %43 = arith.mulf %41, %42 : vector<3x16xf32>
    %44 = vector.extract_strided_slice %7 {offsets = [0, 80], sizes = [3, 16], strides = [1, 1]} : vector<3x192xf32> to vector<3x16xf32>
    %45 = vector.extract_strided_slice %7 {offsets = [0, 144], sizes = [3, 16], strides = [1, 1]} : vector<3x192xf32> to vector<3x16xf32>
    %46 = arith.truncf %43 : vector<3x16xf32> to vector<3x16xbf16>
    %47 = arith.truncf %44 : vector<3x16xf32> to vector<3x16xbf16>
    %cst_14 = arith.constant dense<0.000000e+00> : vector<3x3xf32>
    %48 = tpu.matmul %46, %47, %cst_14 {dimension_numbers = #tpu.dot_dimension_numbers<[1], [1], [0], [0], [0, 0, 1, 0], [], []>} : vector<3x16xbf16>, vector<3x16xbf16>, vector<3x3xf32> -> vector<3x3xf32>
    %49 = arith.addf %48, %18 : vector<3x3xf32>
    %cst_15 = arith.constant dense<0xFF800000> : vector<3xf32>
    %50 = vector.multi_reduction <maximumf>, %49, %cst_15 [1] : vector<3x3xf32> to vector<3xf32>
    %51 = vector.shape_cast %50 : vector<3xf32> to vector<3x1xf32>
    %52 = vector.broadcast %51 : vector<3x1xf32> to vector<3x3xf32>
    %53 = arith.subf %49, %52 : vector<3x3xf32>
    %54 = math.exp %53 : vector<3x3xf32>
    %cst_16 = arith.constant dense<0.000000e+00> : vector<3xf32>
    %55 = vector.multi_reduction <add>, %54, %cst_16 [1] : vector<3x3xf32> to vector<3xf32>
    %56 = vector.shape_cast %55 : vector<3xf32> to vector<3x1xf32>
    %57 = tpu.reciprocal %56 {approx = true} : vector<3x1xf32> -> vector<3x1xf32>
    %58 = vector.broadcast %57 : vector<3x1xf32> to vector<3x3xf32>
    %59 = arith.mulf %54, %58 : vector<3x3xf32>
    %60 = arith.truncf %59 : vector<3x3xf32> to vector<3x3xbf16>
    %61 = arith.truncf %45 : vector<3x16xf32> to vector<3x16xbf16>
    %cst_17 = arith.constant dense<0.000000e+00> : vector<3x16xf32>
    %62 = tpu.matmul %60, %61, %cst_17 {dimension_numbers = #tpu.dot_dimension_numbers<[1], [0], [0], [1], [0, 0, 1, 1], [], []>} : vector<3x3xbf16>, vector<3x16xbf16>, vector<3x16xf32> -> vector<3x16xf32>
    %63 = vector.extract_strided_slice %7 {offsets = [0, 32], sizes = [3, 16], strides = [1, 1]} : vector<3x192xf32> to vector<3x16xf32>
    %cst_18 = arith.constant 2.500000e-01 : f32
    %64 = vector.broadcast %cst_18 : f32 to vector<3x16xf32>
    %65 = arith.mulf %63, %64 : vector<3x16xf32>
    %66 = vector.extract_strided_slice %7 {offsets = [0, 96], sizes = [3, 16], strides = [1, 1]} : vector<3x192xf32> to vector<3x16xf32>
    %67 = vector.extract_strided_slice %7 {offsets = [0, 160], sizes = [3, 16], strides = [1, 1]} : vector<3x192xf32> to vector<3x16xf32>
    %68 = arith.truncf %65 : vector<3x16xf32> to vector<3x16xbf16>
    %69 = arith.truncf %66 : vector<3x16xf32> to vector<3x16xbf16>
    %cst_19 = arith.constant dense<0.000000e+00> : vector<3x3xf32>
    %70 = tpu.matmul %68, %69, %cst_19 {dimension_numbers = #tpu.dot_dimension_numbers<[1], [1], [0], [0], [0, 0, 1, 0], [], []>} : vector<3x16xbf16>, vector<3x16xbf16>, vector<3x3xf32> -> vector<3x3xf32>
    %71 = arith.addf %70, %18 : vector<3x3xf32>
    %cst_20 = arith.constant dense<0xFF800000> : vector<3xf32>
    %72 = vector.multi_reduction <maximumf>, %71, %cst_20 [1] : vector<3x3xf32> to vector<3xf32>
    %73 = vector.shape_cast %72 : vector<3xf32> to vector<3x1xf32>
    %74 = vector.broadcast %73 : vector<3x1xf32> to vector<3x3xf32>
    %75 = arith.subf %71, %74 : vector<3x3xf32>
    %76 = math.exp %75 : vector<3x3xf32>
    %cst_21 = arith.constant dense<0.000000e+00> : vector<3xf32>
    %77 = vector.multi_reduction <add>, %76, %cst_21 [1] : vector<3x3xf32> to vector<3xf32>
    %78 = vector.shape_cast %77 : vector<3xf32> to vector<3x1xf32>
    %79 = tpu.reciprocal %78 {approx = true} : vector<3x1xf32> -> vector<3x1xf32>
    %80 = vector.broadcast %79 : vector<3x1xf32> to vector<3x3xf32>
    %81 = arith.mulf %76, %80 : vector<3x3xf32>
    %82 = arith.truncf %81 : vector<3x3xf32> to vector<3x3xbf16>
    %83 = arith.truncf %67 : vector<3x16xf32> to vector<3x16xbf16>
    %cst_22 = arith.constant dense<0.000000e+00> : vector<3x16xf32>
    %84 = tpu.matmul %82, %83, %cst_22 {dimension_numbers = #tpu.dot_dimension_numbers<[1], [0], [0], [1], [0, 0, 1, 1], [], []>} : vector<3x3xbf16>, vector<3x16xbf16>, vector<3x16xf32> -> vector<3x16xf32>
    %85 = vector.extract_strided_slice %7 {offsets = [0, 48], sizes = [3, 16], strides = [1, 1]} : vector<3x192xf32> to vector<3x16xf32>
    %cst_23 = arith.constant 2.500000e-01 : f32
    %86 = vector.broadcast %cst_23 : f32 to vector<3x16xf32>
    %87 = arith.mulf %85, %86 : vector<3x16xf32>
    %88 = vector.extract_strided_slice %7 {offsets = [0, 112], sizes = [3, 16], strides = [1, 1]} : vector<3x192xf32> to vector<3x16xf32>
    %89 = vector.extract_strided_slice %7 {offsets = [0, 176], sizes = [3, 16], strides = [1, 1]} : vector<3x192xf32> to vector<3x16xf32>
    %90 = arith.truncf %87 : vector<3x16xf32> to vector<3x16xbf16>
    %91 = arith.truncf %88 : vector<3x16xf32> to vector<3x16xbf16>
    %cst_24 = arith.constant dense<0.000000e+00> : vector<3x3xf32>
    %92 = tpu.matmul %90, %91, %cst_24 {dimension_numbers = #tpu.dot_dimension_numbers<[1], [1], [0], [0], [0, 0, 1, 0], [], []>} : vector<3x16xbf16>, vector<3x16xbf16>, vector<3x3xf32> -> vector<3x3xf32>
    %93 = arith.addf %92, %18 : vector<3x3xf32>
    %cst_25 = arith.constant dense<0xFF800000> : vector<3xf32>
    %94 = vector.multi_reduction <maximumf>, %93, %cst_25 [1] : vector<3x3xf32> to vector<3xf32>
    %95 = vector.shape_cast %94 : vector<3xf32> to vector<3x1xf32>
    %96 = vector.broadcast %95 : vector<3x1xf32> to vector<3x3xf32>
    %97 = arith.subf %93, %96 : vector<3x3xf32>
    %98 = math.exp %97 : vector<3x3xf32>
    %cst_26 = arith.constant dense<0.000000e+00> : vector<3xf32>
    %99 = vector.multi_reduction <add>, %98, %cst_26 [1] : vector<3x3xf32> to vector<3xf32>
    %100 = vector.shape_cast %99 : vector<3xf32> to vector<3x1xf32>
    %101 = tpu.reciprocal %100 {approx = true} : vector<3x1xf32> -> vector<3x1xf32>
    %102 = vector.broadcast %101 : vector<3x1xf32> to vector<3x3xf32>
    %103 = arith.mulf %98, %102 : vector<3x3xf32>
    %104 = arith.truncf %103 : vector<3x3xf32> to vector<3x3xbf16>
    %105 = arith.truncf %89 : vector<3x16xf32> to vector<3x16xbf16>
    %cst_27 = arith.constant dense<0.000000e+00> : vector<3x16xf32>
    %106 = tpu.matmul %104, %105, %cst_27 {dimension_numbers = #tpu.dot_dimension_numbers<[1], [0], [0], [1], [0, 0, 1, 1], [], []>} : vector<3x3xbf16>, vector<3x16xbf16>, vector<3x16xf32> -> vector<3x16xf32>
    %107 = tpu.concatenate %40, %62, %84, %106 in 1 : vector<3x16xf32>, vector<3x16xf32>, vector<3x16xf32>, vector<3x16xf32> -> vector<3x64xf32>
    %108 = arith.truncf %107 : vector<3x64xf32> to vector<3x64xbf16>
    %c0_28 = arith.constant 0 : index
    %c0_29 = arith.constant 0 : index
    %109 = vector.load %arg5[%c0_28, %c0_29] : memref<64x64xbf16, #tpu.memory_space<vmem>>, vector<64x64xbf16>
    %cst_30 = arith.constant dense<0.000000e+00> : vector<3x64xf32>
    %110 = tpu.matmul %108, %109, %cst_30 {dimension_numbers = #tpu.dot_dimension_numbers<[1], [0], [0], [1], [0, 0, 1, 1], [], []>} : vector<3x64xbf16>, vector<64x64xbf16>, vector<3x64xf32> -> vector<3x64xf32>
    %c0_31 = arith.constant 0 : index
    %c0_32 = arith.constant 0 : index
    %111 = vector.load %arg6[%c0_31, %c0_32] : memref<1x64xf32, #tpu.memory_space<vmem>>, vector<1x64xf32>
    %112 = vector.broadcast %111 : vector<1x64xf32> to vector<3x64xf32>
    %113 = arith.addf %110, %112 : vector<3x64xf32>
    %114 = arith.addf %1, %113 : vector<3x64xf32>
    %c0_33 = arith.constant 0 : index
    %c0_34 = arith.constant 0 : index
    %115 = vector.load %arg7[%c0_33, %c0_34] : memref<1x64xf32, #tpu.memory_space<vmem>>, vector<1x64xf32>
    %c0_35 = arith.constant 0 : index
    %c0_36 = arith.constant 0 : index
    %116 = vector.load %arg8[%c0_35, %c0_36] : memref<1x64xf32, #tpu.memory_space<vmem>>, vector<1x64xf32>
    %cst_37 = arith.constant dense<0.000000e+00> : vector<3xf32>
    %117 = vector.multi_reduction <add>, %114, %cst_37 [1] : vector<3x64xf32> to vector<3xf32>
    %118 = vector.shape_cast %117 : vector<3xf32> to vector<3x1xf32>
    %cst_38 = arith.constant 6.400000e+01 : f32
    %119 = vector.broadcast %cst_38 : f32 to vector<3x1xf32>
    %120 = arith.divf %118, %119 : vector<3x1xf32>
    %121 = vector.broadcast %120 : vector<3x1xf32> to vector<3x64xf32>
    %122 = arith.subf %114, %121 : vector<3x64xf32>
    %123 = arith.mulf %122, %122 : vector<3x64xf32>
    %cst_39 = arith.constant dense<0.000000e+00> : vector<3xf32>
    %124 = vector.multi_reduction <add>, %123, %cst_39 [1] : vector<3x64xf32> to vector<3xf32>
    %125 = vector.shape_cast %124 : vector<3xf32> to vector<3x1xf32>
    %cst_40 = arith.constant 6.400000e+01 : f32
    %126 = vector.broadcast %cst_40 : f32 to vector<3x1xf32>
    %127 = arith.divf %125, %126 : vector<3x1xf32>
    %cst_41 = arith.constant 9.99999974E-6 : f32
    %128 = vector.broadcast %cst_41 : f32 to vector<3x1xf32>
    %129 = arith.addf %127, %128 : vector<3x1xf32>
    %130 = math.rsqrt %129 : vector<3x1xf32>
    %131 = vector.broadcast %130 : vector<3x1xf32> to vector<3x64xf32>
    %132 = arith.mulf %122, %131 : vector<3x64xf32>
    %133 = vector.broadcast %115 : vector<1x64xf32> to vector<3x64xf32>
    %134 = arith.mulf %132, %133 : vector<3x64xf32>
    %135 = vector.broadcast %116 : vector<1x64xf32> to vector<3x64xf32>
    %136 = arith.addf %134, %135 : vector<3x64xf32>
    %c0_42 = arith.constant 0 : index
    %c0_43 = arith.constant 0 : index
    %c0_44 = arith.constant 0 : index
    %137 = vector.load %arg9[%c0_42, %c0_43, %c0_44] : memref<1x3x64xf32, #tpu.memory_space<vmem>>, vector<1x3x64xf32>
    %138 = vector.shape_cast %137 : vector<1x3x64xf32> to vector<3x64xf32>
    %139 = vector.shape_cast %136 : vector<3x64xf32> to vector<1x3x64xf32>
    tpu.vector_store %arg9[%c0_42, %c0_43, %c0_44], %139 {strides = array<i32>} : memref<1x3x64xf32, #tpu.memory_space<vmem>>, vector<1x3x64xf32>,
    return
  }
  func.func @transform_0(%arg0: i32, %arg1: memref<4xi32, #tpu.memory_space<smem>>) -> (i32, i32, i32) {
    %c0_i32 = arith.constant 0 : i32
    %c0_i32_0 = arith.constant 0 : i32
    %c0_i32_1 = arith.constant 0 : i32
    return %arg0, %c0_i32, %c0_i32_0 : i32, i32, i32
  }
  func.func @transform_1(%arg0: i32, %arg1: memref<4xi32, #tpu.memory_space<smem>>) -> (i32, i32) {
    %c0_i32 = arith.constant 0 : i32
    %c0_i32_0 = arith.constant 0 : i32
    %c0_i32_1 = arith.constant 0 : i32
    return %c0_i32, %c0_i32_0 : i32, i32
  }
  func.func @transform_2(%arg0: i32, %arg1: memref<4xi32, #tpu.memory_space<smem>>) -> (i32, i32) {
    %c0_i32 = arith.constant 0 : i32
    %c0_i32_0 = arith.constant 0 : i32
    %c0_i32_1 = arith.constant 0 : i32
    return %c0_i32, %c0_i32_0 : i32, i32
  }
  func.func @transform_3(%arg0: i32, %arg1: memref<4xi32, #tpu.memory_space<smem>>) -> (i32, i32) {
    %c0_i32 = arith.constant 0 : i32
    %c0_i32_0 = arith.constant 0 : i32
    %c0_i32_1 = arith.constant 0 : i32
    return %c0_i32, %c0_i32_0 : i32, i32
  }
  func.func @transform_4(%arg0: i32, %arg1: memref<4xi32, #tpu.memory_space<smem>>) -> (i32, i32) {
    %c0_i32 = arith.constant 0 : i32
    %c0_i32_0 = arith.constant 0 : i32
    %c0_i32_1 = arith.constant 0 : i32
    return %c0_i32, %c0_i32_0 : i32, i32
  }
  func.func @transform_5(%arg0: i32, %arg1: memref<4xi32, #tpu.memory_space<smem>>) -> (i32, i32) {
    %c0_i32 = arith.constant 0 : i32
    %c0_i32_0 = arith.constant 0 : i32
    %c0_i32_1 = arith.constant 0 : i32
    return %c0_i32, %c0_i32_0 : i32, i32
  }
  func.func @transform_6(%arg0: i32, %arg1: memref<4xi32, #tpu.memory_space<smem>>) -> (i32, i32) {
    %c0_i32 = arith.constant 0 : i32
    %c0_i32_0 = arith.constant 0 : i32
    %c0_i32_1 = arith.constant 0 : i32
    return %c0_i32, %c0_i32_0 : i32, i32
  }
  func.func @transform_7(%arg0: i32, %arg1: memref<4xi32, #tpu.memory_space<smem>>) -> (i32, i32, i32) {
    %c0_i32 = arith.constant 0 : i32
    %c0_i32_0 = arith.constant 0 : i32
    %c0_i32_1 = arith.constant 0 : i32
    return %arg0, %c0_i32, %c0_i32_0 : i32, i32, i32
  }
}

module attributes {stable_mosaic.version = 11 : i64} {
  func.func @_attn_block_kernel(%arg0: i32, %arg1: memref<2xi32, #tpu.memory_space<smem>>, %arg2: memref<1x2x64xf32, #tpu.memory_space<vmem>>, %arg3: memref<64x192xbf16, #tpu.memory_space<vmem>>, %arg4: memref<1x192xf32, #tpu.memory_space<vmem>>, %arg5: memref<64x64xbf16, #tpu.memory_space<vmem>>, %arg6: memref<1x64xf32, #tpu.memory_space<vmem>>, %arg7: memref<1x64xf32, #tpu.memory_space<vmem>>, %arg8: memref<1x64xf32, #tpu.memory_space<vmem>>, %arg9: memref<1x2x64xf32, #tpu.memory_space<vmem>>) attributes {dimension_semantics = [#tpu.dimension_semantics<parallel>], iteration_bounds = array<i64: 2>, scalar_prefetch = 1 : i64, scratch_operands = 0 : i64, tpu.core_type = #tpu.core_type<tc>, window_params = [{transform_indices = @transform_0, window_bounds = array<i64: 1, 2, 64>}, {pipeline_mode = #tpu.pipeline_mode<synchronous>, transform_indices = @transform_1, window_bounds = array<i64: 64, 192>}, {pipeline_mode = #tpu.pipeline_mode<synchronous>, transform_indices = @transform_2, window_bounds = array<i64: 1, 192>}, {pipeline_mode = #tpu.pipeline_mode<synchronous>, transform_indices = @transform_3, window_bounds = array<i64: 64, 64>}, {pipeline_mode = #tpu.pipeline_mode<synchronous>, transform_indices = @transform_4, window_bounds = array<i64: 1, 64>}, {pipeline_mode = #tpu.pipeline_mode<synchronous>, transform_indices = @transform_5, window_bounds = array<i64: 1, 64>}, {pipeline_mode = #tpu.pipeline_mode<synchronous>, transform_indices = @transform_6, window_bounds = array<i64: 1, 64>}, {transform_indices = @transform_7, window_bounds = array<i64: 1, 2, 64>}]} {
    %c0 = arith.constant 0 : index
    %c0_0 = arith.constant 0 : index
    %c0_1 = arith.constant 0 : index
    %0 = vector.load %arg2[%c0, %c0_0, %c0_1] : memref<1x2x64xf32, #tpu.memory_space<vmem>>, vector<1x2x64xf32>
    %1 = vector.shape_cast %0 : vector<1x2x64xf32> to vector<2x64xf32>
    %2 = arith.truncf %1 : vector<2x64xf32> to vector<2x64xbf16>
    %c0_2 = arith.constant 0 : index
    %c0_3 = arith.constant 0 : index
    %3 = vector.load %arg3[%c0_2, %c0_3] : memref<64x192xbf16, #tpu.memory_space<vmem>>, vector<64x192xbf16>
    %cst = arith.constant dense<0.000000e+00> : vector<2x192xf32>
    %4 = tpu.matmul %2, %3, %cst {dimension_numbers = #tpu.dot_dimension_numbers<[1], [0], [0], [1], [0, 0, 1, 1], [], []>} : vector<2x64xbf16>, vector<64x192xbf16>, vector<2x192xf32> -> vector<2x192xf32>
    %c0_4 = arith.constant 0 : index
    %c0_5 = arith.constant 0 : index
    %5 = vector.load %arg4[%c0_4, %c0_5] : memref<1x192xf32, #tpu.memory_space<vmem>>, vector<1x192xf32>
    %6 = vector.broadcast %5 : vector<1x192xf32> to vector<2x192xf32>
    %7 = arith.addf %4, %6 : vector<2x192xf32>
    %8 = arith.index_cast %arg0 : i32 to index
    %9 = memref.load %arg1[%8] : memref<2xi32, #tpu.memory_space<smem>>
    %10 = tpu.iota {dimensions = array<i32: 0>} : vector<2x2xi32>
    %11 = tpu.iota {dimensions = array<i32: 1>} : vector<2x2xi32>
    %12 = arith.cmpi sle, %11, %10 : vector<2x2xi32>
    %13 = vector.broadcast %9 : i32 to vector<2x2xi32>
    %14 = arith.cmpi slt, %11, %13 : vector<2x2xi32>
    %15 = arith.andi %12, %14 : vector<2x2xi1>
    %cst_6 = arith.constant 0.000000e+00 : f32
    %cst_7 = arith.constant -1.000000e+30 : f32
    %16 = vector.broadcast %cst_6 : f32 to vector<2x2xf32>
    %17 = vector.broadcast %cst_7 : f32 to vector<2x2xf32>
    %18 = arith.select %15, %16, %17 : vector<2x2xi1>, vector<2x2xf32>
    %19 = vector.extract_strided_slice %7 {offsets = [0, 0], sizes = [2, 16], strides = [1, 1]} : vector<2x192xf32> to vector<2x16xf32>
    %cst_8 = arith.constant 2.500000e-01 : f32
    %20 = vector.broadcast %cst_8 : f32 to vector<2x16xf32>
    %21 = arith.mulf %19, %20 : vector<2x16xf32>
    %22 = vector.extract_strided_slice %7 {offsets = [0, 64], sizes = [2, 16], strides = [1, 1]} : vector<2x192xf32> to vector<2x16xf32>
    %23 = vector.extract_strided_slice %7 {offsets = [0, 128], sizes = [2, 16], strides = [1, 1]} : vector<2x192xf32> to vector<2x16xf32>
    %24 = arith.truncf %21 : vector<2x16xf32> to vector<2x16xbf16>
    %25 = arith.truncf %22 : vector<2x16xf32> to vector<2x16xbf16>
    %cst_9 = arith.constant dense<0.000000e+00> : vector<2x2xf32>
    %26 = tpu.matmul %24, %25, %cst_9 {dimension_numbers = #tpu.dot_dimension_numbers<[1], [1], [0], [0], [0, 0, 1, 0], [], []>} : vector<2x16xbf16>, vector<2x16xbf16>, vector<2x2xf32> -> vector<2x2xf32>
    %27 = arith.addf %26, %18 : vector<2x2xf32>
    %cst_10 = arith.constant dense<0xFF800000> : vector<2xf32>
    %28 = vector.multi_reduction <maximumf>, %27, %cst_10 [1] : vector<2x2xf32> to vector<2xf32>
    %29 = vector.shape_cast %28 : vector<2xf32> to vector<2x1xf32>
    %30 = vector.broadcast %29 : vector<2x1xf32> to vector<2x2xf32>
    %31 = arith.subf %27, %30 : vector<2x2xf32>
    %32 = math.exp %31 : vector<2x2xf32>
    %cst_11 = arith.constant dense<0.000000e+00> : vector<2xf32>
    %33 = vector.multi_reduction <add>, %32, %cst_11 [1] : vector<2x2xf32> to vector<2xf32>
    %34 = vector.shape_cast %33 : vector<2xf32> to vector<2x1xf32>
    %35 = tpu.reciprocal %34 {approx = true} : vector<2x1xf32> -> vector<2x1xf32>
    %36 = vector.broadcast %35 : vector<2x1xf32> to vector<2x2xf32>
    %37 = arith.mulf %32, %36 : vector<2x2xf32>
    %38 = arith.truncf %37 : vector<2x2xf32> to vector<2x2xbf16>
    %39 = arith.truncf %23 : vector<2x16xf32> to vector<2x16xbf16>
    %cst_12 = arith.constant dense<0.000000e+00> : vector<2x16xf32>
    %40 = tpu.matmul %38, %39, %cst_12 {dimension_numbers = #tpu.dot_dimension_numbers<[1], [0], [0], [1], [0, 0, 1, 1], [], []>} : vector<2x2xbf16>, vector<2x16xbf16>, vector<2x16xf32> -> vector<2x16xf32>
    %41 = vector.extract_strided_slice %7 {offsets = [0, 16], sizes = [2, 16], strides = [1, 1]} : vector<2x192xf32> to vector<2x16xf32>
    %cst_13 = arith.constant 2.500000e-01 : f32
    %42 = vector.broadcast %cst_13 : f32 to vector<2x16xf32>
    %43 = arith.mulf %41, %42 : vector<2x16xf32>
    %44 = vector.extract_strided_slice %7 {offsets = [0, 80], sizes = [2, 16], strides = [1, 1]} : vector<2x192xf32> to vector<2x16xf32>
    %45 = vector.extract_strided_slice %7 {offsets = [0, 144], sizes = [2, 16], strides = [1, 1]} : vector<2x192xf32> to vector<2x16xf32>
    %46 = arith.truncf %43 : vector<2x16xf32> to vector<2x16xbf16>
    %47 = arith.truncf %44 : vector<2x16xf32> to vector<2x16xbf16>
    %cst_14 = arith.constant dense<0.000000e+00> : vector<2x2xf32>
    %48 = tpu.matmul %46, %47, %cst_14 {dimension_numbers = #tpu.dot_dimension_numbers<[1], [1], [0], [0], [0, 0, 1, 0], [], []>} : vector<2x16xbf16>, vector<2x16xbf16>, vector<2x2xf32> -> vector<2x2xf32>
    %49 = arith.addf %48, %18 : vector<2x2xf32>
    %cst_15 = arith.constant dense<0xFF800000> : vector<2xf32>
    %50 = vector.multi_reduction <maximumf>, %49, %cst_15 [1] : vector<2x2xf32> to vector<2xf32>
    %51 = vector.shape_cast %50 : vector<2xf32> to vector<2x1xf32>
    %52 = vector.broadcast %51 : vector<2x1xf32> to vector<2x2xf32>
    %53 = arith.subf %49, %52 : vector<2x2xf32>
    %54 = math.exp %53 : vector<2x2xf32>
    %cst_16 = arith.constant dense<0.000000e+00> : vector<2xf32>
    %55 = vector.multi_reduction <add>, %54, %cst_16 [1] : vector<2x2xf32> to vector<2xf32>
    %56 = vector.shape_cast %55 : vector<2xf32> to vector<2x1xf32>
    %57 = tpu.reciprocal %56 {approx = true} : vector<2x1xf32> -> vector<2x1xf32>
    %58 = vector.broadcast %57 : vector<2x1xf32> to vector<2x2xf32>
    %59 = arith.mulf %54, %58 : vector<2x2xf32>
    %60 = arith.truncf %59 : vector<2x2xf32> to vector<2x2xbf16>
    %61 = arith.truncf %45 : vector<2x16xf32> to vector<2x16xbf16>
    %cst_17 = arith.constant dense<0.000000e+00> : vector<2x16xf32>
    %62 = tpu.matmul %60, %61, %cst_17 {dimension_numbers = #tpu.dot_dimension_numbers<[1], [0], [0], [1], [0, 0, 1, 1], [], []>} : vector<2x2xbf16>, vector<2x16xbf16>, vector<2x16xf32> -> vector<2x16xf32>
    %63 = vector.extract_strided_slice %7 {offsets = [0, 32], sizes = [2, 16], strides = [1, 1]} : vector<2x192xf32> to vector<2x16xf32>
    %cst_18 = arith.constant 2.500000e-01 : f32
    %64 = vector.broadcast %cst_18 : f32 to vector<2x16xf32>
    %65 = arith.mulf %63, %64 : vector<2x16xf32>
    %66 = vector.extract_strided_slice %7 {offsets = [0, 96], sizes = [2, 16], strides = [1, 1]} : vector<2x192xf32> to vector<2x16xf32>
    %67 = vector.extract_strided_slice %7 {offsets = [0, 160], sizes = [2, 16], strides = [1, 1]} : vector<2x192xf32> to vector<2x16xf32>
    %68 = arith.truncf %65 : vector<2x16xf32> to vector<2x16xbf16>
    %69 = arith.truncf %66 : vector<2x16xf32> to vector<2x16xbf16>
    %cst_19 = arith.constant dense<0.000000e+00> : vector<2x2xf32>
    %70 = tpu.matmul %68, %69, %cst_19 {dimension_numbers = #tpu.dot_dimension_numbers<[1], [1], [0], [0], [0, 0, 1, 0], [], []>} : vector<2x16xbf16>, vector<2x16xbf16>, vector<2x2xf32> -> vector<2x2xf32>
    %71 = arith.addf %70, %18 : vector<2x2xf32>
    %cst_20 = arith.constant dense<0xFF800000> : vector<2xf32>
    %72 = vector.multi_reduction <maximumf>, %71, %cst_20 [1] : vector<2x2xf32> to vector<2xf32>
    %73 = vector.shape_cast %72 : vector<2xf32> to vector<2x1xf32>
    %74 = vector.broadcast %73 : vector<2x1xf32> to vector<2x2xf32>
    %75 = arith.subf %71, %74 : vector<2x2xf32>
    %76 = math.exp %75 : vector<2x2xf32>
    %cst_21 = arith.constant dense<0.000000e+00> : vector<2xf32>
    %77 = vector.multi_reduction <add>, %76, %cst_21 [1] : vector<2x2xf32> to vector<2xf32>
    %78 = vector.shape_cast %77 : vector<2xf32> to vector<2x1xf32>
    %79 = tpu.reciprocal %78 {approx = true} : vector<2x1xf32> -> vector<2x1xf32>
    %80 = vector.broadcast %79 : vector<2x1xf32> to vector<2x2xf32>
    %81 = arith.mulf %76, %80 : vector<2x2xf32>
    %82 = arith.truncf %81 : vector<2x2xf32> to vector<2x2xbf16>
    %83 = arith.truncf %67 : vector<2x16xf32> to vector<2x16xbf16>
    %cst_22 = arith.constant dense<0.000000e+00> : vector<2x16xf32>
    %84 = tpu.matmul %82, %83, %cst_22 {dimension_numbers = #tpu.dot_dimension_numbers<[1], [0], [0], [1], [0, 0, 1, 1], [], []>} : vector<2x2xbf16>, vector<2x16xbf16>, vector<2x16xf32> -> vector<2x16xf32>
    %85 = vector.extract_strided_slice %7 {offsets = [0, 48], sizes = [2, 16], strides = [1, 1]} : vector<2x192xf32> to vector<2x16xf32>
    %cst_23 = arith.constant 2.500000e-01 : f32
    %86 = vector.broadcast %cst_23 : f32 to vector<2x16xf32>
    %87 = arith.mulf %85, %86 : vector<2x16xf32>
    %88 = vector.extract_strided_slice %7 {offsets = [0, 112], sizes = [2, 16], strides = [1, 1]} : vector<2x192xf32> to vector<2x16xf32>
    %89 = vector.extract_strided_slice %7 {offsets = [0, 176], sizes = [2, 16], strides = [1, 1]} : vector<2x192xf32> to vector<2x16xf32>
    %90 = arith.truncf %87 : vector<2x16xf32> to vector<2x16xbf16>
    %91 = arith.truncf %88 : vector<2x16xf32> to vector<2x16xbf16>
    %cst_24 = arith.constant dense<0.000000e+00> : vector<2x2xf32>
    %92 = tpu.matmul %90, %91, %cst_24 {dimension_numbers = #tpu.dot_dimension_numbers<[1], [1], [0], [0], [0, 0, 1, 0], [], []>} : vector<2x16xbf16>, vector<2x16xbf16>, vector<2x2xf32> -> vector<2x2xf32>
    %93 = arith.addf %92, %18 : vector<2x2xf32>
    %cst_25 = arith.constant dense<0xFF800000> : vector<2xf32>
    %94 = vector.multi_reduction <maximumf>, %93, %cst_25 [1] : vector<2x2xf32> to vector<2xf32>
    %95 = vector.shape_cast %94 : vector<2xf32> to vector<2x1xf32>
    %96 = vector.broadcast %95 : vector<2x1xf32> to vector<2x2xf32>
    %97 = arith.subf %93, %96 : vector<2x2xf32>
    %98 = math.exp %97 : vector<2x2xf32>
    %cst_26 = arith.constant dense<0.000000e+00> : vector<2xf32>
    %99 = vector.multi_reduction <add>, %98, %cst_26 [1] : vector<2x2xf32> to vector<2xf32>
    %100 = vector.shape_cast %99 : vector<2xf32> to vector<2x1xf32>
    %101 = tpu.reciprocal %100 {approx = true} : vector<2x1xf32> -> vector<2x1xf32>
    %102 = vector.broadcast %101 : vector<2x1xf32> to vector<2x2xf32>
    %103 = arith.mulf %98, %102 : vector<2x2xf32>
    %104 = arith.truncf %103 : vector<2x2xf32> to vector<2x2xbf16>
    %105 = arith.truncf %89 : vector<2x16xf32> to vector<2x16xbf16>
    %cst_27 = arith.constant dense<0.000000e+00> : vector<2x16xf32>
    %106 = tpu.matmul %104, %105, %cst_27 {dimension_numbers = #tpu.dot_dimension_numbers<[1], [0], [0], [1], [0, 0, 1, 1], [], []>} : vector<2x2xbf16>, vector<2x16xbf16>, vector<2x16xf32> -> vector<2x16xf32>
    %107 = tpu.concatenate %40, %62, %84, %106 in 1 : vector<2x16xf32>, vector<2x16xf32>, vector<2x16xf32>, vector<2x16xf32> -> vector<2x64xf32>
    %108 = arith.truncf %107 : vector<2x64xf32> to vector<2x64xbf16>
    %c0_28 = arith.constant 0 : index
    %c0_29 = arith.constant 0 : index
    %109 = vector.load %arg5[%c0_28, %c0_29] : memref<64x64xbf16, #tpu.memory_space<vmem>>, vector<64x64xbf16>
    %cst_30 = arith.constant dense<0.000000e+00> : vector<2x64xf32>
    %110 = tpu.matmul %108, %109, %cst_30 {dimension_numbers = #tpu.dot_dimension_numbers<[1], [0], [0], [1], [0, 0, 1, 1], [], []>} : vector<2x64xbf16>, vector<64x64xbf16>, vector<2x64xf32> -> vector<2x64xf32>
    %c0_31 = arith.constant 0 : index
    %c0_32 = arith.constant 0 : index
    %111 = vector.load %arg6[%c0_31, %c0_32] : memref<1x64xf32, #tpu.memory_space<vmem>>, vector<1x64xf32>
    %112 = vector.broadcast %111 : vector<1x64xf32> to vector<2x64xf32>
    %113 = arith.addf %110, %112 : vector<2x64xf32>
    %114 = arith.addf %1, %113 : vector<2x64xf32>
    %c0_33 = arith.constant 0 : index
    %c0_34 = arith.constant 0 : index
    %115 = vector.load %arg7[%c0_33, %c0_34] : memref<1x64xf32, #tpu.memory_space<vmem>>, vector<1x64xf32>
    %c0_35 = arith.constant 0 : index
    %c0_36 = arith.constant 0 : index
    %116 = vector.load %arg8[%c0_35, %c0_36] : memref<1x64xf32, #tpu.memory_space<vmem>>, vector<1x64xf32>
    %cst_37 = arith.constant dense<0.000000e+00> : vector<2xf32>
    %117 = vector.multi_reduction <add>, %114, %cst_37 [1] : vector<2x64xf32> to vector<2xf32>
    %118 = vector.shape_cast %117 : vector<2xf32> to vector<2x1xf32>
    %cst_38 = arith.constant 6.400000e+01 : f32
    %119 = vector.broadcast %cst_38 : f32 to vector<2x1xf32>
    %120 = arith.divf %118, %119 : vector<2x1xf32>
    %121 = vector.broadcast %120 : vector<2x1xf32> to vector<2x64xf32>
    %122 = arith.subf %114, %121 : vector<2x64xf32>
    %123 = arith.mulf %122, %122 : vector<2x64xf32>
    %cst_39 = arith.constant dense<0.000000e+00> : vector<2xf32>
    %124 = vector.multi_reduction <add>, %123, %cst_39 [1] : vector<2x64xf32> to vector<2xf32>
    %125 = vector.shape_cast %124 : vector<2xf32> to vector<2x1xf32>
    %cst_40 = arith.constant 6.400000e+01 : f32
    %126 = vector.broadcast %cst_40 : f32 to vector<2x1xf32>
    %127 = arith.divf %125, %126 : vector<2x1xf32>
    %cst_41 = arith.constant 9.99999974E-6 : f32
    %128 = vector.broadcast %cst_41 : f32 to vector<2x1xf32>
    %129 = arith.addf %127, %128 : vector<2x1xf32>
    %130 = math.rsqrt %129 : vector<2x1xf32>
    %131 = vector.broadcast %130 : vector<2x1xf32> to vector<2x64xf32>
    %132 = arith.mulf %122, %131 : vector<2x64xf32>
    %133 = vector.broadcast %115 : vector<1x64xf32> to vector<2x64xf32>
    %134 = arith.mulf %132, %133 : vector<2x64xf32>
    %135 = vector.broadcast %116 : vector<1x64xf32> to vector<2x64xf32>
    %136 = arith.addf %134, %135 : vector<2x64xf32>
    %c0_42 = arith.constant 0 : index
    %c0_43 = arith.constant 0 : index
    %c0_44 = arith.constant 0 : index
    %137 = vector.load %arg9[%c0_42, %c0_43, %c0_44] : memref<1x2x64xf32, #tpu.memory_space<vmem>>, vector<1x2x64xf32>
    %138 = vector.shape_cast %137 : vector<1x2x64xf32> to vector<2x64xf32>
    %139 = vector.shape_cast %136 : vector<2x64xf32> to vector<1x2x64xf32>
    tpu.vector_store %arg9[%c0_42, %c0_43, %c0_44], %139 {strides = array<i32>} : memref<1x2x64xf32, #tpu.memory_space<vmem>>, vector<1x2x64xf32>,
    return
  }
  func.func @transform_0(%arg0: i32, %arg1: memref<2xi32, #tpu.memory_space<smem>>) -> (i32, i32, i32) {
    %c0_i32 = arith.constant 0 : i32
    %c0_i32_0 = arith.constant 0 : i32
    %c0_i32_1 = arith.constant 0 : i32
    return %arg0, %c0_i32, %c0_i32_0 : i32, i32, i32
  }
  func.func @transform_1(%arg0: i32, %arg1: memref<2xi32, #tpu.memory_space<smem>>) -> (i32, i32) {
    %c0_i32 = arith.constant 0 : i32
    %c0_i32_0 = arith.constant 0 : i32
    %c0_i32_1 = arith.constant 0 : i32
    return %c0_i32, %c0_i32_0 : i32, i32
  }
  func.func @transform_2(%arg0: i32, %arg1: memref<2xi32, #tpu.memory_space<smem>>) -> (i32, i32) {
    %c0_i32 = arith.constant 0 : i32
    %c0_i32_0 = arith.constant 0 : i32
    %c0_i32_1 = arith.constant 0 : i32
    return %c0_i32, %c0_i32_0 : i32, i32
  }
  func.func @transform_3(%arg0: i32, %arg1: memref<2xi32, #tpu.memory_space<smem>>) -> (i32, i32) {
    %c0_i32 = arith.constant 0 : i32
    %c0_i32_0 = arith.constant 0 : i32
    %c0_i32_1 = arith.constant 0 : i32
    return %c0_i32, %c0_i32_0 : i32, i32
  }
  func.func @transform_4(%arg0: i32, %arg1: memref<2xi32, #tpu.memory_space<smem>>) -> (i32, i32) {
    %c0_i32 = arith.constant 0 : i32
    %c0_i32_0 = arith.constant 0 : i32
    %c0_i32_1 = arith.constant 0 : i32
    return %c0_i32, %c0_i32_0 : i32, i32
  }
  func.func @transform_5(%arg0: i32, %arg1: memref<2xi32, #tpu.memory_space<smem>>) -> (i32, i32) {
    %c0_i32 = arith.constant 0 : i32
    %c0_i32_0 = arith.constant 0 : i32
    %c0_i32_1 = arith.constant 0 : i32
    return %c0_i32, %c0_i32_0 : i32, i32
  }
  func.func @transform_6(%arg0: i32, %arg1: memref<2xi32, #tpu.memory_space<smem>>) -> (i32, i32) {
    %c0_i32 = arith.constant 0 : i32
    %c0_i32_0 = arith.constant 0 : i32
    %c0_i32_1 = arith.constant 0 : i32
    return %c0_i32, %c0_i32_0 : i32, i32
  }
  func.func @transform_7(%arg0: i32, %arg1: memref<2xi32, #tpu.memory_space<smem>>) -> (i32, i32, i32) {
    %c0_i32 = arith.constant 0 : i32
    %c0_i32_0 = arith.constant 0 : i32
    %c0_i32_1 = arith.constant 0 : i32
    return %arg0, %c0_i32, %c0_i32_0 : i32, i32, i32
  }
}

module attributes {stable_mosaic.version = 11 : i64} {
  func.func @_ffn_block_kernel(%arg0: memref<4x64xf32, #tpu.memory_space<vmem>>, %arg1: memref<64x128xbf16, #tpu.memory_space<vmem>>, %arg2: memref<1x128xf32, #tpu.memory_space<vmem>>, %arg3: memref<128x64xbf16, #tpu.memory_space<vmem>>, %arg4: memref<1x64xf32, #tpu.memory_space<vmem>>, %arg5: memref<1x64xf32, #tpu.memory_space<vmem>>, %arg6: memref<1x64xf32, #tpu.memory_space<vmem>>, %arg7: memref<1x64xf32, #tpu.memory_space<vmem>>, %arg8: memref<1x64xf32, #tpu.memory_space<vmem>>, %arg9: memref<4x64xf32, #tpu.memory_space<vmem>>) attributes {dimension_semantics = [], scalar_prefetch = 0 : i64, scratch_operands = 0 : i64, tpu.core_type = #tpu.core_type<tc>} {
    %c0 = arith.constant 0 : index
    %c0_0 = arith.constant 0 : index
    %0 = vector.load %arg0[%c0, %c0_0] : memref<4x64xf32, #tpu.memory_space<vmem>>, vector<4x64xf32>
    %1 = arith.truncf %0 : vector<4x64xf32> to vector<4x64xbf16>
    %c0_1 = arith.constant 0 : index
    %c0_2 = arith.constant 0 : index
    %2 = vector.load %arg1[%c0_1, %c0_2] : memref<64x128xbf16, #tpu.memory_space<vmem>>, vector<64x128xbf16>
    %cst = arith.constant dense<0.000000e+00> : vector<4x128xf32>
    %3 = tpu.matmul %1, %2, %cst {dimension_numbers = #tpu.dot_dimension_numbers<[1], [0], [0], [1], [0, 0, 1, 1], [], []>} : vector<4x64xbf16>, vector<64x128xbf16>, vector<4x128xf32> -> vector<4x128xf32>
    %c0_3 = arith.constant 0 : index
    %c0_4 = arith.constant 0 : index
    %4 = vector.load %arg2[%c0_3, %c0_4] : memref<1x128xf32, #tpu.memory_space<vmem>>, vector<1x128xf32>
    %5 = vector.broadcast %4 : vector<1x128xf32> to vector<4x128xf32>
    %6 = arith.addf %3, %5 : vector<4x128xf32>
    %cst_5 = arith.constant 5.000000e-01 : f32
    %7 = vector.broadcast %cst_5 : f32 to vector<4x128xf32>
    %8 = arith.mulf %7, %6 : vector<4x128xf32>
    %cst_6 = arith.constant 4.471500e-02 : f32
    %9 = vector.broadcast %cst_6 : f32 to vector<4x128xf32>
    %10 = arith.mulf %9, %6 : vector<4x128xf32>
    %11 = arith.mulf %10, %6 : vector<4x128xf32>
    %12 = arith.mulf %11, %6 : vector<4x128xf32>
    %13 = arith.addf %6, %12 : vector<4x128xf32>
    %cst_7 = arith.constant 0.797884583 : f32
    %14 = vector.broadcast %cst_7 : f32 to vector<4x128xf32>
    %15 = arith.mulf %14, %13 : vector<4x128xf32>
    %16 = math.tanh %15 : vector<4x128xf32>
    %cst_8 = arith.constant 1.000000e+00 : f32
    %17 = vector.broadcast %cst_8 : f32 to vector<4x128xf32>
    %18 = arith.addf %17, %16 : vector<4x128xf32>
    %19 = arith.mulf %8, %18 : vector<4x128xf32>
    %20 = arith.truncf %19 : vector<4x128xf32> to vector<4x128xbf16>
    %c0_9 = arith.constant 0 : index
    %c0_10 = arith.constant 0 : index
    %21 = vector.load %arg3[%c0_9, %c0_10] : memref<128x64xbf16, #tpu.memory_space<vmem>>, vector<128x64xbf16>
    %cst_11 = arith.constant dense<0.000000e+00> : vector<4x64xf32>
    %22 = tpu.matmul %20, %21, %cst_11 {dimension_numbers = #tpu.dot_dimension_numbers<[1], [0], [0], [1], [0, 0, 1, 1], [], []>} : vector<4x128xbf16>, vector<128x64xbf16>, vector<4x64xf32> -> vector<4x64xf32>
    %c0_12 = arith.constant 0 : index
    %c0_13 = arith.constant 0 : index
    %23 = vector.load %arg4[%c0_12, %c0_13] : memref<1x64xf32, #tpu.memory_space<vmem>>, vector<1x64xf32>
    %24 = vector.broadcast %23 : vector<1x64xf32> to vector<4x64xf32>
    %25 = arith.addf %22, %24 : vector<4x64xf32>
    %26 = arith.addf %0, %25 : vector<4x64xf32>
    %c0_14 = arith.constant 0 : index
    %c0_15 = arith.constant 0 : index
    %27 = vector.load %arg5[%c0_14, %c0_15] : memref<1x64xf32, #tpu.memory_space<vmem>>, vector<1x64xf32>
    %c0_16 = arith.constant 0 : index
    %c0_17 = arith.constant 0 : index
    %28 = vector.load %arg6[%c0_16, %c0_17] : memref<1x64xf32, #tpu.memory_space<vmem>>, vector<1x64xf32>
    %cst_18 = arith.constant dense<0.000000e+00> : vector<4xf32>
    %29 = vector.multi_reduction <add>, %26, %cst_18 [1] : vector<4x64xf32> to vector<4xf32>
    %30 = vector.shape_cast %29 : vector<4xf32> to vector<4x1xf32>
    %cst_19 = arith.constant 6.400000e+01 : f32
    %31 = vector.broadcast %cst_19 : f32 to vector<4x1xf32>
    %32 = arith.divf %30, %31 : vector<4x1xf32>
    %33 = vector.broadcast %32 : vector<4x1xf32> to vector<4x64xf32>
    %34 = arith.subf %26, %33 : vector<4x64xf32>
    %35 = arith.mulf %34, %34 : vector<4x64xf32>
    %cst_20 = arith.constant dense<0.000000e+00> : vector<4xf32>
    %36 = vector.multi_reduction <add>, %35, %cst_20 [1] : vector<4x64xf32> to vector<4xf32>
    %37 = vector.shape_cast %36 : vector<4xf32> to vector<4x1xf32>
    %cst_21 = arith.constant 6.400000e+01 : f32
    %38 = vector.broadcast %cst_21 : f32 to vector<4x1xf32>
    %39 = arith.divf %37, %38 : vector<4x1xf32>
    %cst_22 = arith.constant 9.99999974E-6 : f32
    %40 = vector.broadcast %cst_22 : f32 to vector<4x1xf32>
    %41 = arith.addf %39, %40 : vector<4x1xf32>
    %42 = math.rsqrt %41 : vector<4x1xf32>
    %43 = vector.broadcast %42 : vector<4x1xf32> to vector<4x64xf32>
    %44 = arith.mulf %34, %43 : vector<4x64xf32>
    %45 = vector.broadcast %27 : vector<1x64xf32> to vector<4x64xf32>
    %46 = arith.mulf %44, %45 : vector<4x64xf32>
    %47 = vector.broadcast %28 : vector<1x64xf32> to vector<4x64xf32>
    %48 = arith.addf %46, %47 : vector<4x64xf32>
    %c0_23 = arith.constant 0 : index
    %c0_24 = arith.constant 0 : index
    %49 = vector.load %arg7[%c0_23, %c0_24] : memref<1x64xf32, #tpu.memory_space<vmem>>, vector<1x64xf32>
    %c0_25 = arith.constant 0 : index
    %c0_26 = arith.constant 0 : index
    %50 = vector.load %arg8[%c0_25, %c0_26] : memref<1x64xf32, #tpu.memory_space<vmem>>, vector<1x64xf32>
    %cst_27 = arith.constant dense<0.000000e+00> : vector<4xf32>
    %51 = vector.multi_reduction <add>, %48, %cst_27 [1] : vector<4x64xf32> to vector<4xf32>
    %52 = vector.shape_cast %51 : vector<4xf32> to vector<4x1xf32>
    %cst_28 = arith.constant 6.400000e+01 : f32
    %53 = vector.broadcast %cst_28 : f32 to vector<4x1xf32>
    %54 = arith.divf %52, %53 : vector<4x1xf32>
    %55 = vector.broadcast %54 : vector<4x1xf32> to vector<4x64xf32>
    %56 = arith.subf %48, %55 : vector<4x64xf32>
    %57 = arith.mulf %56, %56 : vector<4x64xf32>
    %cst_29 = arith.constant dense<0.000000e+00> : vector<4xf32>
    %58 = vector.multi_reduction <add>, %57, %cst_29 [1] : vector<4x64xf32> to vector<4xf32>
    %59 = vector.shape_cast %58 : vector<4xf32> to vector<4x1xf32>
    %cst_30 = arith.constant 6.400000e+01 : f32
    %60 = vector.broadcast %cst_30 : f32 to vector<4x1xf32>
    %61 = arith.divf %59, %60 : vector<4x1xf32>
    %cst_31 = arith.constant 9.99999974E-6 : f32
    %62 = vector.broadcast %cst_31 : f32 to vector<4x1xf32>
    %63 = arith.addf %61, %62 : vector<4x1xf32>
    %64 = math.rsqrt %63 : vector<4x1xf32>
    %65 = vector.broadcast %64 : vector<4x1xf32> to vector<4x64xf32>
    %66 = arith.mulf %56, %65 : vector<4x64xf32>
    %67 = vector.broadcast %49 : vector<1x64xf32> to vector<4x64xf32>
    %68 = arith.mulf %66, %67 : vector<4x64xf32>
    %69 = vector.broadcast %50 : vector<1x64xf32> to vector<4x64xf32>
    %70 = arith.addf %68, %69 : vector<4x64xf32>
    %c0_32 = arith.constant 0 : index
    %c0_33 = arith.constant 0 : index
    %71 = vector.load %arg9[%c0_32, %c0_33] : memref<4x64xf32, #tpu.memory_space<vmem>>, vector<4x64xf32>
    tpu.vector_store %arg9[%c0_32, %c0_33], %70 {strides = array<i32>} : memref<4x64xf32, #tpu.memory_space<vmem>>, vector<4x64xf32>,
    return
  }
}

module attributes {stable_mosaic.version = 11 : i64} {
  func.func @_heads_kernel(%arg0: memref<16x64xf32, #tpu.memory_space<vmem>>, %arg1: memref<16x64xf32, #tpu.memory_space<vmem>>, %arg2: memref<128x64xbf16, #tpu.memory_space<vmem>>, %arg3: memref<1x64xf32, #tpu.memory_space<vmem>>, %arg4: memref<128x640xbf16, #tpu.memory_space<vmem>>, %arg5: memref<1x640xf32, #tpu.memory_space<vmem>>, %arg6: memref<16x640xf32, #tpu.memory_space<vmem>>) attributes {dimension_semantics = [], scalar_prefetch = 0 : i64, scratch_operands = 0 : i64, tpu.core_type = #tpu.core_type<tc>} {
    %c0 = arith.constant 0 : index
    %c0_0 = arith.constant 0 : index
    %0 = vector.load %arg0[%c0, %c0_0] : memref<16x64xf32, #tpu.memory_space<vmem>>, vector<16x64xf32>
    %c0_1 = arith.constant 0 : index
    %c0_2 = arith.constant 0 : index
    %1 = vector.load %arg1[%c0_1, %c0_2] : memref<16x64xf32, #tpu.memory_space<vmem>>, vector<16x64xf32>
    %2 = tpu.concatenate %0, %1 in 1 : vector<16x64xf32>, vector<16x64xf32> -> vector<16x128xf32>
    %3 = arith.truncf %2 : vector<16x128xf32> to vector<16x128xbf16>
    %c0_3 = arith.constant 0 : index
    %c0_4 = arith.constant 0 : index
    %4 = vector.load %arg2[%c0_3, %c0_4] : memref<128x64xbf16, #tpu.memory_space<vmem>>, vector<128x64xbf16>
    %cst = arith.constant dense<0.000000e+00> : vector<16x64xf32>
    %5 = tpu.matmul %3, %4, %cst {dimension_numbers = #tpu.dot_dimension_numbers<[1], [0], [0], [1], [0, 0, 1, 1], [], []>} : vector<16x128xbf16>, vector<128x64xbf16>, vector<16x64xf32> -> vector<16x64xf32>
    %c0_5 = arith.constant 0 : index
    %c0_6 = arith.constant 0 : index
    %6 = vector.load %arg3[%c0_5, %c0_6] : memref<1x64xf32, #tpu.memory_space<vmem>>, vector<1x64xf32>
    %7 = vector.broadcast %6 : vector<1x64xf32> to vector<16x64xf32>
    %8 = arith.addf %5, %7 : vector<16x64xf32>
    %9 = tpu.concatenate %0, %8 in 1 : vector<16x64xf32>, vector<16x64xf32> -> vector<16x128xf32>
    %10 = arith.truncf %9 : vector<16x128xf32> to vector<16x128xbf16>
    %c0_7 = arith.constant 0 : index
    %c0_8 = arith.constant 0 : index
    %11 = vector.load %arg4[%c0_7, %c0_8] : memref<128x640xbf16, #tpu.memory_space<vmem>>, vector<128x640xbf16>
    %cst_9 = arith.constant dense<0.000000e+00> : vector<16x640xf32>
    %12 = tpu.matmul %10, %11, %cst_9 {dimension_numbers = #tpu.dot_dimension_numbers<[1], [0], [0], [1], [0, 0, 1, 1], [], []>} : vector<16x128xbf16>, vector<128x640xbf16>, vector<16x640xf32> -> vector<16x640xf32>
    %c0_10 = arith.constant 0 : index
    %c0_11 = arith.constant 0 : index
    %13 = vector.load %arg5[%c0_10, %c0_11] : memref<1x640xf32, #tpu.memory_space<vmem>>, vector<1x640xf32>
    %14 = vector.broadcast %13 : vector<1x640xf32> to vector<16x640xf32>
    %15 = arith.addf %12, %14 : vector<16x640xf32>
    %c0_12 = arith.constant 0 : index
    %c0_13 = arith.constant 0 : index
    %16 = vector.load %arg6[%c0_12, %c0_13] : memref<16x640xf32, #tpu.memory_space<vmem>>, vector<16x640xf32>
    tpu.vector_store %arg6[%c0_12, %c0_13], %15 {strides = array<i32>} : memref<16x640xf32, #tpu.memory_space<vmem>>, vector<16x640xf32>,
    return
  }
}

</mosaic_0001>

<bundles_post_ra>
// kernel: form_model_forward_training.12
= control target key start
LH: loop header
LB: loop body
LE: loop exit
PB: predicated region body
PF: predicated region fallthrough
CT: control target
= control target key end

     0   :  { %v439_v0 = vmov 0.0   ;;  %vm440_vm0 = vmmov 0   ;;  %vm75_vm1 = vcmask 523264   ;;  %s576_s1 = inlined_call_operand.vmem [shape: bf16[64,128], index: 1, kind: input, shape index: {}]   ;;  %s577_s0 = inlined_call_operand.vmem [shape: f32[16,64], index: 0, kind: input, shape index: {}]   ;;  %s578_s3 = inlined_call_operand.vmem [shape: bf16[128,64], index: 3, kind: input, shape index: {}]   ;;  %s579_s2 = inlined_call_operand.vmem [shape: f32[1,128], index: 2, kind: input, shape index: {}]   ;;  %s580_s4 = inlined_call_operand.vmem [shape: f32[1,64], index: 4, kind: input, shape index: {}]   ;;  %s581_s5 = inlined_call_operand.vmem [shape: f32[1,64], index: 5, kind: input, shape index: {}]   ;;  %s582_s6 = inlined_call_operand.vmem [shape: f32[1,64], index: 6, kind: input, shape index: {}]   ;;  %s583_s7 = inlined_call_operand.vmem [shape: f32[1,64], index: 7, kind: input, shape index: {}]   ;;  %s584_s8 = inlined_call_operand.vmem [shape: f32[1,64], index: 8, kind: input, shape index: {}]   ;;  %s585_s9 = inlined_call_operand.vmem [shape: f32[16,64], index: 9, kind: output, shape index: {}]  }
   0x1   :  { %381 = vmatprep.subr.bf16.mxu0 %v439_v0  ;;  %v415_v1 = vld [vmem:[%s576_s1] sm:$0xff]   ;;  %389 = vmatprep.mubr.msk.bf16.mxu0 %vm440_vm0, %v439_v0  ;;  %v416_v2 = vld [vmem:[%s576_s1 + $0x8] sm:$0xff]   ;;  %v417_v3 = vld [vmem:[%s576_s1 + $0x10] sm:$0xff]  }
   0x2   :  { %393 = vmatprep.subr.bf16.mxu1 %v439_v0  ;;  %409 = vmatprep.mubr.msk.bf16.mxu1 %vm440_vm0, %v439_v0  ;;  %v418_v4 = vld [vmem:[%s576_s1 + $0x18] sm:$0xff]   ;;  %v506_v5 = vld [vmem:[%s577_s0] sm:$0xff]  ;;  %v511_v6 = vld [vmem:[%s577_s0 + $0x8] sm:$0xff] }
   0x3   :  { %382 = vmatpush3.bf16.msra.mxu0 %v415_v1  ;;  %v35_v7 = vpack.c.bf16 %v511_v6, %v506_v5  ;;  %v419_v8 = vld [vmem:[%s578_s3] sm:$0xff]   ;;  %v420_v9 = vld [vmem:[%s578_s3 + $0x8] sm:$0xff]   ;;  %v421_v10 = vld [vmem:[%s578_s3 + $0x10] sm:$0xff]  }
   0x4   :  { %383 = vmatprep.subr.bf16.mxu0 %v439_v0  ;;  %394 = vmatpush3.bf16.msra.mxu1 %v419_v8  ;;  %v422_v11 = vld [vmem:[%s578_s3 + $0x18] sm:$0xff]   ;;  %v423_v12 = vld [vmem:[%s578_s3 + $0x20] sm:$0xff]   ;;  %v424_v13 = vld [vmem:[%s578_s3 + $0x28] sm:$0xff]  }
   0x5   :  { %395 = vmatprep.subr.bf16.mxu1 %v439_v0  ;;  %v425_v14 = vld [vmem:[%s578_s3 + $0x30] sm:$0xff]   ;;  %v426_v15 = vld [vmem:[%s578_s3 + $0x38] sm:$0xff]   ;;  %v348_v16 = vld [vmem:[%s579_s2] ss:$0 sm:$0xff] }
   0x6   :  { %v354_v42 = vld [vmem:[%s580_s4] ss:$0 sm:$0xff] }
   0x7   :  { %384 = vmatpush3.bf16.msra.mxu0 %v416_v2  ;;  %v364_v8 = vld [vmem:[%s582_s6] ss:$0 sm:$0xff] }
   0x8   :  { %385 = vmatprep.subr.bf16.mxu0 %v439_v0  ;;  %396 = vmatpush3.bf16.msra.mxu1 %v420_v9 }
   0x9   :  { %397 = vmatprep.subr.bf16.mxu1 %v439_v0 }
   0xb   :  { %386 = vmatpush3.bf16.msra.mxu0 %v417_v3 }
   0xc   :  { %387 = vmatprep.subr.bf16.mxu0 %v439_v0  ;;  %398 = vmatpush3.bf16.msra.mxu1 %v421_v10 }
   0xd   :  { %399 = vmatprep.subr.bf16.mxu1 %v439_v0 }
   0xf   :  { %388 = vmatpush3.bf16.msra.mxu0 %v418_v4 }
  0x10   :  { %400 = vmatpush3.bf16.msra.mxu1 %v422_v11 }
  0x11   :  { %401 = vmatprep.subr.bf16.mxu1 %v439_v0 }
  0x12   :  { %390 = vmatmul.mubr.msk.bf16.vlgmr.msra.gmra.mrb[0].mxu0 %vm75_vm1, %v35_v7 }
  0x14   :  { %402 = vmatpush3.bf16.msra.mxu1 %v423_v12 }
  0x15   :  { %403 = vmatprep.subr.bf16.mxu1 %v439_v0 }
  0x18   :  { %404 = vmatpush3.bf16.msra.mxu1 %v424_v13 }
  0x19   :  { %405 = vmatprep.subr.bf16.mxu1 %v439_v0 }
  0x1c   :  { %406 = vmatpush3.bf16.msra.mxu1 %v425_v14 }
  0x1d   :  { %407 = vmatprep.subr.bf16.mxu1 %v439_v0 }
  0x20   :  { %408 = vmatpush3.bf16.msra.mxu1 %v426_v15 }
  0xe5   :  { %v113_v17 = vpop.f32.mrb[0].mxu0 }
  0xe6   :  { %v114_v18 = vadd.f32 %v348_v16, %v113_v17  ;;  %v391_v19 = vpop.f32.mrb[1].mxu0 }
  0xe7   :  { %v116_v20 = vpop.f32.mrb[2].mxu0 }
  0xe8   :  { %v122_v21 = vmul.f32 0.044715, %v114_v18  ;;  %v117_v22 = vadd.f32 %v348_v16, %v116_v20  ;;  %v392_v23 = vpop.f32.mrb[3].mxu0  ;;  %v120_v36 = vmul.f32 0.5, %v114_v18 }
  0xea   :  { %v124_v24 = vmul.f32 %v122_v21, %v114_v18  ;;  %v123_v25 = vmul.f32 0.044715, %v117_v22  ;;  %v121_v37 = vmul.f32 0.5, %v117_v22 }
  0xec   :  { %v126_v26 = vmul.f32 %v124_v24, %v114_v18  ;;  %v125_v27 = vmul.f32 %v123_v25, %v117_v22 }
  0xee   :  { %v127_v28 = vmul.f32 %v125_v27, %v117_v22  ;;  %v128_v29 = vadd.f32 %v126_v26, %v114_v18 }
  0xf0   :  { %v129_v30 = vadd.f32 %v127_v28, %v117_v22  ;;  %v130_v31 = vmul.f32 0.7978846, %v128_v29 }
  0xf2   :  { %v131_v32 = vmul.f32 0.7978846, %v129_v30  ;;  %427 = vtanh.f32 %v130_v31 }
  0xf4   :  { %429 = vtanh.f32 %v131_v32 }
  0xfc   :  { %v428_v33 = vpop.eup %427 }
  0xfd   :  { %v134_v34 = vadd.f32 1.0, %v428_v33 }
  0xfe   :  { %v430_v35 = vpop.eup %429 }
  0xff   :  { %v135_v38 = vadd.f32 1.0, %v430_v35  ;;  %v136_v39 = vmul.f32 %v134_v34, %v120_v36  ;;  %v365_v34 = vld [vmem:[%s583_s7] ss:$0 sm:$0xff] }
 0x100   :  { %v366_v36 = vld [vmem:[%s584_s8] ss:$0 sm:$0xff] }
 0x101   :  { %v137_v40 = vmul.f32 %v135_v38, %v121_v37 }
 0x103   :  { %v138_v41 = vpack.c.bf16 %v137_v40, %v136_v39 }
 0x105   :  { %410 = vmatmul.mubr.bf16.vlgmr.msra.gmra.mrb[0].mxu1 %v138_v41 }
 0x1d8   :  { %v244_v43 = vpop.f32.mrb[0].mxu1 }
 0x1d9   :  { %v245_v44 = vadd.f32 %v354_v42, %v244_v43  ;;  %v411_v45 = vpop.f32.mrb[1].mxu1 }
 0x1da   :  { %v247_v46 = vpop.f32.mrb[2].mxu1 }
 0x1db   :  { %v248_v47 = vadd.f32 %v354_v42, %v247_v46  ;;  %v412_v48 = vpop.f32.mrb[3].mxu1  ;;  %v251_v49 = vadd.f32 %v245_v44, %v506_v5 }
 0x1dd   :  { %v255_v50 = vsel %vm75_vm1, %v251_v49, 0.0  ;;  %v252_v51 = vadd.f32 %v248_v47, %v511_v6  ;;  %v363_v6 = vld [vmem:[%s581_s5] ss:$0 sm:$0xff] }
 0x1de   :  { %256 = vadd.xlane.f32.xlu0 %v255_v50 }
 0x1df   :  { %v258_v52 = vsel %vm75_vm1, %v252_v51, 0.0 }
 0x1e2   :  { %259 = vadd.xlane.f32.xlu0 %v258_v52 }
 0x26b   :  { %v257_v53 = vpop.xlane.xlu0 %256 }
 0x26c   :  { %v262_v54 = vmul.f32 0.015625, %v257_v53 }
 0x26e   :  { %v264_v55 = vsub.f32 %v251_v49, %v262_v54 }
 0x26f   :  { %v260_v56 = vpop.xlane.xlu0 %259 }
 0x270   :  { %v263_v57 = vmul.f32 0.015625, %v260_v56  ;;  %v266_v58 = vmul.f32 %v264_v55, %v264_v55 }
 0x272   :  { %v265_v59 = vsub.f32 %v252_v51, %v263_v57  ;;  %v268_v60 = vsel %vm75_vm1, %v266_v58, 0.0 }
 0x273   :  { %269 = vadd.xlane.f32.xlu1 %v268_v60 }
 0x274   :  { %v267_v61 = vmul.f32 %v265_v59, %v265_v59 }
 0x276   :  { %v271_v62 = vsel %vm75_vm1, %v267_v61, 0.0 }
 0x277   :  { %272 = vadd.xlane.f32.xlu1 %v271_v62 }
 0x300   :  { %v270_v63 = vpop.xlane.xlu1 %269 }
 0x301   :  { %v274_v0 = vmul.f32 0.015625, %v270_v63 }
 0x303   :  { %v276_v1 = vadd.f32 1e-05, %v274_v0 }
 0x304   :  { %v273_v2 = vpop.xlane.xlu1 %272 }
 0x305   :  { %431 = vrsqrt.f32 %v276_v1  ;;  %v275_v3 = vmul.f32 0.015625, %v273_v2 }
 0x307   :  { %v277_v4 = vadd.f32 1e-05, %v275_v3 }
 0x309   :  { %433 = vrsqrt.f32 %v277_v4 }
 0x30f   :  { %v432_v5 = vpop.eup %431 }
 0x310   :  { %v280_v7 = vmul.f32 %v432_v5, %v264_v55 }
 0x312   :  { %v288_v9 = vmul.f32 %v363_v6, %v280_v7 }
 0x313   :  { %v434_v10 = vpop.eup %433 }
 0x314   :  { %v296_v11 = vadd.f32 %v364_v8, %v288_v9  ;;  %v281_v12 = vmul.f32 %v434_v10, %v265_v59 }
 0x316   :  { %v300_v13 = vsel %vm75_vm1, %v296_v11, 0.0  ;;  %v289_v14 = vmul.f32 %v363_v6, %v281_v12 }
 0x317   :  { %301 = vadd.xlane.f32.xlu0 %v300_v13 }
 0x318   :  { %v297_v15 = vadd.f32 %v364_v8, %v289_v14 }
 0x31a   :  { %v303_v16 = vsel %vm75_vm1, %v297_v15, 0.0 }
 0x31b   :  { %304 = vadd.xlane.f32.xlu1 %v303_v16 }
 0x3a4   :  { %v302_v17 = vpop.xlane.xlu0 %301 }
 0x3a5   :  { %v306_v18 = vmul.f32 0.015625, %v302_v17 }
 0x3a7   :  { %v308_v19 = vsub.f32 %v296_v11, %v306_v18 }
 0x3a8   :  { %v305_v20 = vpop.xlane.xlu1 %304 }
 0x3a9   :  { %v307_v21 = vmul.f32 0.015625, %v305_v20  ;;  %v310_v22 = vmul.f32 %v308_v19, %v308_v19 }
 0x3ab   :  { %v309_v23 = vsub.f32 %v297_v15, %v307_v21  ;;  %v312_v24 = vsel %vm75_vm1, %v310_v22, 0.0 }
 0x3ac   :  { %313 = vadd.xlane.f32.xlu0 %v312_v24 }
 0x3ad   :  { %v311_v25 = vmul.f32 %v309_v23, %v309_v23 }
 0x3af   :  { %v315_v26 = vsel %vm75_vm1, %v311_v25, 0.0 }
 0x3b0   :  { %316 = vadd.xlane.f32.xlu1 %v315_v26 }
 0x439   :  { %v314_v27 = vpop.xlane.xlu0 %313 }
 0x43a   :  { %v318_v28 = vmul.f32 0.015625, %v314_v27 }
 0x43c   :  { %v320_v29 = vadd.f32 1e-05, %v318_v28 }
 0x43d   :  { %v317_v30 = vpop.xlane.xlu1 %316 }
 0x43e   :  { %435 = vrsqrt.f32 %v320_v29  ;;  %v319_v31 = vmul.f32 0.015625, %v317_v30 }
 0x440   :  { %v321_v32 = vadd.f32 1e-05, %v319_v31 }
 0x442   :  { %437 = vrsqrt.f32 %v321_v32 }
 0x448   :  { %v436_v33 = vpop.eup %435 }
 0x449   :  { %v324_v35 = vmul.f32 %v436_v33, %v308_v19 }
 0x44b   :  { %v332_v37 = vmul.f32 %v365_v34, %v324_v35 }
 0x44c   :  { %v438_v38 = vpop.eup %437 }
 0x44d   :  { %v340_v39 = vadd.f32 %v366_v36, %v332_v37  ;;  %v325_v40 = vmul.f32 %v438_v38, %v309_v23 }
 0x44f   :  { %342 = vst.msk [vmem:[%s585_s9] sm:$0xff] %vm75_vm1, %v340_v39  ;;  %v333_v41 = vmul.f32 %v365_v34, %v325_v40 }
 0x451   :  { %v341_v42 = vadd.f32 %v366_v36, %v333_v41 }
 0x453   :  { %343 = vst.msk [vmem:[%s585_s9 + $0x8] sm:$0xff] %vm75_vm1, %v341_v42 }

// kernel: form_model_forward_training.11
= control target key start
LH: loop header
LB: loop body
LE: loop exit
PB: predicated region body
PF: predicated region fallthrough
CT: control target
= control target key end

     0   :  { %s1450_s0 = inlined_call_operand.vmem [shape: s32[2], index: 0, kind: input, shape index: {}]   ;;  %s1451_s1 = inlined_call_operand.vmem [shape: f32[2,8,64], index: 1, kind: input, shape index: {}]   ;;  %s1452_s2 = inlined_call_operand.vmem [shape: bf16[64,192], index: 2, kind: input, shape index: {}]   ;;  %s1453_s3 = inlined_call_operand.vmem [shape: f32[1,192], index: 3, kind: input, shape index: {}]   ;;  %s1454_s4 = inlined_call_operand.vmem [shape: bf16[64,64], index: 4, kind: input, shape index: {}]   ;;  %s1455_s5 = inlined_call_operand.vmem [shape: f32[1,64], index: 5, kind: input, shape index: {}]   ;;  %s1456_s6 = inlined_call_operand.vmem [shape: f32[1,64], index: 6, kind: input, shape index: {}]   ;;  %s1457_s7 = inlined_call_operand.vmem [shape: f32[1,64], index: 7, kind: input, shape index: {}]   ;;  %s1458_s8 = inlined_call_operand.vmem [shape: f32[2,8,64], index: 8, kind: output, shape index: {}]  }
   0x1   :  { %s13_s29 = sshll.u32 %s1450_s0, 4  ;;  %s14_s29 = int_to_ptr.vmem [resolvable:$true] %s13_s29 }
   0x2   :  { %s1199_s30 = scalar_lea.vmem %s14_s29, 16  ;;  %p1204_p1 = scmp.lt.s32.totalorder %s14_s29, %s14_s29 }
   0x3   :  { %p1200_p0 = scmp.ne.s32.totalorder %s14_s29, %s1199_s30  ;;  %p1205_p2 = scmp.lt.s32.totalorder %s1199_s30, %s1199_s30 }
   0x5   :  { %p1206_p3 = por %p1205_p2, %p1204_p1 }
   0x7   :  { %p1207_p4 = pnand %p1206_p3, %p1200_p0 }
   0x9   :  { %1210 = shalt.err (!%p1207_p4)  }
   0xa   :  { %s1221_s9 = smov [#allocation3]  }
   0xb   :  { %16 = dma.vmem_to_smem %s14_s29, 16, %s1221_s9, [#allocation2] }
   0xc   :  { %1215 = dma.done.wait [#allocation2], 16 }
   0xd   :  { %1216 = vsyncadd [#allocation2], 4294967280 }
   0xe   :  { %18 = sfence }
   0xf   :  { %s1281_s10 = smov 0  }
  0x10 LB: > { %s1287_s0 = sadd.s32 4294967295, %s1219_s10   ;;  %p1034_p5 = scmp.ge.s32.totalorder %s1219_s10, 1  ;;  %s1219_s10 = sphi %s1281_s10, %s24_s10  }
  0x11   : > { %p243_p6 = scmp.lt.s32.totalorder %s1219_s10, 3 }
  0x13   : > { %p244_p7 = pnand %p1034_p5, %p243_p6 }
  0x14   : > { %v1165_v0 = vld [vmem:[%s1452_s2 + $0x4] ss:$8 sps:$4 sm:$0xff] (!%p244_p7)   ;;  %p273_p8 = scmp.lt.s32.totalorder (!%p244_p7), %s1287_s0, 1  ;;  %v1167_v1 = vld [vmem:[%s1452_s2] ss:$8 sps:$4 sm:$0xff] (!%p244_p7)   ;;  %v1222_v2 = vmov (!%p244_p7), 0   ;;  %v294_v11 = vlaneseq (!%p244_p7) }
  0x15   : > { %247 = sbr.rel (%p244_p7) target bundleno = 2328 (0x918), region = 48  ;;  %380 = vmatprep.mubr.bf16.mxu0 (!%p244_p7), %v1222_v2  ;;  %348 = vmatprep.subr.bf16.mxu0 (!%p244_p7), %v1165_v0  ;;  %v1168_v3 = vld [vmem:[%s1452_s2 + $0x14] ss:$8 sps:$4 sm:$0xff] (!%p244_p7)   ;;  %v1170_v4 = vld [vmem:[%s1452_s2 + $0x10] ss:$8 sps:$4 sm:$0xff] (!%p244_p7)   ;;  %vm344_vm0 = vcmask (!%p244_p7), 523264  }
  0x16   : > { %349 = vmatpush1.bf16.msra.mxu0 (!%p244_p7), %v1167_v1  ;;  %v1171_v5 = vld [vmem:[%s1452_s2 + $0x24] ss:$8 sps:$4 sm:$0xff] (!%p244_p7)   ;;  %v1173_v6 = vld [vmem:[%s1452_s2 + $0x20] ss:$8 sps:$4 sm:$0xff] (!%p244_p7)   ;;  %v1174_v7 = vld [vmem:[%s1452_s2 + $0x34] ss:$8 sps:$4 sm:$0xff] (!%p244_p7)  }
  0x17   : > { %350 = vmatprep.subr.bf16.mxu0 (!%p244_p7), %v1168_v3  ;;  %v1176_v8 = vld [vmem:[%s1452_s2 + $0x30] ss:$8 sps:$4 sm:$0xff] (!%p244_p7)   ;;  %v295_v12 = vshrl.u32 (!%p244_p7), %v294_v11, 7  ;;  %v1223_v13 = vmov (!%p244_p7), 0.0   ;;  %v292_v15 = vld [vmem:[%s1453_s3] sm:$0x3] (!%p244_p7) }
  0x18   : > { %1085 = vmatprep.subr.bf16.mxu1 (!%p244_p7), %v1223_v13  ;;  %vm1224_vm1 = vmmov (!%p244_p7), 0   ;;  %s1225_s13 = smov (!%p244_p7), 48   ;;  %s1226_s14 = smov (!%p244_p7), 64   ;;  %vm405_vm2 = vcmask (!%p244_p7), 130048   ;;  %vm469_vm3 = vcmask (!%p244_p7), 1043456   ;;  %v393_v32 = vand.u32 (!%p244_p7), 127, %v294_v11 }
  0x19   : > { %v296_v14 = vsub.s32 (!%p244_p7), 0, %v295_v12  ;;  %1087 = vmatprep.mubr.msk.bf16.mxu1 (!%p244_p7), %vm1224_vm1, %v1223_v13  ;;  %v300_v23 = vsub.s32 (!%p244_p7), 1, %v295_v12  ;;  %s389_s15 = sld [smem:[#allocation3 + %s1287_s0]] (!%p244_p7)  ;;  %v1227_v34 = vmov (!%p244_p7), -1e+30   ;;  %vm452_vm7 = vcmask (!%p244_p7), 64512  }
  0x1a   : > { %351 = vmatpush1.bf16.msra.mxu0 (!%p244_p7), %v1170_v4  ;;  %vm394_vm4 = vcmp.le.s32.totalorder (!%p244_p7), %v393_v32, %v295_v12  ;;  %s1228_s16 = smov (!%p244_p7), 80   ;;  %s1230_s18 = smov (!%p244_p7), 32   ;;  %vm858_vm8 = vcmask (!%p244_p7), 261120   ;;  %vm860_vm9 = vcmask (!%p244_p7), 392192  }
  0x1b   : > { %352 = vmatprep.subr.bf16.mxu0 (!%p244_p7), %v1171_v5  ;;  %v297_v16 = vrot.slane (!%p244_p7), %v292_v15, %v296_v14  ;;  %v301_v24 = vrot.slane (!%p244_p7), %v292_v15, %v300_v23  ;;  %s1231_s19 = smov (!%p244_p7), 96   ;;  %s1232_s20 = smov (!%p244_p7), 16  }
  0x1c   : > { %s1302_s17 = scalar_select %p273_p8, %s1287_s0, 1 }
  0x1d   : > { %s1229_s0 = smov 112  }
  0x1e   : > { %s1035_s24 = sshll.u32 %s1302_s17, 3  ;;  %353 = vmatpush1.bf16.msra.mxu0 %v1173_v6 }
  0x1f   : > { %s276_s29 = scalar_lea.vmem %s1451_s1, %s1035_s24  ;;  %354 = vmatprep.subr.bf16.mxu0 %v1174_v7  ;;  %v395_v33 = vstv %s389_s15 }
  0x20   : > { %v1325_v9 = vld [vmem:[%s276_s29] sm:$0xff]  ;;  %vm396_vm5 = vcmp.lt.s32.totalorder %v393_v32, %v395_v33 }
  0x21   : > { %v283_v10 = vpack.c.bf16 %v1325_v9, %v1325_v9  ;;  %vm397_vm6 = vmand %vm394_vm4, %vm396_vm5 }
  0x22   : > { %355 = vmatpush1.bf16.msra.mxu0 %v1176_v8  ;;  %v1351_v35 = vsel %vm397_vm6, 0.0, %v1227_v34 }
  0x23   : > { %1109 = vmatprep.subr.bf16.mxu0 %v1223_v13 }
  0x25   : > { %1045 = vmatmul.mubr.msk.bf16.vlgmr.msra.gmra.mrb[0].mxu0 %vm344_vm0, %v283_v10 }
  0x26   : > { %1111 = vmatprep.mubr.msk.bf16.mxu0 %vm1224_vm1, %v1223_v13 }
  0xf8   : > { %v382_v17 = vpop.f32.mrb[0].mxu0 }
  0xf9   : > { %v383_v18 = vadd.f32 %v382_v17, %v297_v16  ;;  %v384_v19 = vpop.f32.mrb[1].mxu0 }
  0xfa   : > { %v386_v20 = vpop.f32.mrb[2].mxu0  ;;  %v385_v26 = vadd.f32 %v384_v19, %v301_v24 }
  0xfb   : > { %v401_v21 = vpack.c.bf16 %v383_v18, %v383_v18  ;;  %v387_v22 = vpop.f32.mrb[3].mxu0  ;;  %v399_v28 = vmul.f32 0.25, %v383_v18 }
  0xfc   : > { %v1342_v29 = vpack.c.bf16 %v385_v26, %v385_v26 }
  0xfd   : > { %516 = vrot.lane.b32.xlu1 %v401_v21, %s1225_s13  ;;  %403 = vrot.lane.b32.xlu0 %v401_v21, %s1226_s14  ;;  %v400_v30 = vpack.c.bf16 %v399_v28, %v399_v28 }
  0xfe   : > { %v471_v31 = vsel %vm469_vm3, %v1342_v29, 0 }
 0x16f   : > { %v404_v25 = vpop.permute.xlu0 %403  ;;  %v517_v47 = vpop.permute.xlu1 %516 }
 0x170   : > { %v410_v27 = vsel %vm405_vm2, %v404_v25, 0  ;;  %v522_v56 = vsel %vm405_vm2, %v517_v47, 0 }
 0x171   : > { %1086 = vmatpush3.bf16.xpose.msra.mxu1 %v410_v27 }
 0x172   : > { %1091 = vmatprep.subr.bf16.mxu1 %v1223_v13 }
 0x178   : > { %1088 = vmatmul.mubr.msk.bf16.vlgmr.msra.gmra.mrb[0].mxu1 %vm405_vm2, %v400_v30 }
 0x179   : > { %1092 = vmatpush3.bf16.msra.mxu1 %v471_v31  ;;  %1093 = vmatprep.mubr.msk.bf16.mxu1 %vm1224_vm1, %v1223_v13 }
 0x17a   : > { %1097 = vmatprep.subr.bf16.mxu1 %v1223_v13 }
 0x24b   : > { %v446_v36 = vpop.f32.mrb[0].mxu1 }
 0x24c   : > { %v447_v37 = vadd.f32 %v446_v36, %v1351_v35  ;;  %v1089_v38 = vpop.f32.mrb[1].mxu1 }
 0x24d   : > { %v449_v39 = vpop.f32.mrb[2].mxu1 }
 0x24e   : > { %v1090_v40 = vpop.f32.mrb[3].mxu1  ;;  %v453_v41 = vsel %vm452_vm7, %v447_v37, -inf }
 0x24f   : > { %454 = vmax.xlane.f32.xlu0 %v453_v41 }
 0x265   : > { %735 = vrot.lane.b32.xlu0 %v400_v30, %s1228_s16 }
 0x2dc   : > { %v455_v42 = vpop.xlane.xlu0 %454 }
 0x2dd   : > { %v456_v43 = vsub.f32 %v447_v37, %v455_v42 }
 0x2df   : > { %v457_v44 = vmul.f32 1.442695, %v456_v43 }
 0x2e0   : > { %v736_v59 = vpop.permute.xlu0 %735 }
 0x2e1   : > { %1181 = vpow2.f32 %v457_v44 }
 0x2eb   : > { %v1182_v45 = vpop.eup %1181 }
 0x2ec   : > { %v459_v46 = vsel %vm452_vm7, %v1182_v45, 0.0 }
 0x2ed   : > { %460 = vadd.xlane.f32.xlu1 %v459_v46 }
 0x2fe   : > { %514 = vrot.lane.b32.xlu1 %v400_v30, %s1229_s0 }
 0x302   : > { %627 = vrot.lane.b32.xlu1 %v401_v21, %s1230_s18 }
 0x306   : > { %625 = vrot.lane.b32.xlu1 %v400_v30, %s1231_s19 }
 0x30a   : > { %737 = vrot.lane.b32.xlu1 %v401_v21, %s1232_s20 }
 0x37a   : > { %v461_v48 = vpop.xlane.xlu1 %460 }
 0x37b   : > { %1183 = vrcp.f32 %v461_v48 }
 0x37e   : > { %v515_v49 = vpop.permute.xlu1 %514 }
 0x382   : > { %v628_v50 = vpop.permute.xlu1 %627 }
 0x383   : > { %v633_v51 = vsel %vm405_vm2, %v628_v50, 0 }
 0x384   : > { %1110 = vmatpush3.bf16.xpose.msra.mxu0 %v633_v51 }
 0x385   : > { %v1184_v52 = vpop.eup %1183  ;;  %1121 = vmatprep.subr.bf16.mxu0 %v1223_v13 }
 0x386   : > { %v463_v53 = vmul.f32 %v1184_v52, %v1182_v45  ;;  %v626_v54 = vpop.permute.xlu1 %625 }
 0x388   : > { %v464_v55 = vpack.c.bf16 %v463_v53, %v463_v53  ;;  %v1177_v53 = vld [vmem:[%s1454_s4] sm:$0xff]  }
 0x38a   : > { %1094 = vmatmul.mubr.msk.bf16.vlgmr.msra.gmra.mrb[4].mxu1 %vm452_vm7, %v464_v55  ;;  %v738_v57 = vpop.permute.xlu1 %737  ;;  %v1179_v55 = vld [vmem:[%s1454_s4 + $0x10] sm:$0xff]  }
 0x38b   : > { %1098 = vmatpush3.bf16.xpose.msra.mxu1 %v522_v56  ;;  %v743_v58 = vsel %vm405_vm2, %v738_v57, 0  ;;  %1112 = vmatmul.mubr.msk.bf16.vlgmr.msra.gmra.mrb[4].mxu0 %vm405_vm2, %v626_v54  ;;  %v1178_v54 = vld [vmem:[%s1454_s4 + $0x8] sm:$0xff]  }
 0x38c   : > { %1122 = vmatpush3.bf16.xpose.msra.mxu0 %v743_v58  ;;  %1099 = vmatprep.mubr.msk.bf16.mxu1 %vm1224_vm1, %v1223_v13 }
 0x38d   : > { %1123 = vmatprep.mubr.msk.bf16.mxu0 %vm1224_vm1, %v1223_v13  ;;  %1103 = vmatprep.subr.bf16.mxu1 %v1223_v13 }
 0x38e   : > { %1133 = vmatprep.subr.bf16.mxu0 %v1223_v13 }
 0x392   : > { %1100 = vmatmul.mubr.msk.bf16.vlgmr.msra.gmra.mrb[8].mxu1 %vm405_vm2, %v515_v49 }
 0x393   : > { %1124 = vmatmul.mubr.msk.bf16.vlgmr.msra.gmra.mrb[8].mxu0 %vm405_vm2, %v736_v59  ;;  %1105 = vmatprep.mubr.msk.bf16.mxu1 %vm1224_vm1, %v1223_v13 }
 0x394   : > { %1141 = vmatprep.mubr.msk.bf16.mxu0 %vm1224_vm1, %v1223_v13  ;;  %1134 = vmatpush3.bf16.msra.mxu0 %v1177_v53 }
 0x395   : > { %1135 = vmatprep.subr.bf16.mxu0 %v1223_v13 }
 0x398   : > { %1136 = vmatpush3.bf16.msra.mxu0 %v1178_v54 }
 0x399   : > { %1137 = vmatprep.subr.bf16.mxu0 %v1223_v13 }
 0x39c   : > { %1138 = vmatpush3.bf16.msra.mxu0 %v1179_v55 }
 0x39d   : > { %1139 = vmatprep.subr.bf16.mxu0 %v1223_v13 }
 0x45d   : > { %v1379_v60 = vpop.f32.mrb[4].mxu1 }
 0x45e   : > { %v1095_v61 = vpop.f32.mrb[5].mxu1  ;;  %v669_v62 = vpop.f32.mrb[4].mxu0 }
 0x45f   : > { %v670_v63 = vadd.f32 %v669_v62, %v1351_v35  ;;  %v510_v0 = vpop.f32.mrb[6].mxu1  ;;  %v1113_v1 = vpop.f32.mrb[5].mxu0  ;;  %v1180_v61 = vld [vmem:[%s1454_s4 + $0x18] sm:$0xff]  }
 0x460   : > { %v1096_v2 = vpop.f32.mrb[7].mxu1  ;;  %v672_v3 = vpop.f32.mrb[6].mxu0  ;;  %1140 = vmatpush3.bf16.msra.mxu0 %v1180_v61 }
 0x461   : > { %v1114_v4 = vpop.f32.mrb[7].mxu0  ;;  %v675_v5 = vsel %vm452_vm7, %v670_v63, -inf }
 0x462   : > { %676 = vmax.xlane.f32.xlu0 %v675_v5 }
 0x465   : > { %v558_v6 = vpop.f32.mrb[8].mxu1 }
 0x466   : > { %v559_v7 = vadd.f32 %v558_v6, %v1351_v35  ;;  %v1101_v8 = vpop.f32.mrb[9].mxu1  ;;  %v779_v10 = vpop.f32.mrb[8].mxu0 }
 0x467   : > { %v561_v11 = vpop.f32.mrb[10].mxu1  ;;  %v1125_v12 = vpop.f32.mrb[9].mxu0  ;;  %v780_v14 = vadd.f32 %v779_v10, %v1351_v35 }
 0x468   : > { %v1102_v15 = vpop.f32.mrb[11].mxu1  ;;  %v782_v16 = vpop.f32.mrb[10].mxu0  ;;  %v564_v17 = vsel %vm452_vm7, %v559_v7, -inf }
 0x469   : > { %v1126_v18 = vpop.f32.mrb[11].mxu0  ;;  %565 = vmax.xlane.f32.xlu1 %v564_v17  ;;  %v785_v19 = vsel %vm452_vm7, %v780_v14, -inf }
 0x46d   : > { %786 = vmax.xlane.f32.xlu1 %v785_v19 }
 0x478   : > { %577 = vrot.lane.b32.xlu0 %v1342_v29, %s1229_s0  ;;  %s280_s0 = scalar_lea.vmem %s1458_s8, %s1035_s24 }
 0x4ef   : > { %v677_v20 = vpop.xlane.xlu0 %676 }
 0x4f0   : > { %v678_v21 = vsub.f32 %v670_v63, %v677_v20 }
 0x4f2   : > { %v679_v22 = vmul.f32 1.442695, %v678_v21 }
 0x4f3   : > { %v578_v23 = vpop.permute.xlu0 %577 }
 0x4f4   : > { %1185 = vpow2.f32 %v679_v22  ;;  %v583_v24 = vsel %vm469_vm3, %v578_v23, 0 }
 0x4f5   : > { %1104 = vmatpush3.bf16.msra.mxu1 %v583_v24 }
 0x4f6   : > { %v566_v25 = vpop.xlane.xlu1 %565  ;;  %1115 = vmatprep.subr.bf16.mxu1 %v1223_v13 }
 0x4f7   : > { %v567_v26 = vsub.f32 %v559_v7, %v566_v25 }
 0x4f9   : > { %v568_v30 = vmul.f32 1.442695, %v567_v26 }
 0x4fa   : > { %v787_v27 = vpop.xlane.xlu1 %786 }
 0x4fb   : > { %v788_v28 = vsub.f32 %v780_v14, %v787_v27  ;;  %v1054_v14 = vld [vmem:[%s1455_s5] ss:$0 sm:$0xff] }
 0x4fd   : > { %v789_v31 = vmul.f32 1.442695, %v788_v28 }
 0x4fe   : > { %v1186_v32 = vpop.eup %1185 }
 0x4ff   : > { %1187 = vpow2.f32 %v789_v31  ;;  %v681_v33 = vsel %vm452_vm7, %v1186_v32, 0.0 }
 0x500   : > { %682 = vadd.xlane.f32.xlu1 %v681_v33  ;;  %1189 = vpow2.f32 %v568_v30 }
 0x509   : > { %v1188_v34 = vpop.eup %1187 }
 0x50a   : > { %v791_v35 = vsel %vm452_vm7, %v1188_v34, 0.0  ;;  %v1190_v36 = vpop.eup %1189 }
 0x50b   : > { %792 = vadd.xlane.f32.xlu1 %v791_v35  ;;  %v570_v37 = vsel %vm452_vm7, %v1190_v36, 0.0 }
 0x50f   : > { %571 = vadd.xlane.f32.xlu1 %v570_v37 }
 0x520   : > { %687 = vrot.lane.b32.xlu1 %v1342_v29, %s1231_s19 }
 0x524   : > { %797 = vrot.lane.b32.xlu1 %v1342_v29, %s1228_s16 }
 0x58d   : > { %v683_v38 = vpop.xlane.xlu1 %682 }
 0x598   : > { %v793_v39 = vpop.xlane.xlu1 %792 }
 0x59c   : > { %v572_v40 = vpop.xlane.xlu1 %571 }
 0x59d   : > { %1191 = vrcp.f32 %v572_v40 }
 0x59e   : > { %1193 = vrcp.f32 %v683_v38 }
 0x59f   : > { %1195 = vrcp.f32 %v793_v39 }
 0x5a0   : > { %v688_v43 = vpop.permute.xlu1 %687 }
 0x5a1   : > { %v693_v46 = vsel %vm469_vm3, %v688_v43, 0 }
 0x5a4   : > { %v798_v47 = vpop.permute.xlu1 %797 }
 0x5a5   : > { %v803_v50 = vsel %vm469_vm3, %v798_v47, 0 }
 0x5a7   : > { %v1192_v41 = vpop.eup %1191 }
 0x5a8   : > { %v574_v42 = vmul.f32 %v1192_v41, %v1190_v36  ;;  %v1194_v45 = vpop.eup %1193 }
 0x5a9   : > { %v685_v29 = vmul.f32 %v1194_v45, %v1186_v32  ;;  %v1196_v49 = vpop.eup %1195  ;;  %v1061_v32 = vld [vmem:[%s1457_s7] ss:$0 sm:$0xff] }
 0x5aa   : > { %v575_v44 = vpack.c.bf16 %v574_v42, %v574_v42  ;;  %v795_v51 = vmul.f32 %v1196_v49, %v1188_v34 }
 0x5ab   : > { %v686_v48 = vpack.c.bf16 %v685_v29, %v685_v29 }
 0x5ac   : > { %1106 = vmatmul.mubr.msk.bf16.vlgmr.msra.gmra.mrb[12].mxu1 %vm452_vm7, %v575_v44  ;;  %v796_v52 = vpack.c.bf16 %v795_v51, %v795_v51 }
 0x5ad   : > { %1116 = vmatpush3.bf16.msra.mxu1 %v693_v46  ;;  %1117 = vmatprep.mubr.msk.bf16.mxu1 %vm1224_vm1, %v1223_v13 }
 0x5ae   : > { %1127 = vmatprep.subr.bf16.mxu1 %v1223_v13 }
 0x5b4   : > { %1118 = vmatmul.mubr.msk.bf16.vlgmr.msra.gmra.mrb[16].mxu1 %vm452_vm7, %v686_v48 }
 0x5b5   : > { %1128 = vmatpush3.bf16.msra.mxu1 %v803_v50  ;;  %1129 = vmatprep.mubr.msk.bf16.mxu1 %vm1224_vm1, %v1223_v13 }
 0x5bc   : > { %1130 = vmatmul.mubr.msk.bf16.vlgmr.msra.gmra.mrb[20].mxu1 %vm452_vm7, %v796_v52 }
 0x67f   : > { %v619_v56 = vpop.f32.mrb[12].mxu1 }
 0x680   : > { %846 = vrot.lane.b32.xlu0 %v619_v56, %s1232_s20  ;;  %v1107_v57 = vpop.f32.mrb[13].mxu1 }
 0x681   : > { %v622_v58 = vpop.f32.mrb[14].mxu1 }
 0x682   : > { %v1108_v59 = vpop.f32.mrb[15].mxu1 }
 0x687   : > { %v729_v62 = vpop.f32.mrb[16].mxu1 }
 0x688   : > { %850 = vrot.lane.b32.xlu1 %v729_v62, %s1230_s18  ;;  %v1119_v63 = vpop.f32.mrb[17].mxu1 }
 0x689   : > { %v732_v0 = vpop.f32.mrb[18].mxu1 }
 0x68a   : > { %v1120_v1 = vpop.f32.mrb[19].mxu1 }
 0x68f   : > { %v839_v2 = vpop.f32.mrb[20].mxu1 }
 0x690   : > { %854 = vrot.lane.b32.xlu0 %v839_v2, %s1225_s13  ;;  %v1131_v3 = vpop.f32.mrb[21].mxu1 }
 0x691   : > { %v842_v4 = vpop.f32.mrb[22].mxu1 }
 0x692   : > { %v1132_v5 = vpop.f32.mrb[23].mxu1 }
 0x6f2   : > { %v847_v6 = vpop.permute.xlu0 %846 }
 0x6f3   : > { %v857_v7 = vsel %vm405_vm2, %v1379_v60, %v847_v6 }
 0x6fa   : > { %v851_v13 = vpop.permute.xlu1 %850 }
 0x6fb   : > { %v859_v8 = vsel %vm858_vm8, %v857_v7, %v851_v13 }
 0x702   : > { %v855_v10 = vpop.permute.xlu0 %854 }
 0x703   : > { %v861_v11 = vsel %vm860_vm9, %v859_v8, %v855_v10 }
 0x704   : > { %v862_v12 = vpack.c.bf16 %v861_v11, %v861_v11 }
 0x706   : > { %1142 = vmatmul.mubr.msk.bf16.vlgmr.msra.gmra.mrb[12].mxu0 %vm344_vm0, %v862_v12 }
 0x7d9   : > { %v939_v15 = vpop.f32.mrb[12].mxu0 }
 0x7da   : > { %v940_v16 = vadd.f32 %v1054_v14, %v939_v15  ;;  %v1143_v17 = vpop.f32.mrb[13].mxu0 }
 0x7db   : > { %v942_v18 = vpop.f32.mrb[14].mxu0 }
 0x7dc   : > { %v1144_v19 = vpop.f32.mrb[15].mxu0  ;;  %v945_v20 = vadd.f32 %v940_v16, %v1325_v9  ;;  %v1060_v9 = vld [vmem:[%s1456_s6] ss:$0 sm:$0xff] }
 0x7de   : > { %v948_v21 = vsel %vm344_vm0, %v945_v20, 0.0 }
 0x7df   : > { %949 = vadd.xlane.f32.xlu1 %v948_v21 }
 0x86c   : > { %v950_v60 = vpop.xlane.xlu1 %949 }
 0x86d   : > { %v952_v22 = vmul.f32 0.015625, %v950_v60 }
 0x86f   : > { %v953_v23 = vsub.f32 %v945_v20, %v952_v22 }
 0x871   : > { %v954_v24 = vmul.f32 %v953_v23, %v953_v23 }
 0x873   : > { %v955_v25 = vsel %vm344_vm0, %v954_v24, 0.0 }
 0x874   : > { %956 = vadd.xlane.f32.xlu0 %v955_v25 }
 0x901   : > { %v957_v26 = vpop.xlane.xlu0 %956 }
 0x902   : > { %v958_v27 = vmul.f32 0.015625, %v957_v26 }
 0x904   : > { %v959_v28 = vadd.f32 1e-05, %v958_v27 }
 0x906   : > { %1197 = vrsqrt.f32 %v959_v28 }
 0x910   : > { %v1198_v30 = vpop.eup %1197 }
 0x911   : > { %v961_v31 = vmul.f32 %v1198_v30, %v953_v23 }
 0x913   : > { %v968_v33 = vmul.f32 %v1060_v9, %v961_v31 }
 0x915   : > { %v975_v34 = vadd.f32 %v1061_v32, %v968_v33 }
 0x917   : > { %976 = vst.msk [vmem:[%s280_s0] sm:$0xff] %vm344_vm0, %v975_v34 }
 0x918 PF: > { %s24_s10 = sadd.s32 1, %s1219_s10  }
 0x919   : > { %p21_p9 = scmp.ge.s32.totalorder %s24_s10, 4  }
 0x91b   :  { %23 = sbr.rel (!%p21_p9) target bundleno = 16 (0x10), region = 78 }

// kernel: form_model_forward_training.10
= control target key start
LH: loop header
LB: loop body
LE: loop exit
PB: predicated region body
PF: predicated region fallthrough
CT: control target
= control target key end

     0   :  { %vm2199_vm0 = vmmov 0   ;;  %vm1263_vm1 = vcmask 523264   ;;  %s2790_s1 = inlined_call_operand.vmem [shape: bf16[2368,64], index: 1, kind: input, shape index: {}]   ;;  %s2791_s0 = inlined_call_operand.vmem [shape: f32[16,2368], index: 0, kind: input, shape index: {}]   ;;  %s2792_s2 = inlined_call_operand.vmem [shape: f32[1,64], index: 2, kind: input, shape index: {}]   ;;  %s2793_s3 = inlined_call_operand.vmem [shape: f32[16,64], index: 3, kind: output, shape index: {}]  }
   0x1   :  { %v2050_v0 = vld [vmem:[%s2790_s1 + $0x40] sm:$0xff]   ;;  %v2054_v4 = vld [vmem:[%s2790_s1 + $0x48] sm:$0xff]   ;;  %v2058_v8 = vld [vmem:[%s2790_s1 + $0x50] sm:$0xff]  }
   0x2   :  { %v2051_v1 = vld [vmem:[%s2790_s1] sm:$0xff]   ;;  %1833 = vmatprep.subr.bf16.mxu0 %v2050_v0  ;;  %v2055_v5 = vld [vmem:[%s2790_s1 + $0x8] sm:$0xff]   ;;  %v2059_v9 = vld [vmem:[%s2790_s1 + $0x10] sm:$0xff]  }
   0x3   :  { %v2052_v2 = vld [vmem:[%s2790_s1 + $0xc0] sm:$0xff]   ;;  %1834 = vmatpush3.bf16.msra.mxu0 %v2051_v1  ;;  %v2056_v6 = vld [vmem:[%s2790_s1 + $0xc8] sm:$0xff]   ;;  %v2060_v10 = vld [vmem:[%s2790_s1 + $0xd0] sm:$0xff]  }
   0x4   :  { %v2053_v3 = vld [vmem:[%s2790_s1 + $0x80] sm:$0xff]   ;;  %1855 = vmatprep.subr.bf16.mxu1 %v2052_v2  ;;  %1835 = vmatprep.subr.bf16.mxu0 %v2054_v4  ;;  %v2057_v7 = vld [vmem:[%s2790_s1 + $0x88] sm:$0xff]   ;;  %v2061_v11 = vld [vmem:[%s2790_s1 + $0x90] sm:$0xff]  }
   0x5   :  { %1856 = vmatpush3.bf16.msra.mxu1 %v2053_v3  ;;  %v2062_v12 = vld [vmem:[%s2790_s1 + $0x58] sm:$0xff]   ;;  %v2066_v16 = vld [vmem:[%s2790_s1 + $0x60] sm:$0xff]   ;;  %v2070_v20 = vld [vmem:[%s2790_s1 + $0x68] sm:$0xff]  }
   0x6   :  { %1857 = vmatprep.subr.bf16.mxu1 %v2056_v6  ;;  %v2063_v13 = vld [vmem:[%s2790_s1 + $0x18] sm:$0xff]   ;;  %v2067_v17 = vld [vmem:[%s2790_s1 + $0x20] sm:$0xff]   ;;  %v2071_v21 = vld [vmem:[%s2790_s1 + $0x28] sm:$0xff]  }
   0x7   :  { %1836 = vmatpush3.bf16.msra.mxu0 %v2055_v5  ;;  %v2064_v14 = vld [vmem:[%s2790_s1 + $0xd8] sm:$0xff]   ;;  %v2068_v18 = vld [vmem:[%s2790_s1 + $0xe0] sm:$0xff]   ;;  %v2072_v22 = vld [vmem:[%s2790_s1 + $0xe8] sm:$0xff]  }
   0x8   :  { %1837 = vmatprep.subr.bf16.mxu0 %v2058_v8  ;;  %v2065_v15 = vld [vmem:[%s2790_s1 + $0x98] sm:$0xff]   ;;  %v2069_v19 = vld [vmem:[%s2790_s1 + $0xa0] sm:$0xff]   ;;  %v2073_v23 = vld [vmem:[%s2790_s1 + $0xa8] sm:$0xff]  }
   0x9   :  { %1858 = vmatpush3.bf16.msra.mxu1 %v2057_v7  ;;  %v2074_v24 = vld [vmem:[%s2790_s1 + $0x70] sm:$0xff]   ;;  %v2078_v28 = vld [vmem:[%s2790_s1 + $0x78] sm:$0xff]   ;;  %v16_v31 = vld [vmem:[%s2791_s0 + $0x8] sm:$0xff] }
   0xa   :  { %1859 = vmatprep.subr.bf16.mxu1 %v2060_v10  ;;  %v2075_v25 = vld [vmem:[%s2790_s1 + $0x30] sm:$0xff]   ;;  %v2079_v29 = vld [vmem:[%s2790_s1 + $0x38] sm:$0xff]   ;;  %v35_v32 = vld [vmem:[%s2791_s0 + $0xa0] sm:$0xff] }
   0xb   :  { %1838 = vmatpush3.bf16.msra.mxu0 %v2059_v9  ;;  %v2076_v26 = vld [vmem:[%s2790_s1 + $0xf0] sm:$0xff]   ;;  %v2080_v30 = vld [vmem:[%s2790_s1 + $0xf8] sm:$0xff]   ;;  %v54_v33 = vpack.c.bf16 %v35_v32, %v16_v31  ;;  %v15_v35 = vld [vmem:[%s2791_s0] sm:$0xff] }
   0xc   :  { %1839 = vmatprep.subr.bf16.mxu0 %v2062_v12  ;;  %v2077_v27 = vld [vmem:[%s2790_s1 + $0xb0] sm:$0xff]   ;;  %v2081_v34 = vld [vmem:[%s2790_s1 + $0xb8] sm:$0xff]   ;;  %v2082_v38 = vld [vmem:[%s2790_s1 + $0x140] sm:$0xff]  }
   0xd   :  { %1860 = vmatpush3.bf16.msra.mxu1 %v2061_v11  ;;  %v34_v36 = vld [vmem:[%s2791_s0 + $0x98] sm:$0xff]  ;;  %1299 = vmatprep.mubr.bf16.mxu0 %v54_v33  ;;  %v37_v40 = vld [vmem:[%s2791_s0 + $0xb0] sm:$0xff]  ;;  %v2083_v42 = vld [vmem:[%s2790_s1 + $0x100] sm:$0xff]  }
   0xe   :  { %1861 = vmatprep.subr.bf16.mxu1 %v2064_v14  ;;  %v53_v37 = vpack.c.bf16 %v34_v36, %v15_v35  ;;  %v18_v39 = vld [vmem:[%s2791_s0 + $0x18] sm:$0xff]  ;;  %v17_v43 = vld [vmem:[%s2791_s0 + $0x10] sm:$0xff]  ;;  %v36_v44 = vld [vmem:[%s2791_s0 + $0xa8] sm:$0xff] }
   0xf   :  { %1840 = vmatpush3.bf16.msra.mxu0 %v2063_v13  ;;  %v56_v41 = vpack.c.bf16 %v37_v40, %v18_v39  ;;  %v55_v45 = vpack.c.bf16 %v36_v44, %v17_v43  ;;  %v2084_v46 = vld [vmem:[%s2790_s1 + $0x1c0] sm:$0xff]   ;;  %v2086_v48 = vld [vmem:[%s2790_s1 + $0x148] sm:$0xff]   ;;  %v2090_v52 = vld [vmem:[%s2790_s1 + $0x150] sm:$0xff]  }
  0x10   :  { %1841 = vmatprep.subr.bf16.mxu0 %v2066_v16  ;;  %v2085_v47 = vld [vmem:[%s2790_s1 + $0x180] sm:$0xff]   ;;  %v2087_v49 = vld [vmem:[%s2790_s1 + $0x108] sm:$0xff]   ;;  %v2091_v53 = vld [vmem:[%s2790_s1 + $0x110] sm:$0xff]  }
  0x11   :  { %1862 = vmatpush3.bf16.msra.mxu1 %v2065_v15  ;;  %1340 = vmatprep.mubr.bf16.mxu1 %v56_v41  ;;  %v2088_v50 = vld [vmem:[%s2790_s1 + $0x1c8] sm:$0xff]   ;;  %v2092_v54 = vld [vmem:[%s2790_s1 + $0x1d0] sm:$0xff]   ;;  %v2094_v56 = vld [vmem:[%s2790_s1 + $0x158] sm:$0xff]  }
  0x12   :  { %1863 = vmatprep.subr.bf16.mxu1 %v2068_v18  ;;  %v2089_v51 = vld [vmem:[%s2790_s1 + $0x188] sm:$0xff]   ;;  %v2093_v55 = vld [vmem:[%s2790_s1 + $0x190] sm:$0xff]   ;;  %v2095_v57 = vld [vmem:[%s2790_s1 + $0x118] sm:$0xff]  }
  0x13   :  { %1842 = vmatpush3.bf16.msra.mxu0 %v2067_v17  ;;  %v2096_v58 = vld [vmem:[%s2790_s1 + $0x1d8] sm:$0xff]   ;;  %v2098_v60 = vld [vmem:[%s2790_s1 + $0x160] sm:$0xff]   ;;  %v2102_v0 = vld [vmem:[%s2790_s1 + $0x168] sm:$0xff]  }
  0x14   :  { %1843 = vmatprep.subr.bf16.mxu0 %v2070_v20  ;;  %v2097_v59 = vld [vmem:[%s2790_s1 + $0x198] sm:$0xff]   ;;  %v2099_v61 = vld [vmem:[%s2790_s1 + $0x120] sm:$0xff]   ;;  %v2103_v1 = vld [vmem:[%s2790_s1 + $0x128] sm:$0xff]  }
  0x15   :  { %1864 = vmatpush3.bf16.msra.mxu1 %v2069_v19  ;;  %v2100_v62 = vld [vmem:[%s2790_s1 + $0x1e0] sm:$0xff]   ;;  %v2104_v2 = vld [vmem:[%s2790_s1 + $0x1e8] sm:$0xff]   ;;  %v2106_v4 = vld [vmem:[%s2790_s1 + $0x170] sm:$0xff]  }
  0x16   :  { %1865 = vmatprep.subr.bf16.mxu1 %v2072_v22  ;;  %v2101_v63 = vld [vmem:[%s2790_s1 + $0x1a0] sm:$0xff]   ;;  %v2105_v3 = vld [vmem:[%s2790_s1 + $0x1a8] sm:$0xff]   ;;  %v2107_v5 = vld [vmem:[%s2790_s1 + $0x130] sm:$0xff]  }
  0x17   :  { %1844 = vmatpush3.bf16.msra.mxu0 %v2071_v21  ;;  %v2108_v6 = vld [vmem:[%s2790_s1 + $0x1f0] sm:$0xff]   ;;  %v2110_v8 = vld [vmem:[%s2790_s1 + $0x178] sm:$0xff]   ;;  %v20_v11 = vld [vmem:[%s2791_s0 + $0x28] sm:$0xff] }
  0x18   :  { %1845 = vmatprep.subr.bf16.mxu0 %v2074_v24  ;;  %v2109_v7 = vld [vmem:[%s2790_s1 + $0x1b0] sm:$0xff]   ;;  %v2111_v9 = vld [vmem:[%s2790_s1 + $0x138] sm:$0xff]   ;;  %v39_v12 = vld [vmem:[%s2791_s0 + $0xc0] sm:$0xff] }
  0x19   :  { %1866 = vmatpush3.bf16.msra.mxu1 %v2073_v23  ;;  %v2112_v10 = vld [vmem:[%s2790_s1 + $0x1f8] sm:$0xff]   ;;  %v58_v13 = vpack.c.bf16 %v39_v12, %v20_v11  ;;  %v19_v15 = vld [vmem:[%s2791_s0 + $0x20] sm:$0xff]  ;;  %v41_v20 = vld [vmem:[%s2791_s0 + $0xd0] sm:$0xff] }
  0x1a   :  { %1867 = vmatprep.subr.bf16.mxu1 %v2076_v26  ;;  %v2113_v14 = vld [vmem:[%s2790_s1 + $0x1b8] sm:$0xff]   ;;  %v2114_v18 = vld [vmem:[%s2790_s1 + $0x240] sm:$0xff]   ;;  %v21_v23 = vld [vmem:[%s2791_s0 + $0x30] sm:$0xff] }
  0x1b   :  { %1846 = vmatpush3.bf16.msra.mxu0 %v2075_v25  ;;  %v38_v16 = vld [vmem:[%s2791_s0 + $0xb8] sm:$0xff]  ;;  %v2115_v22 = vld [vmem:[%s2790_s1 + $0x200] sm:$0xff]   ;;  %v40_v24 = vld [vmem:[%s2791_s0 + $0xc8] sm:$0xff] }
  0x1c   :  { %1847 = vmatprep.subr.bf16.mxu0 %v2078_v28  ;;  %v57_v17 = vpack.c.bf16 %v38_v16, %v19_v15  ;;  %v22_v19 = vld [vmem:[%s2791_s0 + $0x38] sm:$0xff]  ;;  %v59_v25 = vpack.c.bf16 %v40_v24, %v21_v23  ;;  %v2116_v26 = vld [vmem:[%s2790_s1 + $0x2c0] sm:$0xff]   ;;  %v2118_v28 = vld [vmem:[%s2790_s1 + $0x248] sm:$0xff]  }
  0x1d   :  { %1868 = vmatpush3.bf16.msra.mxu1 %v2077_v27  ;;  %v60_v21 = vpack.c.bf16 %v41_v20, %v22_v19  ;;  %v2117_v27 = vld [vmem:[%s2790_s1 + $0x280] sm:$0xff]   ;;  %v2121_v31 = vld [vmem:[%s2790_s1 + $0x288] sm:$0xff]   ;;  %v2122_v32 = vld [vmem:[%s2790_s1 + $0x250] sm:$0xff]  }
  0x1e   :  { %1869 = vmatprep.subr.bf16.mxu1 %v2080_v30  ;;  %v2120_v30 = vld [vmem:[%s2790_s1 + $0x2c8] sm:$0xff]   ;;  %v2123_v33 = vld [vmem:[%s2790_s1 + $0x210] sm:$0xff]   ;;  %v2126_v36 = vld [vmem:[%s2790_s1 + $0x258] sm:$0xff]  }
  0x1f   :  { %1848 = vmatpush3.bf16.msra.mxu0 %v2079_v29  ;;  %v2119_v29 = vld [vmem:[%s2790_s1 + $0x208] sm:$0xff]   ;;  %v2125_v35 = vld [vmem:[%s2790_s1 + $0x290] sm:$0xff]   ;;  %v2129_v39 = vld [vmem:[%s2790_s1 + $0x298] sm:$0xff]  }
  0x20   :  { %1877 = vmatprep.subr.bf16.mxu0 %v2082_v38  ;;  %v2128_v38 = vld [vmem:[%s2790_s1 + $0x2d8] sm:$0xff]   ;;  %v2130_v40 = vld [vmem:[%s2790_s1 + $0x260] sm:$0xff]   ;;  %v2134_v44 = vld [vmem:[%s2790_s1 + $0x268] sm:$0xff]  }
  0x21   :  { %1870 = vmatpush3.bf16.msra.mxu1 %v2081_v34  ;;  %v2124_v34 = vld [vmem:[%s2790_s1 + $0x2d0] sm:$0xff]   ;;  %v2131_v41 = vld [vmem:[%s2790_s1 + $0x220] sm:$0xff]   ;;  %v2153_v11 = vld [vmem:[%s2790_s1 + $0x388] sm:$0xff]  }
  0x22   :  { %1300 = vmatmul.mubr.bf16.vlgmr.msra.gmra.mrb[0].mxu0 %v53_v37  ;;  %1899 = vmatprep.subr.bf16.mxu1 %v2084_v46  ;;  %v2127_v37 = vld [vmem:[%s2790_s1 + $0x218] sm:$0xff]   ;;  %v2133_v43 = vld [vmem:[%s2790_s1 + $0x2a0] sm:$0xff]   ;;  %v2136_v46 = vld [vmem:[%s2790_s1 + $0x2e8] sm:$0xff]  }
  0x23   :  { %1878 = vmatpush3.bf16.msra.mxu0 %v2083_v42  ;;  %1381 = vmatprep.mubr.bf16.mxu0 %v58_v13  ;;  %v2132_v42 = vld [vmem:[%s2790_s1 + $0x2e0] sm:$0xff]   ;;  %v2154_v12 = vld [vmem:[%s2790_s1 + $0x350] sm:$0xff]   ;;  %v2158_v16 = vld [vmem:[%s2790_s1 + $0x358] sm:$0xff]  }
  0x24   :  { %1341 = vmatmul.mubr.bf16.vlgmr.msra.gmra.mrb[0].mxu1 %v55_v45  ;;  %1879 = vmatprep.subr.bf16.mxu0 %v2086_v48  ;;  %v2135_v45 = vld [vmem:[%s2790_s1 + $0x228] sm:$0xff]   ;;  %v2138_v48 = vld [vmem:[%s2790_s1 + $0x270] sm:$0xff]   ;;  %v2161_v19 = vld [vmem:[%s2790_s1 + $0x398] sm:$0xff]  }
  0x25   :  { %1900 = vmatpush3.bf16.msra.mxu1 %v2085_v47  ;;  %1422 = vmatprep.mubr.bf16.mxu1 %v60_v21  ;;  %v2137_v47 = vld [vmem:[%s2790_s1 + $0x2a8] sm:$0xff]   ;;  %v2155_v13 = vld [vmem:[%s2790_s1 + $0x310] sm:$0xff]   ;;  %v2162_v20 = vld [vmem:[%s2790_s1 + $0x360] sm:$0xff]  }
  0x26   :  { %1901 = vmatprep.subr.bf16.mxu1 %v2088_v50  ;;  %v2140_v50 = vld [vmem:[%s2790_s1 + $0x2f0] sm:$0xff]   ;;  %v2163_v21 = vld [vmem:[%s2790_s1 + $0x320] sm:$0xff]   ;;  %v2166_v24 = vld [vmem:[%s2790_s1 + $0x368] sm:$0xff]  }
  0x27   :  { %1880 = vmatpush3.bf16.msra.mxu0 %v2087_v49  ;;  %v2139_v49 = vld [vmem:[%s2790_s1 + $0x230] sm:$0xff]   ;;  %v2165_v23 = vld [vmem:[%s2790_s1 + $0x3a0] sm:$0xff]  }
  0x28   :  { %1881 = vmatprep.subr.bf16.mxu0 %v2090_v52  ;;  %v2142_v52 = vld [vmem:[%s2790_s1 + $0x278] sm:$0xff]   ;;  %v2157_v15 = vld [vmem:[%s2790_s1 + $0x390] sm:$0xff]  }
  0x29   :  { %1902 = vmatpush3.bf16.msra.mxu1 %v2089_v51  ;;  %v2141_v51 = vld [vmem:[%s2790_s1 + $0x2b0] sm:$0xff]  }
  0x2a   :  { %1903 = vmatprep.subr.bf16.mxu1 %v2092_v54  ;;  %v2144_v54 = vld [vmem:[%s2790_s1 + $0x2f8] sm:$0xff]  }
  0x2b   :  { %1882 = vmatpush3.bf16.msra.mxu0 %v2091_v53  ;;  %v2143_v53 = vld [vmem:[%s2790_s1 + $0x238] sm:$0xff]  }
  0x2c   :  { %1883 = vmatprep.subr.bf16.mxu0 %v2094_v56  ;;  %v43_v56 = vld [vmem:[%s2791_s0 + $0xe0] sm:$0xff] }
  0x2d   :  { %1904 = vmatpush3.bf16.msra.mxu1 %v2093_v55  ;;  %v24_v55 = vld [vmem:[%s2791_s0 + $0x48] sm:$0xff] }
  0x2e   :  { %1905 = vmatprep.subr.bf16.mxu1 %v2096_v58  ;;  %v2145_v58 = vld [vmem:[%s2790_s1 + $0x2b8] sm:$0xff]  }
  0x2f   :  { %1884 = vmatpush3.bf16.msra.mxu0 %v2095_v57  ;;  %v62_v57 = vpack.c.bf16 %v43_v56, %v24_v55  ;;  %v2184_v55 = vld [vmem:[%s2790_s1 + $0x458] sm:$0xff]  }
  0x30   :  { %1885 = vmatprep.subr.bf16.mxu0 %v2098_v60  ;;  %v42_v60 = vld [vmem:[%s2791_s0 + $0xd8] sm:$0xff] }
  0x31   :  { %1906 = vmatpush3.bf16.msra.mxu1 %v2097_v59  ;;  %v23_v59 = vld [vmem:[%s2791_s0 + $0x40] sm:$0xff]  ;;  %v2185_v56 = vld [vmem:[%s2790_s1 + $0x418] sm:$0xff]  }
  0x32   :  { %1907 = vmatprep.subr.bf16.mxu1 %v2100_v62  ;;  %v2146_v62 = vld [vmem:[%s2790_s1 + $0x340] sm:$0xff]  }
  0x33   :  { %1886 = vmatpush3.bf16.msra.mxu0 %v2099_v61  ;;  %v61_v61 = vpack.c.bf16 %v42_v60, %v23_v59  ;;  %v2191_v59 = vld [vmem:[%s2790_s1 + $0x488] sm:$0xff]   ;;  %v2187_v60 = vld [vmem:[%s2790_s1 + $0x420] sm:$0xff]  }
  0x34   :  { %1887 = vmatprep.subr.bf16.mxu0 %v2102_v0  ;;  %v45_v0 = vld [vmem:[%s2791_s0 + $0xf0] sm:$0xff] }
  0x35   :  { %1908 = vmatpush3.bf16.msra.mxu1 %v2101_v63  ;;  %v26_v63 = vld [vmem:[%s2791_s0 + $0x58] sm:$0xff] }
  0x36   :  { %1909 = vmatprep.subr.bf16.mxu1 %v2104_v2  ;;  %v2147_v2 = vld [vmem:[%s2790_s1 + $0x300] sm:$0xff]  }
  0x37   :  { %1888 = vmatpush3.bf16.msra.mxu0 %v2103_v1  ;;  %v64_v1 = vpack.c.bf16 %v45_v0, %v26_v63  ;;  %v2190_v63 = vld [vmem:[%s2790_s1 + $0x428] sm:$0xff]   ;;  %v2192_v0 = vld [vmem:[%s2790_s1 + $0x470] sm:$0xff]  }
  0x38   :  { %1889 = vmatprep.subr.bf16.mxu0 %v2106_v4  ;;  %v44_v4 = vld [vmem:[%s2791_s0 + $0xe8] sm:$0xff] }
  0x39   :  { %1910 = vmatpush3.bf16.msra.mxu1 %v2105_v3  ;;  %v25_v3 = vld [vmem:[%s2791_s0 + $0x50] sm:$0xff] }
  0x3a   :  { %1911 = vmatprep.subr.bf16.mxu1 %v2108_v6  ;;  %v2148_v6 = vld [vmem:[%s2790_s1 + $0x3c0] sm:$0xff]  }
  0x3b   :  { %1890 = vmatpush3.bf16.msra.mxu0 %v2107_v5  ;;  %v63_v5 = vpack.c.bf16 %v44_v4, %v25_v3  ;;  %v2197_v4 = vld [vmem:[%s2790_s1 + $0x498] sm:$0xff]  }
  0x3c   :  { %1891 = vmatprep.subr.bf16.mxu0 %v2110_v8  ;;  %v2150_v8 = vld [vmem:[%s2790_s1 + $0x348] sm:$0xff]  }
  0x3d   :  { %1912 = vmatpush3.bf16.msra.mxu1 %v2109_v7  ;;  %v2149_v7 = vld [vmem:[%s2790_s1 + $0x380] sm:$0xff]  }
  0x3e   :  { %1913 = vmatprep.subr.bf16.mxu1 %v2112_v10  ;;  %v2152_v10 = vld [vmem:[%s2790_s1 + $0x3c8] sm:$0xff]  }
  0x3f   :  { %1892 = vmatpush3.bf16.msra.mxu0 %v2111_v9  ;;  %v2151_v9 = vld [vmem:[%s2790_s1 + $0x308] sm:$0xff]  }
  0x40   :  { %1921 = vmatprep.subr.bf16.mxu0 %v2114_v18  ;;  %v2160_v18 = vld [vmem:[%s2790_s1 + $0x3d8] sm:$0xff]  }
  0x41   :  { %1914 = vmatpush3.bf16.msra.mxu1 %v2113_v14  ;;  %v2156_v14 = vld [vmem:[%s2790_s1 + $0x3d0] sm:$0xff]  }
  0x42   :  { %1382 = vmatmul.mubr.bf16.vlgmr.msra.gmra.mrb[4].mxu0 %v57_v17  ;;  %1943 = vmatprep.subr.bf16.mxu1 %v2116_v26  ;;  %v2159_v17 = vld [vmem:[%s2790_s1 + $0x318] sm:$0xff]   ;;  %v2168_v26 = vld [vmem:[%s2790_s1 + $0x3e8] sm:$0xff]  }
  0x43   :  { %1922 = vmatpush3.bf16.msra.mxu0 %v2115_v22  ;;  %1463 = vmatprep.mubr.bf16.mxu0 %v62_v57  ;;  %v2164_v22 = vld [vmem:[%s2790_s1 + $0x3e0] sm:$0xff]  }
  0x44   :  { %1423 = vmatmul.mubr.bf16.vlgmr.msra.gmra.mrb[4].mxu1 %v59_v25  ;;  %1923 = vmatprep.subr.bf16.mxu0 %v2118_v28  ;;  %v2167_v25 = vld [vmem:[%s2790_s1 + $0x328] sm:$0xff]   ;;  %v2170_v28 = vld [vmem:[%s2790_s1 + $0x370] sm:$0xff]   ;;  %v2188_v57 = vld [vmem:[%s2790_s1 + $0x480] sm:$0xff]  }
  0x45   :  { %1944 = vmatpush3.bf16.msra.mxu1 %v2117_v27  ;;  %1504 = vmatprep.mubr.bf16.mxu1 %v64_v1  ;;  %v2169_v27 = vld [vmem:[%s2790_s1 + $0x3a8] sm:$0xff]  }
  0x46   :  { %1945 = vmatprep.subr.bf16.mxu1 %v2120_v30  ;;  %v2172_v30 = vld [vmem:[%s2790_s1 + $0x3f0] sm:$0xff]   ;;  %v32_v1 = vld [vmem:[%s2791_s0 + $0x88] sm:$0xff] }
  0x47   :  { %1924 = vmatpush3.bf16.msra.mxu0 %v2119_v29  ;;  %v2171_v29 = vld [vmem:[%s2790_s1 + $0x330] sm:$0xff]  }
  0x48   :  { %1925 = vmatprep.subr.bf16.mxu0 %v2122_v32  ;;  %v2174_v32 = vld [vmem:[%s2790_s1 + $0x378] sm:$0xff]  }
  0x49   :  { %1946 = vmatpush3.bf16.msra.mxu1 %v2121_v31  ;;  %v2173_v31 = vld [vmem:[%s2790_s1 + $0x3b0] sm:$0xff]  }
  0x4a   :  { %1947 = vmatprep.subr.bf16.mxu1 %v2124_v34  ;;  %v2176_v34 = vld [vmem:[%s2790_s1 + $0x3f8] sm:$0xff]  }
  0x4b   :  { %1926 = vmatpush3.bf16.msra.mxu0 %v2123_v33  ;;  %v2175_v33 = vld [vmem:[%s2790_s1 + $0x338] sm:$0xff]  }
  0x4c   :  { %1927 = vmatprep.subr.bf16.mxu0 %v2126_v36  ;;  %v47_v36 = vld [vmem:[%s2791_s0 + $0x100] sm:$0xff] }
  0x4d   :  { %1948 = vmatpush3.bf16.msra.mxu1 %v2125_v35  ;;  %v28_v35 = vld [vmem:[%s2791_s0 + $0x68] sm:$0xff] }
  0x4e   :  { %1949 = vmatprep.subr.bf16.mxu1 %v2128_v38  ;;  %v2177_v38 = vld [vmem:[%s2790_s1 + $0x3b8] sm:$0xff]  }
  0x4f   :  { %1928 = vmatpush3.bf16.msra.mxu0 %v2127_v37  ;;  %v66_v37 = vpack.c.bf16 %v47_v36, %v28_v35 }
  0x50   :  { %1929 = vmatprep.subr.bf16.mxu0 %v2130_v40  ;;  %v46_v40 = vld [vmem:[%s2791_s0 + $0xf8] sm:$0xff] }
  0x51   :  { %1950 = vmatpush3.bf16.msra.mxu1 %v2129_v39  ;;  %v27_v39 = vld [vmem:[%s2791_s0 + $0x60] sm:$0xff] }
  0x52   :  { %1951 = vmatprep.subr.bf16.mxu1 %v2132_v42  ;;  %v2178_v42 = vld [vmem:[%s2790_s1 + $0x440] sm:$0xff]  }
  0x53   :  { %1930 = vmatpush3.bf16.msra.mxu0 %v2131_v41  ;;  %v65_v41 = vpack.c.bf16 %v46_v40, %v27_v39 }
  0x54   :  { %1931 = vmatprep.subr.bf16.mxu0 %v2134_v44  ;;  %v49_v44 = vld [vmem:[%s2791_s0 + $0x110] sm:$0xff] }
  0x55   :  { %1952 = vmatpush3.bf16.msra.mxu1 %v2133_v43  ;;  %v30_v43 = vld [vmem:[%s2791_s0 + $0x78] sm:$0xff] }
  0x56   :  { %1953 = vmatprep.subr.bf16.mxu1 %v2136_v46  ;;  %v2179_v46 = vld [vmem:[%s2790_s1 + $0x400] sm:$0xff]  }
  0x57   :  { %1932 = vmatpush3.bf16.msra.mxu0 %v2135_v45  ;;  %v68_v45 = vpack.c.bf16 %v49_v44, %v30_v43 }
  0x58   :  { %1933 = vmatprep.subr.bf16.mxu0 %v2138_v48  ;;  %v29_v48 = vld [vmem:[%s2791_s0 + $0x70] sm:$0xff] }
  0x59   :  { %1954 = vmatpush3.bf16.msra.mxu1 %v2137_v47  ;;  %v2198_v47 = vmov 0.0  }
  0x5a   :  { %1955 = vmatprep.subr.bf16.mxu1 %v2140_v50 }
  0x5b   :  { %1934 = vmatpush3.bf16.msra.mxu0 %v2139_v49  ;;  %v48_v49 = vld [vmem:[%s2791_s0 + $0x108] sm:$0xff] }
  0x5c   :  { %1935 = vmatprep.subr.bf16.mxu0 %v2142_v52  ;;  %v67_v50 = vpack.c.bf16 %v48_v49, %v29_v48  ;;  %v2181_v52 = vld [vmem:[%s2790_s1 + $0x408] sm:$0xff]  }
  0x5d   :  { %1956 = vmatpush3.bf16.msra.mxu1 %v2141_v51  ;;  %v2180_v51 = vld [vmem:[%s2790_s1 + $0x448] sm:$0xff]  }
  0x5e   :  { %1957 = vmatprep.subr.bf16.mxu1 %v2144_v54  ;;  %v2183_v54 = vld [vmem:[%s2790_s1 + $0x410] sm:$0xff]  }
  0x5f   :  { %1936 = vmatpush3.bf16.msra.mxu0 %v2143_v53  ;;  %v2182_v53 = vld [vmem:[%s2790_s1 + $0x450] sm:$0xff]  }
  0x60   :  { %1965 = vmatprep.subr.bf16.mxu0 %v2146_v62  ;;  %v2194_v62 = vld [vmem:[%s2790_s1 + $0x490] sm:$0xff]  }
  0x61   :  { %1958 = vmatpush3.bf16.msra.mxu1 %v2145_v58  ;;  %v2186_v58 = vld [vmem:[%s2790_s1 + $0x460] sm:$0xff]  }
  0x62   :  { %1464 = vmatmul.mubr.bf16.vlgmr.msra.gmra.mrb[8].mxu0 %v61_v61  ;;  %1987 = vmatprep.subr.bf16.mxu1 %v2148_v6  ;;  %v2189_v61 = vld [vmem:[%s2790_s1 + $0x468] sm:$0xff]  }
  0x63   :  { %1966 = vmatpush3.bf16.msra.mxu0 %v2147_v2  ;;  %1545 = vmatprep.mubr.bf16.mxu0 %v66_v37  ;;  %v51_v2 = vld [vmem:[%s2791_s0 + $0x120] sm:$0xff]  ;;  %v52_v6 = vld [vmem:[%s2791_s0 + $0x128] sm:$0xff] }
  0x64   :  { %1505 = vmatmul.mubr.bf16.vlgmr.msra.gmra.mrb[8].mxu1 %v63_v5  ;;  %1967 = vmatprep.subr.bf16.mxu0 %v2150_v8  ;;  %v70_v3 = vpack.c.bf16 %v51_v2, %v32_v1  ;;  %v33_v5 = vld [vmem:[%s2791_s0 + $0x90] sm:$0xff]  ;;  %v2195_v8 = vld [vmem:[%s2790_s1 + $0x478] sm:$0xff]  }
  0x65   :  { %1988 = vmatpush3.bf16.msra.mxu1 %v2149_v7  ;;  %1586 = vmatprep.mubr.bf16.mxu1 %v68_v45  ;;  %v2193_v7 = vld [vmem:[%s2790_s1 + $0x430] sm:$0xff]  }
  0x66   :  { %1989 = vmatprep.subr.bf16.mxu1 %v2152_v10  ;;  %v2196_v10 = vld [vmem:[%s2790_s1 + $0x438] sm:$0xff]  }
  0x67   :  { %1968 = vmatpush3.bf16.msra.mxu0 %v2151_v9  ;;  %v71_v9 = vpack.c.bf16 %v52_v6, %v33_v5 }
  0x68   :  { %1969 = vmatprep.subr.bf16.mxu0 %v2154_v12  ;;  %v50_v12 = vld [vmem:[%s2791_s0 + $0x118] sm:$0xff] }
  0x69   :  { %1990 = vmatpush3.bf16.msra.mxu1 %v2153_v11  ;;  %v31_v11 = vld [vmem:[%s2791_s0 + $0x80] sm:$0xff] }
  0x6a   :  { %1991 = vmatprep.subr.bf16.mxu1 %v2156_v14 }
  0x6b   :  { %1970 = vmatpush3.bf16.msra.mxu0 %v2155_v13  ;;  %v69_v13 = vpack.c.bf16 %v50_v12, %v31_v11 }
  0x6c   :  { %1971 = vmatprep.subr.bf16.mxu0 %v2158_v16 }
  0x6d   :  { %1992 = vmatpush3.bf16.msra.mxu1 %v2157_v15  ;;  %v1683_v15 = vld [vmem:[%s2792_s2] ss:$0 sm:$0xff] }
  0x6e   :  { %1993 = vmatprep.subr.bf16.mxu1 %v2160_v18 }
  0x6f   :  { %1972 = vmatpush3.bf16.msra.mxu0 %v2159_v17 }
  0x70   :  { %1973 = vmatprep.subr.bf16.mxu0 %v2162_v20 }
  0x71   :  { %1994 = vmatpush3.bf16.msra.mxu1 %v2161_v19 }
  0x72   :  { %1995 = vmatprep.subr.bf16.mxu1 %v2164_v22 }
  0x73   :  { %1974 = vmatpush3.bf16.msra.mxu0 %v2163_v21 }
  0x74   :  { %1975 = vmatprep.subr.bf16.mxu0 %v2166_v24 }
  0x75   :  { %1996 = vmatpush3.bf16.msra.mxu1 %v2165_v23 }
  0x76   :  { %1997 = vmatprep.subr.bf16.mxu1 %v2168_v26 }
  0x77   :  { %1976 = vmatpush3.bf16.msra.mxu0 %v2167_v25 }
  0x78   :  { %1977 = vmatprep.subr.bf16.mxu0 %v2170_v28 }
  0x79   :  { %1998 = vmatpush3.bf16.msra.mxu1 %v2169_v27 }
  0x7a   :  { %1999 = vmatprep.subr.bf16.mxu1 %v2172_v30 }
  0x7b   :  { %1978 = vmatpush3.bf16.msra.mxu0 %v2171_v29 }
  0x7c   :  { %1979 = vmatprep.subr.bf16.mxu0 %v2174_v32 }
  0x7d   :  { %2000 = vmatpush3.bf16.msra.mxu1 %v2173_v31 }
  0x7e   :  { %2001 = vmatprep.subr.bf16.mxu1 %v2176_v34 }
  0x7f   :  { %1980 = vmatpush3.bf16.msra.mxu0 %v2175_v33 }
  0x80   :  { %2009 = vmatprep.subr.bf16.mxu0 %v2178_v42 }
  0x81   :  { %2002 = vmatpush3.bf16.msra.mxu1 %v2177_v38 }
  0x82   :  { %2036 = vmatprep.subr.bf16.mxu1 %v2198_v47  ;;  %1546 = vmatmul.mubr.bf16.vlgmr.msra.gmra.mrb[12].mxu0 %v65_v41 }
  0x83   :  { %2010 = vmatpush3.bf16.msra.mxu0 %v2179_v46  ;;  %1627 = vmatprep.mubr.bf16.mxu0 %v70_v3 }
  0x84   :  { %1587 = vmatmul.mubr.bf16.vlgmr.msra.gmra.mrb[12].mxu1 %v67_v50  ;;  %2011 = vmatprep.subr.bf16.mxu0 %v2180_v51 }
  0x85   :  { %2044 = vmatprep.mubr.msk.bf16.mxu1 %vm2199_vm0, %v2198_v47  ;;  %2037 = vmatpush3.bf16.msra.mxu1 %v2188_v57 }
  0x86   :  { %2038 = vmatprep.subr.bf16.mxu1 %v2198_v47 }
  0x87   :  { %2012 = vmatpush3.bf16.msra.mxu0 %v2181_v52 }
  0x88   :  { %2013 = vmatprep.subr.bf16.mxu0 %v2182_v53 }
  0x89   :  { %2039 = vmatpush3.bf16.msra.mxu1 %v2191_v59 }
  0x8a   :  { %2040 = vmatprep.subr.bf16.mxu1 %v2198_v47 }
  0x8b   :  { %2014 = vmatpush3.bf16.msra.mxu0 %v2183_v54 }
  0x8c   :  { %2015 = vmatprep.subr.bf16.mxu0 %v2184_v55 }
  0x8d   :  { %2041 = vmatpush3.bf16.msra.mxu1 %v2194_v62 }
  0x8e   :  { %2042 = vmatprep.subr.bf16.mxu1 %v2198_v47 }
  0x8f   :  { %2016 = vmatpush3.bf16.msra.mxu0 %v2185_v56 }
  0x90   :  { %2017 = vmatprep.subr.bf16.mxu0 %v2186_v58 }
  0x91   :  { %2043 = vmatpush3.bf16.msra.mxu1 %v2197_v4 }
  0x93   :  { %2018 = vmatpush3.bf16.msra.mxu0 %v2187_v60 }
  0x94   :  { %2019 = vmatprep.subr.bf16.mxu0 %v2189_v61  ;;  %2045 = vmatmul.mubr.msk.bf16.vlgmr.msra.gmra.mrb[16].mxu1 %vm1263_vm1, %v71_v9 }
  0x97   :  { %2020 = vmatpush3.bf16.msra.mxu0 %v2190_v63 }
  0x98   :  { %2021 = vmatprep.subr.bf16.mxu0 %v2192_v0 }
  0x9b   :  { %2022 = vmatpush3.bf16.msra.mxu0 %v2193_v7 }
  0x9c   :  { %2023 = vmatprep.subr.bf16.mxu0 %v2195_v8 }
  0x9f   :  { %2024 = vmatpush3.bf16.msra.mxu0 %v2196_v10 }
  0xa2   :  { %1628 = vmatmul.mubr.bf16.vlgmr.msra.gmra.mrb[16].mxu0 %v69_v13 }
  0xf5   :  { %v1849_v14 = vpop.f32.mrb[0].mxu0 }
  0xf6   :  { %v1850_v16 = vpop.f32.mrb[1].mxu0 }
  0xf7   :  { %v1851_v17 = vadd.f32 %v1850_v16, %v1849_v14  ;;  %v1852_v18 = vpop.f32.mrb[2].mxu0  ;;  %v1871_v19 = vpop.f32.mrb[0].mxu1 }
  0xf8   :  { %v1853_v20 = vpop.f32.mrb[3].mxu0  ;;  %v1872_v23 = vpop.f32.mrb[1].mxu1 }
  0xf9   :  { %v1302_v21 = vadd.f32 %v1851_v17, %v1683_v15  ;;  %v1854_v22 = vadd.f32 %v1853_v20, %v1852_v18  ;;  %v1873_v24 = vadd.f32 %v1872_v23, %v1871_v19  ;;  %v1874_v25 = vpop.f32.mrb[2].mxu1 }
  0xfa   :  { %v1875_v27 = vpop.f32.mrb[3].mxu1 }
  0xfb   :  { %v1305_v26 = vadd.f32 %v1854_v22, %v1683_v15  ;;  %v1343_v28 = vadd.f32 %v1873_v24, %v1302_v21  ;;  %v1876_v29 = vadd.f32 %v1875_v27, %v1874_v25 }
  0xfd   :  { %v1346_v30 = vadd.f32 %v1876_v29, %v1305_v26 }
 0x115   :  { %v1893_v31 = vpop.f32.mrb[4].mxu0 }
 0x116   :  { %v1894_v32 = vpop.f32.mrb[5].mxu0 }
 0x117   :  { %v1895_v33 = vadd.f32 %v1894_v32, %v1893_v31  ;;  %v1896_v34 = vpop.f32.mrb[6].mxu0  ;;  %v1915_v37 = vpop.f32.mrb[4].mxu1 }
 0x118   :  { %v1897_v35 = vpop.f32.mrb[7].mxu0  ;;  %v1916_v39 = vpop.f32.mrb[5].mxu1 }
 0x119   :  { %v1384_v36 = vadd.f32 %v1895_v33, %v1343_v28  ;;  %v1898_v38 = vadd.f32 %v1897_v35, %v1896_v34  ;;  %v1917_v41 = vadd.f32 %v1916_v39, %v1915_v37  ;;  %v1918_v42 = vpop.f32.mrb[6].mxu1 }
 0x11a   :  { %v1919_v43 = vpop.f32.mrb[7].mxu1 }
 0x11b   :  { %v1387_v40 = vadd.f32 %v1898_v38, %v1346_v30  ;;  %v1425_v44 = vadd.f32 %v1917_v41, %v1384_v36  ;;  %v1920_v45 = vadd.f32 %v1919_v43, %v1918_v42 }
 0x11d   :  { %v1428_v46 = vadd.f32 %v1920_v45, %v1387_v40 }
 0x135   :  { %v1937_v47 = vpop.f32.mrb[8].mxu0 }
 0x136   :  { %v1938_v48 = vpop.f32.mrb[9].mxu0 }
 0x137   :  { %v1939_v49 = vadd.f32 %v1938_v48, %v1937_v47  ;;  %v1940_v50 = vpop.f32.mrb[10].mxu0  ;;  %v1959_v51 = vpop.f32.mrb[8].mxu1 }
 0x138   :  { %v1941_v52 = vpop.f32.mrb[11].mxu0  ;;  %v1960_v55 = vpop.f32.mrb[9].mxu1 }
 0x139   :  { %v1466_v53 = vadd.f32 %v1939_v49, %v1425_v44  ;;  %v1942_v54 = vadd.f32 %v1941_v52, %v1940_v50  ;;  %v1961_v56 = vadd.f32 %v1960_v55, %v1959_v51  ;;  %v1962_v57 = vpop.f32.mrb[10].mxu1 }
 0x13a   :  { %v1963_v59 = vpop.f32.mrb[11].mxu1 }
 0x13b   :  { %v1469_v58 = vadd.f32 %v1942_v54, %v1428_v46  ;;  %v1507_v60 = vadd.f32 %v1961_v56, %v1466_v53  ;;  %v1964_v61 = vadd.f32 %v1963_v59, %v1962_v57 }
 0x13d   :  { %v1510_v62 = vadd.f32 %v1964_v61, %v1469_v58 }
 0x155   :  { %v1981_v63 = vpop.f32.mrb[12].mxu0 }
 0x156   :  { %v1982_v0 = vpop.f32.mrb[13].mxu0 }
 0x157   :  { %v1983_v1 = vadd.f32 %v1982_v0, %v1981_v63  ;;  %v1984_v2 = vpop.f32.mrb[14].mxu0  ;;  %v2003_v3 = vpop.f32.mrb[12].mxu1 }
 0x158   :  { %v1985_v4 = vpop.f32.mrb[15].mxu0  ;;  %v2004_v7 = vpop.f32.mrb[13].mxu1 }
 0x159   :  { %v1548_v5 = vadd.f32 %v1983_v1, %v1507_v60  ;;  %v1986_v6 = vadd.f32 %v1985_v4, %v1984_v2  ;;  %v2005_v8 = vadd.f32 %v2004_v7, %v2003_v3  ;;  %v2006_v9 = vpop.f32.mrb[14].mxu1 }
 0x15a   :  { %v2007_v11 = vpop.f32.mrb[15].mxu1 }
 0x15b   :  { %v1551_v10 = vadd.f32 %v1986_v6, %v1510_v62  ;;  %v1589_v12 = vadd.f32 %v2005_v8, %v1548_v5  ;;  %v2008_v13 = vadd.f32 %v2007_v11, %v2006_v9 }
 0x15d   :  { %v1592_v14 = vadd.f32 %v2008_v13, %v1551_v10 }
 0x167   :  { %v1670_v15 = vpop.f32.mrb[16].mxu1 }
 0x168   :  { %v2046_v16 = vpop.f32.mrb[17].mxu1 }
 0x169   :  { %v1673_v17 = vpop.f32.mrb[18].mxu1 }
 0x16a   :  { %v2047_v18 = vpop.f32.mrb[19].mxu1 }
 0x175   :  { %v2025_v19 = vpop.f32.mrb[16].mxu0 }
 0x176   :  { %v2026_v20 = vpop.f32.mrb[17].mxu0 }
 0x177   :  { %v2027_v21 = vadd.f32 %v2026_v20, %v2025_v19  ;;  %v2028_v22 = vpop.f32.mrb[18].mxu0 }
 0x178   :  { %v2029_v23 = vpop.f32.mrb[19].mxu0 }
 0x179   :  { %v1630_v24 = vadd.f32 %v2027_v21, %v1589_v12  ;;  %v2030_v25 = vadd.f32 %v2029_v23, %v2028_v22 }
 0x17b   :  { %v1671_v26 = vadd.f32 %v1670_v15, %v1630_v24  ;;  %v1633_v27 = vadd.f32 %v2030_v25, %v1592_v14 }
 0x17d   :  { %1677 = vst.msk [vmem:[%s2793_s3] sm:$0xff] %vm1263_vm1, %v1671_v26  ;;  %v1674_v28 = vadd.f32 %v1673_v17, %v1633_v27 }
 0x17f   :  { %1678 = vst.msk [vmem:[%s2793_s3 + $0x8] sm:$0xff] %vm1263_vm1, %v1674_v28 }

// kernel: form_model_forward_training.14
= control target key start
LH: loop header
LB: loop body
LE: loop exit
PB: predicated region body
PF: predicated region fallthrough
CT: control target
= control target key end

     0   :  { %v440_v0 = vmov 0.0   ;;  %vm441_vm0 = vmmov 0   ;;  %vm75_vm1 = vcmask 523264   ;;  %vm258_vm2 = vcmask 519168   ;;  %s577_s1 = inlined_call_operand.vmem [shape: bf16[64,128], index: 1, kind: input, shape index: {}]   ;;  %s578_s0 = inlined_call_operand.vmem [shape: f32[12,64], index: 0, kind: input, shape index: {}]   ;;  %s579_s3 = inlined_call_operand.vmem [shape: bf16[128,64], index: 3, kind: input, shape index: {}]   ;;  %s580_s2 = inlined_call_operand.vmem [shape: f32[1,128], index: 2, kind: input, shape index: {}]   ;;  %s581_s4 = inlined_call_operand.vmem [shape: f32[1,64], index: 4, kind: input, shape index: {}]   ;;  %s582_s5 = inlined_call_operand.vmem [shape: f32[1,64], index: 5, kind: input, shape index: {}]   ;;  %s583_s6 = inlined_call_operand.vmem [shape: f32[1,64], index: 6, kind: input, shape index: {}]   ;;  %s584_s7 = inlined_call_operand.vmem [shape: f32[1,64], index: 7, kind: input, shape index: {}]   ;;  %s585_s8 = inlined_call_operand.vmem [shape: f32[1,64], index: 8, kind: input, shape index: {}]   ;;  %s586_s9 = inlined_call_operand.vmem [shape: f32[12,64], index: 9, kind: output, shape index: {}]  }
   0x1   :  { %382 = vmatprep.subr.bf16.mxu0 %v440_v0  ;;  %v416_v1 = vld [vmem:[%s577_s1] sm:$0xff]   ;;  %390 = vmatprep.mubr.msk.bf16.mxu0 %vm441_vm0, %v440_v0  ;;  %v417_v2 = vld [vmem:[%s577_s1 + $0x8] sm:$0xff]   ;;  %v418_v3 = vld [vmem:[%s577_s1 + $0x10] sm:$0xff]  }
   0x2   :  { %394 = vmatprep.subr.bf16.mxu1 %v440_v0  ;;  %410 = vmatprep.mubr.msk.bf16.mxu1 %vm441_vm0, %v440_v0  ;;  %v419_v4 = vld [vmem:[%s577_s1 + $0x18] sm:$0xff]   ;;  %v507_v5 = vld [vmem:[%s578_s0] sm:$0xff]  ;;  %v512_v6 = vld [vmem:[%s578_s0 + $0x8] sm:$0xf] }
   0x3   :  { %383 = vmatpush3.bf16.msra.mxu0 %v416_v1  ;;  %v35_v7 = vpack.c.bf16 %v512_v6, %v507_v5  ;;  %v420_v8 = vld [vmem:[%s579_s3] sm:$0xff]   ;;  %v421_v9 = vld [vmem:[%s579_s3 + $0x8] sm:$0xff]   ;;  %v422_v10 = vld [vmem:[%s579_s3 + $0x10] sm:$0xff]  }
   0x4   :  { %384 = vmatprep.subr.bf16.mxu0 %v440_v0  ;;  %395 = vmatpush3.bf16.msra.mxu1 %v420_v8  ;;  %v423_v11 = vld [vmem:[%s579_s3 + $0x18] sm:$0xff]   ;;  %v424_v12 = vld [vmem:[%s579_s3 + $0x20] sm:$0xff]   ;;  %v425_v13 = vld [vmem:[%s579_s3 + $0x28] sm:$0xff]  }
   0x5   :  { %396 = vmatprep.subr.bf16.mxu1 %v440_v0  ;;  %v426_v14 = vld [vmem:[%s579_s3 + $0x30] sm:$0xff]   ;;  %v427_v15 = vld [vmem:[%s579_s3 + $0x38] sm:$0xff]   ;;  %v349_v16 = vld [vmem:[%s580_s2] ss:$0 sm:$0xff] }
   0x6   :  { %v355_v42 = vld [vmem:[%s581_s4] ss:$0 sm:$0xff] }
   0x7   :  { %385 = vmatpush3.bf16.msra.mxu0 %v417_v2  ;;  %v365_v8 = vld [vmem:[%s583_s6] ss:$0 sm:$0xff] }
   0x8   :  { %386 = vmatprep.subr.bf16.mxu0 %v440_v0  ;;  %397 = vmatpush3.bf16.msra.mxu1 %v421_v9 }
   0x9   :  { %398 = vmatprep.subr.bf16.mxu1 %v440_v0 }
   0xb   :  { %387 = vmatpush3.bf16.msra.mxu0 %v418_v3 }
   0xc   :  { %388 = vmatprep.subr.bf16.mxu0 %v440_v0  ;;  %399 = vmatpush3.bf16.msra.mxu1 %v422_v10 }
   0xd   :  { %400 = vmatprep.subr.bf16.mxu1 %v440_v0 }
   0xf   :  { %389 = vmatpush3.bf16.msra.mxu0 %v419_v4 }
  0x10   :  { %401 = vmatpush3.bf16.msra.mxu1 %v423_v11 }
  0x11   :  { %402 = vmatprep.subr.bf16.mxu1 %v440_v0 }
  0x12   :  { %391 = vmatmul.mubr.msk.bf16.vlgmr.msra.gmra.mrb[0].mxu0 %vm75_vm1, %v35_v7 }
  0x14   :  { %403 = vmatpush3.bf16.msra.mxu1 %v424_v12 }
  0x15   :  { %404 = vmatprep.subr.bf16.mxu1 %v440_v0 }
  0x18   :  { %405 = vmatpush3.bf16.msra.mxu1 %v425_v13 }
  0x19   :  { %406 = vmatprep.subr.bf16.mxu1 %v440_v0 }
  0x1c   :  { %407 = vmatpush3.bf16.msra.mxu1 %v426_v14 }
  0x1d   :  { %408 = vmatprep.subr.bf16.mxu1 %v440_v0 }
  0x20   :  { %409 = vmatpush3.bf16.msra.mxu1 %v427_v15 }
  0xe5   :  { %v113_v17 = vpop.f32.mrb[0].mxu0 }
  0xe6   :  { %v114_v18 = vadd.f32 %v349_v16, %v113_v17  ;;  %v392_v19 = vpop.f32.mrb[1].mxu0 }
  0xe7   :  { %v116_v20 = vpop.f32.mrb[2].mxu0 }
  0xe8   :  { %v122_v21 = vmul.f32 0.044715, %v114_v18  ;;  %v117_v22 = vadd.f32 %v349_v16, %v116_v20  ;;  %v393_v23 = vpop.f32.mrb[3].mxu0  ;;  %v120_v36 = vmul.f32 0.5, %v114_v18 }
  0xea   :  { %v124_v24 = vmul.f32 %v122_v21, %v114_v18  ;;  %v123_v25 = vmul.f32 0.044715, %v117_v22  ;;  %v121_v37 = vmul.f32 0.5, %v117_v22 }
  0xec   :  { %v126_v26 = vmul.f32 %v124_v24, %v114_v18  ;;  %v125_v27 = vmul.f32 %v123_v25, %v117_v22 }
  0xee   :  { %v127_v28 = vmul.f32 %v125_v27, %v117_v22  ;;  %v128_v29 = vadd.f32 %v126_v26, %v114_v18 }
  0xf0   :  { %v129_v30 = vadd.f32 %v127_v28, %v117_v22  ;;  %v130_v31 = vmul.f32 0.7978846, %v128_v29 }
  0xf2   :  { %v131_v32 = vmul.f32 0.7978846, %v129_v30  ;;  %428 = vtanh.f32 %v130_v31 }
  0xf4   :  { %430 = vtanh.f32 %v131_v32 }
  0xfc   :  { %v429_v33 = vpop.eup %428 }
  0xfd   :  { %v134_v34 = vadd.f32 1.0, %v429_v33 }
  0xfe   :  { %v431_v35 = vpop.eup %430 }
  0xff   :  { %v135_v38 = vadd.f32 1.0, %v431_v35  ;;  %v136_v39 = vmul.f32 %v134_v34, %v120_v36  ;;  %v366_v34 = vld [vmem:[%s584_s7] ss:$0 sm:$0xff] }
 0x100   :  { %v367_v36 = vld [vmem:[%s585_s8] ss:$0 sm:$0xff] }
 0x101   :  { %v137_v40 = vmul.f32 %v135_v38, %v121_v37 }
 0x103   :  { %v138_v41 = vpack.c.bf16 %v137_v40, %v136_v39 }
 0x105   :  { %411 = vmatmul.mubr.bf16.vlgmr.msra.gmra.mrb[0].mxu1 %v138_v41 }
 0x1d8   :  { %v244_v43 = vpop.f32.mrb[0].mxu1 }
 0x1d9   :  { %v245_v44 = vadd.f32 %v355_v42, %v244_v43  ;;  %v412_v45 = vpop.f32.mrb[1].mxu1 }
 0x1da   :  { %v247_v46 = vpop.f32.mrb[2].mxu1 }
 0x1db   :  { %v248_v47 = vadd.f32 %v355_v42, %v247_v46  ;;  %v413_v48 = vpop.f32.mrb[3].mxu1  ;;  %v251_v49 = vadd.f32 %v245_v44, %v507_v5 }
 0x1dd   :  { %v255_v50 = vsel %vm75_vm1, %v251_v49, 0.0  ;;  %v252_v51 = vadd.f32 %v248_v47, %v512_v6  ;;  %v364_v6 = vld [vmem:[%s582_s5] ss:$0 sm:$0xff] }
 0x1de   :  { %256 = vadd.xlane.f32.xlu0 %v255_v50 }
 0x1df   :  { %v259_v52 = vsel %vm258_vm2, %v252_v51, 0.0 }
 0x1e2   :  { %260 = vadd.xlane.f32.xlu0 %v259_v52 }
 0x26b   :  { %v257_v53 = vpop.xlane.xlu0 %256 }
 0x26c   :  { %v263_v54 = vmul.f32 0.015625, %v257_v53 }
 0x26e   :  { %v265_v55 = vsub.f32 %v251_v49, %v263_v54 }
 0x26f   :  { %v261_v56 = vpop.xlane.xlu0 %260 }
 0x270   :  { %v264_v57 = vmul.f32 0.015625, %v261_v56  ;;  %v267_v58 = vmul.f32 %v265_v55, %v265_v55 }
 0x272   :  { %v266_v59 = vsub.f32 %v252_v51, %v264_v57  ;;  %v269_v60 = vsel %vm75_vm1, %v267_v58, 0.0 }
 0x273   :  { %270 = vadd.xlane.f32.xlu1 %v269_v60 }
 0x274   :  { %v268_v61 = vmul.f32 %v266_v59, %v266_v59 }
 0x276   :  { %v272_v62 = vsel %vm258_vm2, %v268_v61, 0.0 }
 0x277   :  { %273 = vadd.xlane.f32.xlu1 %v272_v62 }
 0x300   :  { %v271_v63 = vpop.xlane.xlu1 %270 }
 0x301   :  { %v275_v0 = vmul.f32 0.015625, %v271_v63 }
 0x303   :  { %v277_v1 = vadd.f32 1e-05, %v275_v0 }
 0x304   :  { %v274_v2 = vpop.xlane.xlu1 %273 }
 0x305   :  { %432 = vrsqrt.f32 %v277_v1  ;;  %v276_v3 = vmul.f32 0.015625, %v274_v2 }
 0x307   :  { %v278_v4 = vadd.f32 1e-05, %v276_v3 }
 0x309   :  { %434 = vrsqrt.f32 %v278_v4 }
 0x30f   :  { %v433_v5 = vpop.eup %432 }
 0x310   :  { %v281_v7 = vmul.f32 %v433_v5, %v265_v55 }
 0x312   :  { %v289_v9 = vmul.f32 %v364_v6, %v281_v7 }
 0x313   :  { %v435_v10 = vpop.eup %434 }
 0x314   :  { %v297_v11 = vadd.f32 %v365_v8, %v289_v9  ;;  %v282_v12 = vmul.f32 %v435_v10, %v266_v59 }
 0x316   :  { %v301_v13 = vsel %vm75_vm1, %v297_v11, 0.0  ;;  %v290_v14 = vmul.f32 %v364_v6, %v282_v12 }
 0x317   :  { %302 = vadd.xlane.f32.xlu0 %v301_v13 }
 0x318   :  { %v298_v15 = vadd.f32 %v365_v8, %v290_v14 }
 0x31a   :  { %v304_v16 = vsel %vm258_vm2, %v298_v15, 0.0 }
 0x31b   :  { %305 = vadd.xlane.f32.xlu1 %v304_v16 }
 0x3a4   :  { %v303_v17 = vpop.xlane.xlu0 %302 }
 0x3a5   :  { %v307_v18 = vmul.f32 0.015625, %v303_v17 }
 0x3a7   :  { %v309_v19 = vsub.f32 %v297_v11, %v307_v18 }
 0x3a8   :  { %v306_v20 = vpop.xlane.xlu1 %305 }
 0x3a9   :  { %v308_v21 = vmul.f32 0.015625, %v306_v20  ;;  %v311_v22 = vmul.f32 %v309_v19, %v309_v19 }
 0x3ab   :  { %v310_v23 = vsub.f32 %v298_v15, %v308_v21  ;;  %v313_v24 = vsel %vm75_vm1, %v311_v22, 0.0 }
 0x3ac   :  { %314 = vadd.xlane.f32.xlu0 %v313_v24 }
 0x3ad   :  { %v312_v25 = vmul.f32 %v310_v23, %v310_v23 }
 0x3af   :  { %v316_v26 = vsel %vm258_vm2, %v312_v25, 0.0 }
 0x3b0   :  { %317 = vadd.xlane.f32.xlu1 %v316_v26 }
 0x439   :  { %v315_v27 = vpop.xlane.xlu0 %314 }
 0x43a   :  { %v319_v28 = vmul.f32 0.015625, %v315_v27 }
 0x43c   :  { %v321_v29 = vadd.f32 1e-05, %v319_v28 }
 0x43d   :  { %v318_v30 = vpop.xlane.xlu1 %317 }
 0x43e   :  { %436 = vrsqrt.f32 %v321_v29  ;;  %v320_v31 = vmul.f32 0.015625, %v318_v30 }
 0x440   :  { %v322_v32 = vadd.f32 1e-05, %v320_v31 }
 0x442   :  { %438 = vrsqrt.f32 %v322_v32 }
 0x448   :  { %v437_v33 = vpop.eup %436 }
 0x449   :  { %v325_v35 = vmul.f32 %v437_v33, %v309_v19 }
 0x44b   :  { %v333_v37 = vmul.f32 %v366_v34, %v325_v35 }
 0x44c   :  { %v439_v38 = vpop.eup %438 }
 0x44d   :  { %v341_v39 = vadd.f32 %v367_v36, %v333_v37  ;;  %v326_v40 = vmul.f32 %v439_v38, %v310_v23 }
 0x44f   :  { %343 = vst.msk [vmem:[%s586_s9] sm:$0xff] %vm75_vm1, %v341_v39  ;;  %v334_v41 = vmul.f32 %v366_v34, %v326_v40 }
 0x451   :  { %v342_v42 = vadd.f32 %v367_v36, %v334_v41 }
 0x453   :  { %344 = vst.msk [vmem:[%s586_s9 + $0x8] sm:$0xf] %vm258_vm2, %v342_v42 }

// kernel: form_model_forward_training.13
= control target key start
LH: loop header
LB: loop body
LE: loop exit
PB: predicated region body
PF: predicated region fallthrough
CT: control target
= control target key end

     0   :  { %s1459_s0 = inlined_call_operand.vmem [shape: s32[4], index: 0, kind: input, shape index: {}]   ;;  %s1460_s1 = inlined_call_operand.vmem [shape: f32[4,3,64], index: 1, kind: input, shape index: {}]   ;;  %s1461_s2 = inlined_call_operand.vmem [shape: bf16[64,192], index: 2, kind: input, shape index: {}]   ;;  %s1462_s3 = inlined_call_operand.vmem [shape: f32[1,192], index: 3, kind: input, shape index: {}]   ;;  %s1463_s4 = inlined_call_operand.vmem [shape: bf16[64,64], index: 4, kind: input, shape index: {}]   ;;  %s1464_s5 = inlined_call_operand.vmem [shape: f32[1,64], index: 5, kind: input, shape index: {}]   ;;  %s1465_s6 = inlined_call_operand.vmem [shape: f32[1,64], index: 6, kind: input, shape index: {}]   ;;  %s1466_s7 = inlined_call_operand.vmem [shape: f32[1,64], index: 7, kind: input, shape index: {}]   ;;  %s1467_s8 = inlined_call_operand.vmem [shape: f32[4,3,64], index: 8, kind: output, shape index: {}]  }
   0x1   :  { %s13_s29 = sshll.u32 %s1459_s0, 4  ;;  %s14_s29 = int_to_ptr.vmem [resolvable:$true] %s13_s29 }
   0x2   :  { %s1205_s30 = scalar_lea.vmem %s14_s29, 16  ;;  %p1210_p1 = scmp.lt.s32.totalorder %s14_s29, %s14_s29 }
   0x3   :  { %p1206_p0 = scmp.ne.s32.totalorder %s14_s29, %s1205_s30  ;;  %p1211_p2 = scmp.lt.s32.totalorder %s1205_s30, %s1205_s30 }
   0x5   :  { %p1212_p3 = por %p1211_p2, %p1210_p1 }
   0x7   :  { %p1213_p4 = pnand %p1212_p3, %p1206_p0 }
   0x9   :  { %1216 = shalt.err (!%p1213_p4)  }
   0xa   :  { %s1227_s9 = smov [#allocation3]  }
   0xb   :  { %16 = dma.vmem_to_smem %s14_s29, 16, %s1227_s9, [#allocation2] }
   0xc   :  { %1221 = dma.done.wait [#allocation2], 16 }
   0xd   :  { %1222 = vsyncadd [#allocation2], 4294967280 }
   0xe   :  { %18 = sfence }
   0xf   :  { %s1288_s10 = smov 0  }
  0x10 LB: > { %s1294_s0 = sadd.s32 4294967295, %s1225_s10   ;;  %p1039_p5 = scmp.ge.s32.totalorder %s1225_s10, 1  ;;  %s1225_s10 = sphi %s1288_s10, %s24_s10  }
  0x11   : > { %p243_p6 = scmp.lt.s32.totalorder %s1225_s10, 5 }
  0x13   : > { %p244_p7 = pnand %p1039_p5, %p243_p6 }
  0x14   : > { %v1171_v0 = vld [vmem:[%s1461_s2 + $0x4] ss:$8 sps:$4 sm:$0xff] (!%p244_p7)   ;;  %p273_p8 = scmp.lt.s32.totalorder (!%p244_p7), %s1294_s0, 3  ;;  %v1173_v1 = vld [vmem:[%s1461_s2] ss:$8 sps:$4 sm:$0xff] (!%p244_p7)   ;;  %v1228_v2 = vmov (!%p244_p7), 0   ;;  %v294_v11 = vlaneseq (!%p244_p7) }
  0x15   : > { %247 = sbr.rel (%p244_p7) target bundleno = 2328 (0x918), region = 48  ;;  %380 = vmatprep.mubr.bf16.mxu0 (!%p244_p7), %v1228_v2  ;;  %348 = vmatprep.subr.bf16.mxu0 (!%p244_p7), %v1171_v0  ;;  %v1174_v3 = vld [vmem:[%s1461_s2 + $0x14] ss:$8 sps:$4 sm:$0xff] (!%p244_p7)   ;;  %v1176_v4 = vld [vmem:[%s1461_s2 + $0x10] ss:$8 sps:$4 sm:$0xff] (!%p244_p7)   ;;  %vm344_vm0 = vcmask (!%p244_p7), 523264  }
  0x16   : > { %349 = vmatpush1.bf16.msra.mxu0 (!%p244_p7), %v1173_v1  ;;  %v1177_v5 = vld [vmem:[%s1461_s2 + $0x24] ss:$8 sps:$4 sm:$0xff] (!%p244_p7)   ;;  %v1179_v6 = vld [vmem:[%s1461_s2 + $0x20] ss:$8 sps:$4 sm:$0xff] (!%p244_p7)   ;;  %v1180_v7 = vld [vmem:[%s1461_s2 + $0x34] ss:$8 sps:$4 sm:$0xff] (!%p244_p7)  }
  0x17   : > { %350 = vmatprep.subr.bf16.mxu0 (!%p244_p7), %v1174_v3  ;;  %v1182_v8 = vld [vmem:[%s1461_s2 + $0x30] ss:$8 sps:$4 sm:$0xff] (!%p244_p7)   ;;  %v295_v12 = vshrl.u32 (!%p244_p7), %v294_v11, 7  ;;  %v1229_v13 = vmov (!%p244_p7), 0.0   ;;  %v292_v15 = vld [vmem:[%s1462_s3] sm:$0x3] (!%p244_p7) }
  0x18   : > { %1090 = vmatprep.subr.bf16.mxu1 (!%p244_p7), %v1229_v13  ;;  %vm1230_vm1 = vmmov (!%p244_p7), 0   ;;  %s1231_s13 = smov (!%p244_p7), 48   ;;  %s1232_s14 = smov (!%p244_p7), 64   ;;  %vm405_vm2 = vcmask (!%p244_p7), 130048   ;;  %vm470_vm3 = vcmask (!%p244_p7), 1040384   ;;  %vm471_vm4 = vcmask (!%p244_p7), 1041408  }
  0x19   : > { %v296_v14 = vsub.s32 (!%p244_p7), 0, %v295_v12  ;;  %1092 = vmatprep.mubr.msk.bf16.mxu1 (!%p244_p7), %vm1230_vm1, %v1229_v13  ;;  %v300_v23 = vsub.s32 (!%p244_p7), 1, %v295_v12  ;;  %v1233_v28 = vmov (!%p244_p7), 65535   ;;  %s389_s15 = sld [smem:[#allocation3 + %s1294_s0]] (!%p244_p7)  ;;  %v393_v35 = vand.u32 (!%p244_p7), 127, %v294_v11  ;;  %s1235_s16 = smov (!%p244_p7), 80  }
  0x1a   : > { %351 = vmatpush1.bf16.msra.mxu0 (!%p244_p7), %v1176_v4  ;;  %v472_v29 = vsel (!%p244_p7), %vm470_vm3, 4294967295, %v1233_v28  ;;  %v1234_v37 = vmov (!%p244_p7), -1e+30   ;;  %vm452_vm8 = vcmask (!%p244_p7), 18432   ;;  %s1237_s18 = smov (!%p244_p7), 32   ;;  %s1238_s19 = smov (!%p244_p7), 96  }
  0x1b   : > { %352 = vmatprep.subr.bf16.mxu0 (!%p244_p7), %v1177_v5  ;;  %v297_v16 = vrot.slane (!%p244_p7), %v292_v15, %v296_v14  ;;  %v301_v24 = vrot.slane (!%p244_p7), %v292_v15, %v300_v23  ;;  %v1351_v32 = vsel (!%p244_p7), %vm471_vm4, %v472_v29, 0  ;;  %vm394_vm5 = vcmp.le.s32.totalorder (!%p244_p7), %v393_v35, %v295_v12  ;;  %s1239_s20 = smov (!%p244_p7), 16  }
  0x1c   : > { %s1309_s17 = scalar_select %p273_p8, %s1294_s0, 3  ;;  %vm466_vm9 = vcmask 23552   ;;  %vm862_vm10 = vcmask 261120   ;;  %vm864_vm11 = vcmask 392192   ;;  %vm952_vm12 = vcmask 518144  }
  0x1d   : > { %s1236_s0 = smov 112  }
  0x1e   : > { %s1040_s24 = sshll.u32 %s1309_s17, 2  ;;  %353 = vmatpush1.bf16.msra.mxu0 %v1179_v6 }
  0x1f   : > { %s276_s29 = scalar_lea.vmem %s1460_s1, %s1040_s24  ;;  %354 = vmatprep.subr.bf16.mxu0 %v1180_v7  ;;  %v395_v36 = vstv %s389_s15 }
  0x20   : > { %v1332_v9 = vld [vmem:[%s276_s29] sm:$0x7]  ;;  %vm396_vm6 = vcmp.lt.s32.totalorder %v393_v35, %v395_v36 }
  0x21   : > { %v283_v10 = vpack.c.bf16 %v1332_v9, %v1332_v9  ;;  %vm397_vm7 = vmand %vm394_vm5, %vm396_vm6 }
  0x22   : > { %355 = vmatpush1.bf16.msra.mxu0 %v1182_v8  ;;  %v1360_v38 = vsel %vm397_vm7, 0.0, %v1234_v37 }
  0x23   : > { %1114 = vmatprep.subr.bf16.mxu0 %v1229_v13 }
  0x25   : > { %1050 = vmatmul.mubr.msk.bf16.vlgmr.msra.gmra.mrb[0].mxu0 %vm344_vm0, %v283_v10 }
  0x26   : > { %1116 = vmatprep.mubr.msk.bf16.mxu0 %vm1230_vm1, %v1229_v13 }
  0xf8   : > { %v382_v17 = vpop.f32.mrb[0].mxu0 }
  0xf9   : > { %v383_v18 = vadd.f32 %v382_v17, %v297_v16  ;;  %v384_v19 = vpop.f32.mrb[1].mxu0 }
  0xfa   : > { %v386_v20 = vpop.f32.mrb[2].mxu0  ;;  %v385_v25 = vadd.f32 %v384_v19, %v301_v24 }
  0xfb   : > { %v401_v21 = vpack.c.bf16 %v383_v18, %v383_v18  ;;  %v387_v22 = vpop.f32.mrb[3].mxu0  ;;  %v399_v30 = vmul.f32 0.25, %v383_v18 }
  0xfc   : > { %v1349_v31 = vpack.c.bf16 %v385_v25, %v385_v25 }
  0xfd   : > { %520 = vrot.lane.b32.xlu1 %v401_v21, %s1231_s13  ;;  %403 = vrot.lane.b32.xlu0 %v401_v21, %s1232_s14  ;;  %v400_v33 = vpack.c.bf16 %v399_v30, %v399_v30 }
  0xfe   : > { %v475_v34 = vand.u32 %v1351_v32, %v1349_v31 }
 0x16f   : > { %v404_v26 = vpop.permute.xlu0 %403  ;;  %v521_v50 = vpop.permute.xlu1 %520 }
 0x170   : > { %v410_v27 = vsel %vm405_vm2, %v404_v26, 0  ;;  %v526_v59 = vsel %vm405_vm2, %v521_v50, 0 }
 0x171   : > { %1091 = vmatpush3.bf16.xpose.msra.mxu1 %v410_v27 }
 0x172   : > { %1096 = vmatprep.subr.bf16.mxu1 %v1229_v13 }
 0x178   : > { %1093 = vmatmul.mubr.msk.bf16.vlgmr.msra.gmra.mrb[0].mxu1 %vm405_vm2, %v400_v33 }
 0x179   : > { %1097 = vmatpush3.bf16.msra.mxu1 %v475_v34  ;;  %1098 = vmatprep.mubr.msk.bf16.mxu1 %vm1230_vm1, %v1229_v13 }
 0x17a   : > { %1102 = vmatprep.subr.bf16.mxu1 %v1229_v13 }
 0x24b   : > { %v446_v39 = vpop.f32.mrb[0].mxu1 }
 0x24c   : > { %v447_v40 = vadd.f32 %v446_v39, %v1360_v38  ;;  %v1094_v41 = vpop.f32.mrb[1].mxu1 }
 0x24d   : > { %v449_v42 = vpop.f32.mrb[2].mxu1 }
 0x24e   : > { %v1095_v43 = vpop.f32.mrb[3].mxu1  ;;  %v453_v44 = vsel %vm452_vm8, %v447_v40, -inf }
 0x24f   : > { %454 = vmax.xlane.f32.xlu0 %v453_v44 }
 0x265   : > { %739 = vrot.lane.b32.xlu0 %v400_v33, %s1235_s16 }
 0x2dc   : > { %v455_v45 = vpop.xlane.xlu0 %454 }
 0x2dd   : > { %v456_v46 = vsub.f32 %v447_v40, %v455_v45 }
 0x2df   : > { %v457_v47 = vmul.f32 1.442695, %v456_v46 }
 0x2e0   : > { %v740_v62 = vpop.permute.xlu0 %739 }
 0x2e1   : > { %1187 = vpow2.f32 %v457_v47 }
 0x2eb   : > { %v1188_v48 = vpop.eup %1187 }
 0x2ec   : > { %v459_v49 = vsel %vm452_vm8, %v1188_v48, 0.0 }
 0x2ed   : > { %460 = vadd.xlane.f32.xlu1 %v459_v49 }
 0x2fe   : > { %518 = vrot.lane.b32.xlu1 %v400_v33, %s1236_s0 }
 0x302   : > { %631 = vrot.lane.b32.xlu1 %v401_v21, %s1237_s18 }
 0x306   : > { %629 = vrot.lane.b32.xlu1 %v400_v33, %s1238_s19 }
 0x30a   : > { %741 = vrot.lane.b32.xlu1 %v401_v21, %s1239_s20 }
 0x37a   : > { %v461_v51 = vpop.xlane.xlu1 %460 }
 0x37b   : > { %1189 = vrcp.f32 %v461_v51 }
 0x37e   : > { %v519_v52 = vpop.permute.xlu1 %518 }
 0x382   : > { %v632_v53 = vpop.permute.xlu1 %631 }
 0x383   : > { %v637_v54 = vsel %vm405_vm2, %v632_v53, 0 }
 0x384   : > { %1115 = vmatpush3.bf16.xpose.msra.mxu0 %v637_v54 }
 0x385   : > { %v1190_v55 = vpop.eup %1189  ;;  %1126 = vmatprep.subr.bf16.mxu0 %v1229_v13 }
 0x386   : > { %v463_v56 = vmul.f32 %v1190_v55, %v1188_v48  ;;  %v630_v57 = vpop.permute.xlu1 %629 }
 0x388   : > { %v464_v58 = vpack.c.bf16 %v463_v56, %v463_v56 }
 0x38a   : > { %1099 = vmatmul.mubr.msk.bf16.vlgmr.msra.gmra.mrb[4].mxu1 %vm466_vm9, %v464_v58  ;;  %v742_v60 = vpop.permute.xlu1 %741  ;;  %v1185_v58 = vld [vmem:[%s1463_s4 + $0x10] sm:$0xff]  }
 0x38b   : > { %1103 = vmatpush3.bf16.xpose.msra.mxu1 %v526_v59  ;;  %v747_v61 = vsel %vm405_vm2, %v742_v60, 0  ;;  %1117 = vmatmul.mubr.msk.bf16.vlgmr.msra.gmra.mrb[4].mxu0 %vm405_vm2, %v630_v57  ;;  %v1183_v57 = vld [vmem:[%s1463_s4] sm:$0xff]  }
 0x38c   : > { %1127 = vmatpush3.bf16.xpose.msra.mxu0 %v747_v61  ;;  %1104 = vmatprep.mubr.msk.bf16.mxu1 %vm1230_vm1, %v1229_v13 }
 0x38d   : > { %1128 = vmatprep.mubr.msk.bf16.mxu0 %vm1230_vm1, %v1229_v13  ;;  %1108 = vmatprep.subr.bf16.mxu1 %v1229_v13 }
 0x38e   : > { %1138 = vmatprep.subr.bf16.mxu0 %v1229_v13 }
 0x392   : > { %1105 = vmatmul.mubr.msk.bf16.vlgmr.msra.gmra.mrb[8].mxu1 %vm405_vm2, %v519_v52 }
 0x393   : > { %1129 = vmatmul.mubr.msk.bf16.vlgmr.msra.gmra.mrb[8].mxu0 %vm405_vm2, %v740_v62  ;;  %1110 = vmatprep.mubr.msk.bf16.mxu1 %vm1230_vm1, %v1229_v13 }
 0x394   : > { %1146 = vmatprep.mubr.msk.bf16.mxu0 %vm1230_vm1, %v1229_v13  ;;  %1139 = vmatpush3.bf16.msra.mxu0 %v1183_v57 }
 0x395   : > { %1140 = vmatprep.subr.bf16.mxu0 %v1229_v13 }
 0x45d   : > { %v1388_v63 = vpop.f32.mrb[4].mxu1 }
 0x45e   : > { %v1100_v0 = vpop.f32.mrb[5].mxu1  ;;  %v673_v1 = vpop.f32.mrb[4].mxu0 }
 0x45f   : > { %v674_v2 = vadd.f32 %v673_v1, %v1360_v38  ;;  %v514_v3 = vpop.f32.mrb[6].mxu1  ;;  %v1118_v4 = vpop.f32.mrb[5].mxu0  ;;  %v1186_v0 = vld [vmem:[%s1463_s4 + $0x18] sm:$0xff]  }
 0x460   : > { %v1101_v5 = vpop.f32.mrb[7].mxu1  ;;  %v676_v6 = vpop.f32.mrb[6].mxu0 }
 0x461   : > { %v1119_v7 = vpop.f32.mrb[7].mxu0  ;;  %v679_v8 = vsel %vm452_vm8, %v674_v2, -inf }
 0x462   : > { %680 = vmax.xlane.f32.xlu0 %v679_v8 }
 0x465   : > { %v562_v10 = vpop.f32.mrb[8].mxu1 }
 0x466   : > { %v563_v11 = vadd.f32 %v562_v10, %v1360_v38  ;;  %v1106_v12 = vpop.f32.mrb[9].mxu1  ;;  %v783_v14 = vpop.f32.mrb[8].mxu0 }
 0x467   : > { %v565_v15 = vpop.f32.mrb[10].mxu1  ;;  %v1130_v16 = vpop.f32.mrb[9].mxu0  ;;  %v784_v17 = vadd.f32 %v783_v14, %v1360_v38 }
 0x468   : > { %v1107_v18 = vpop.f32.mrb[11].mxu1  ;;  %v786_v19 = vpop.f32.mrb[10].mxu0  ;;  %v568_v20 = vsel %vm452_vm8, %v563_v11, -inf }
 0x469   : > { %v1131_v21 = vpop.f32.mrb[11].mxu0  ;;  %569 = vmax.xlane.f32.xlu1 %v568_v20  ;;  %v789_v22 = vsel %vm452_vm8, %v784_v17, -inf }
 0x46d   : > { %790 = vmax.xlane.f32.xlu1 %v789_v22 }
 0x478   : > { %581 = vrot.lane.b32.xlu0 %v1349_v31, %s1236_s0  ;;  %s280_s0 = scalar_lea.vmem %s1467_s8, %s1040_s24 }
 0x4ef   : > { %v681_v23 = vpop.xlane.xlu0 %680 }
 0x4f0   : > { %v682_v24 = vsub.f32 %v674_v2, %v681_v23 }
 0x4f2   : > { %v683_v25 = vmul.f32 1.442695, %v682_v24 }
 0x4f3   : > { %v582_v26 = vpop.permute.xlu0 %581 }
 0x4f4   : > { %1191 = vpow2.f32 %v683_v25  ;;  %v587_v27 = vand.u32 %v582_v26, %v1351_v32 }
 0x4f6   : > { %1109 = vmatpush3.bf16.msra.mxu1 %v587_v27  ;;  %v570_v28 = vpop.xlane.xlu1 %569 }
 0x4f7   : > { %1120 = vmatprep.subr.bf16.mxu1 %v1229_v13  ;;  %v571_v29 = vsub.f32 %v563_v11, %v570_v28 }
 0x4f9   : > { %v572_v34 = vmul.f32 1.442695, %v571_v29 }
 0x4fa   : > { %v791_v30 = vpop.xlane.xlu1 %790 }
 0x4fb   : > { %v792_v33 = vsub.f32 %v784_v17, %v791_v30  ;;  %v1059_v17 = vld [vmem:[%s1464_s5] ss:$0 sm:$0xff] }
 0x4fd   : > { %v793_v35 = vmul.f32 1.442695, %v792_v33 }
 0x4fe   : > { %v1192_v36 = vpop.eup %1191 }
 0x4ff   : > { %1193 = vpow2.f32 %v793_v35  ;;  %v685_v37 = vsel %vm452_vm8, %v1192_v36, 0.0 }
 0x500   : > { %686 = vadd.xlane.f32.xlu1 %v685_v37  ;;  %1195 = vpow2.f32 %v572_v34 }
 0x509   : > { %v1194_v38 = vpop.eup %1193 }
 0x50a   : > { %v795_v39 = vsel %vm452_vm8, %v1194_v38, 0.0  ;;  %v1196_v40 = vpop.eup %1195 }
 0x50b   : > { %796 = vadd.xlane.f32.xlu1 %v795_v39  ;;  %v574_v41 = vsel %vm452_vm8, %v1196_v40, 0.0 }
 0x50f   : > { %575 = vadd.xlane.f32.xlu1 %v574_v41 }
 0x520   : > { %691 = vrot.lane.b32.xlu1 %v1349_v31, %s1238_s19 }
 0x524   : > { %801 = vrot.lane.b32.xlu1 %v1349_v31, %s1235_s16 }
 0x58d   : > { %v687_v42 = vpop.xlane.xlu1 %686 }
 0x598   : > { %v797_v43 = vpop.xlane.xlu1 %796 }
 0x59c   : > { %v576_v44 = vpop.xlane.xlu1 %575 }
 0x59d   : > { %1197 = vrcp.f32 %v576_v44 }
 0x59e   : > { %1199 = vrcp.f32 %v687_v42 }
 0x59f   : > { %1201 = vrcp.f32 %v797_v43 }
 0x5a0   : > { %v692_v47 = vpop.permute.xlu1 %691 }
 0x5a1   : > { %v697_v50 = vand.u32 %v692_v47, %v1351_v32 }
 0x5a4   : > { %v802_v51 = vpop.permute.xlu1 %801 }
 0x5a5   : > { %v807_v54 = vand.u32 %v802_v51, %v1351_v32  ;;  %v1184_v32 = vld [vmem:[%s1463_s4 + $0x8] sm:$0xff]  }
 0x5a6   : > { %1141 = vmatpush3.bf16.msra.mxu0 %v1184_v32 }
 0x5a7   : > { %v1198_v45 = vpop.eup %1197  ;;  %1142 = vmatprep.subr.bf16.mxu0 %v1229_v13 }
 0x5a8   : > { %v578_v46 = vmul.f32 %v1198_v45, %v1196_v40  ;;  %v1200_v49 = vpop.eup %1199 }
 0x5a9   : > { %v689_v31 = vmul.f32 %v1200_v49, %v1192_v36  ;;  %v1202_v53 = vpop.eup %1201  ;;  %v1066_v36 = vld [vmem:[%s1466_s7] ss:$0 sm:$0xff] }
 0x5aa   : > { %v579_v48 = vpack.c.bf16 %v578_v46, %v578_v46  ;;  %v799_v55 = vmul.f32 %v1202_v53, %v1194_v38  ;;  %1143 = vmatpush3.bf16.msra.mxu0 %v1185_v58 }
 0x5ab   : > { %v690_v52 = vpack.c.bf16 %v689_v31, %v689_v31  ;;  %1144 = vmatprep.subr.bf16.mxu0 %v1229_v13 }
 0x5ac   : > { %1111 = vmatmul.mubr.msk.bf16.vlgmr.msra.gmra.mrb[12].mxu1 %vm466_vm9, %v579_v48  ;;  %v800_v56 = vpack.c.bf16 %v799_v55, %v799_v55 }
 0x5ad   : > { %1121 = vmatpush3.bf16.msra.mxu1 %v697_v50  ;;  %1122 = vmatprep.mubr.msk.bf16.mxu1 %vm1230_vm1, %v1229_v13 }
 0x5ae   : > { %1132 = vmatprep.subr.bf16.mxu1 %v1229_v13  ;;  %1145 = vmatpush3.bf16.msra.mxu0 %v1186_v0 }
 0x5b4   : > { %1123 = vmatmul.mubr.msk.bf16.vlgmr.msra.gmra.mrb[16].mxu1 %vm466_vm9, %v690_v52 }
 0x5b5   : > { %1133 = vmatpush3.bf16.msra.mxu1 %v807_v54  ;;  %1134 = vmatprep.mubr.msk.bf16.mxu1 %vm1230_vm1, %v1229_v13 }
 0x5bc   : > { %1135 = vmatmul.mubr.msk.bf16.vlgmr.msra.gmra.mrb[20].mxu1 %vm466_vm9, %v800_v56 }
 0x67f   : > { %v623_v59 = vpop.f32.mrb[12].mxu1 }
 0x680   : > { %850 = vrot.lane.b32.xlu0 %v623_v59, %s1239_s20  ;;  %v1112_v60 = vpop.f32.mrb[13].mxu1 }
 0x681   : > { %v626_v61 = vpop.f32.mrb[14].mxu1 }
 0x682   : > { %v1113_v62 = vpop.f32.mrb[15].mxu1 }
 0x687   : > { %v733_v1 = vpop.f32.mrb[16].mxu1 }
 0x688   : > { %854 = vrot.lane.b32.xlu1 %v733_v1, %s1237_s18  ;;  %v1124_v2 = vpop.f32.mrb[17].mxu1 }
 0x689   : > { %v736_v3 = vpop.f32.mrb[18].mxu1 }
 0x68a   : > { %v1125_v4 = vpop.f32.mrb[19].mxu1 }
 0x68f   : > { %v843_v5 = vpop.f32.mrb[20].mxu1 }
 0x690   : > { %858 = vrot.lane.b32.xlu0 %v843_v5, %s1231_s13  ;;  %v1136_v6 = vpop.f32.mrb[21].mxu1 }
 0x691   : > { %v846_v7 = vpop.f32.mrb[22].mxu1 }
 0x692   : > { %v1137_v8 = vpop.f32.mrb[23].mxu1 }
 0x6f2   : > { %v851_v10 = vpop.permute.xlu0 %850 }
 0x6f3   : > { %v861_v11 = vsel %vm405_vm2, %v1388_v63, %v851_v10 }
 0x6fa   : > { %v855_v13 = vpop.permute.xlu1 %854 }
 0x6fb   : > { %v863_v12 = vsel %vm862_vm10, %v861_v11, %v855_v13 }
 0x702   : > { %v859_v14 = vpop.permute.xlu0 %858 }
 0x703   : > { %v865_v15 = vsel %vm864_vm11, %v863_v12, %v859_v14 }
 0x704   : > { %v866_v16 = vpack.c.bf16 %v865_v15, %v865_v15 }
 0x706   : > { %1147 = vmatmul.mubr.msk.bf16.vlgmr.msra.gmra.mrb[12].mxu0 %vm344_vm0, %v866_v16 }
 0x7d9   : > { %v943_v18 = vpop.f32.mrb[12].mxu0 }
 0x7da   : > { %v944_v19 = vadd.f32 %v1059_v17, %v943_v18  ;;  %v1148_v20 = vpop.f32.mrb[13].mxu0 }
 0x7db   : > { %v946_v21 = vpop.f32.mrb[14].mxu0 }
 0x7dc   : > { %v1149_v22 = vpop.f32.mrb[15].mxu0  ;;  %v949_v23 = vadd.f32 %v944_v19, %v1332_v9  ;;  %v1065_v9 = vld [vmem:[%s1465_s6] ss:$0 sm:$0xff] }
 0x7de   : > { %v953_v63 = vsel %vm952_vm12, %v949_v23, 0.0 }
 0x7df   : > { %954 = vadd.xlane.f32.xlu1 %v953_v63 }
 0x86c   : > { %v955_v24 = vpop.xlane.xlu1 %954 }
 0x86d   : > { %v957_v25 = vmul.f32 0.015625, %v955_v24 }
 0x86f   : > { %v958_v26 = vsub.f32 %v949_v23, %v957_v25 }
 0x871   : > { %v959_v27 = vmul.f32 %v958_v26, %v958_v26 }
 0x873   : > { %v960_v28 = vsel %vm952_vm12, %v959_v27, 0.0 }
 0x874   : > { %961 = vadd.xlane.f32.xlu0 %v960_v28 }
 0x901   : > { %v962_v29 = vpop.xlane.xlu0 %961 }
 0x902   : > { %v963_v30 = vmul.f32 0.015625, %v962_v29 }
 0x904   : > { %v964_v33 = vadd.f32 1e-05, %v963_v30 }
 0x906   : > { %1203 = vrsqrt.f32 %v964_v33 }
 0x910   : > { %v1204_v34 = vpop.eup %1203 }
 0x911   : > { %v966_v35 = vmul.f32 %v1204_v34, %v958_v26 }
 0x913   : > { %v973_v37 = vmul.f32 %v1065_v9, %v966_v35 }
 0x915   : > { %v980_v38 = vadd.f32 %v1066_v36, %v973_v37 }
 0x917   : > { %981 = vst.msk [vmem:[%s280_s0] sm:$0x7] %vm952_vm12, %v980_v38 }
 0x918 PF: > { %s24_s10 = sadd.s32 1, %s1225_s10  }
 0x919   : > { %p21_p9 = scmp.ge.s32.totalorder %s24_s10, 6  }
 0x91b   :  { %23 = sbr.rel (!%p21_p9) target bundleno = 16 (0x10), region = 78 }

// kernel: form_model_forward_training.15
= control target key start
LH: loop header
LB: loop body
LE: loop exit
PB: predicated region body
PF: predicated region fallthrough
CT: control target
= control target key end

     0   :  { %s1452_s0 = inlined_call_operand.vmem [shape: s32[2], index: 0, kind: input, shape index: {}]   ;;  %s1453_s1 = inlined_call_operand.vmem [shape: f32[2,2,64], index: 1, kind: input, shape index: {}]   ;;  %s1454_s2 = inlined_call_operand.vmem [shape: bf16[64,192], index: 2, kind: input, shape index: {}]   ;;  %s1455_s3 = inlined_call_operand.vmem [shape: f32[1,192], index: 3, kind: input, shape index: {}]   ;;  %s1456_s4 = inlined_call_operand.vmem [shape: bf16[64,64], index: 4, kind: input, shape index: {}]   ;;  %s1457_s5 = inlined_call_operand.vmem [shape: f32[1,64], index: 5, kind: input, shape index: {}]   ;;  %s1458_s6 = inlined_call_operand.vmem [shape: f32[1,64], index: 6, kind: input, shape index: {}]   ;;  %s1459_s7 = inlined_call_operand.vmem [shape: f32[1,64], index: 7, kind: input, shape index: {}]   ;;  %s1460_s8 = inlined_call_operand.vmem [shape: f32[2,2,64], index: 8, kind: output, shape index: {}]  }
   0x1   :  { %s13_s29 = sshll.u32 %s1452_s0, 4  ;;  %s14_s29 = int_to_ptr.vmem [resolvable:$true] %s13_s29 }
   0x2   :  { %s1201_s30 = scalar_lea.vmem %s14_s29, 16  ;;  %p1206_p1 = scmp.lt.s32.totalorder %s14_s29, %s14_s29 }
   0x3   :  { %p1202_p0 = scmp.ne.s32.totalorder %s14_s29, %s1201_s30  ;;  %p1207_p2 = scmp.lt.s32.totalorder %s1201_s30, %s1201_s30 }
   0x5   :  { %p1208_p3 = por %p1207_p2, %p1206_p1 }
   0x7   :  { %p1209_p4 = pnand %p1208_p3, %p1202_p0 }
   0x9   :  { %1212 = shalt.err (!%p1209_p4)  }
   0xa   :  { %s1223_s9 = smov [#allocation3]  }
   0xb   :  { %16 = dma.vmem_to_smem %s14_s29, 16, %s1223_s9, [#allocation2] }
   0xc   :  { %1217 = dma.done.wait [#allocation2], 16 }
   0xd   :  { %1218 = vsyncadd [#allocation2], 4294967280 }
   0xe   :  { %18 = sfence }
   0xf   :  { %s1283_s10 = smov 0  }
  0x10 LB: > { %s1289_s0 = sadd.s32 4294967295, %s1221_s10   ;;  %p1036_p5 = scmp.ge.s32.totalorder %s1221_s10, 1  ;;  %s1221_s10 = sphi %s1283_s10, %s24_s10  }
  0x11   : > { %p243_p6 = scmp.lt.s32.totalorder %s1221_s10, 3 }
  0x13   : > { %p244_p7 = pnand %p1036_p5, %p243_p6 }
  0x14   : > { %v1167_v0 = vld [vmem:[%s1454_s2 + $0x4] ss:$8 sps:$4 sm:$0xff] (!%p244_p7)   ;;  %p273_p8 = scmp.lt.s32.totalorder (!%p244_p7), %s1289_s0, 1  ;;  %v1169_v1 = vld [vmem:[%s1454_s2] ss:$8 sps:$4 sm:$0xff] (!%p244_p7)   ;;  %v1224_v2 = vmov (!%p244_p7), 0   ;;  %v294_v11 = vlaneseq (!%p244_p7) }
  0x15   : > { %247 = sbr.rel (%p244_p7) target bundleno = 2328 (0x918), region = 48  ;;  %380 = vmatprep.mubr.bf16.mxu0 (!%p244_p7), %v1224_v2  ;;  %348 = vmatprep.subr.bf16.mxu0 (!%p244_p7), %v1167_v0  ;;  %v1170_v3 = vld [vmem:[%s1454_s2 + $0x14] ss:$8 sps:$4 sm:$0xff] (!%p244_p7)   ;;  %v1172_v4 = vld [vmem:[%s1454_s2 + $0x10] ss:$8 sps:$4 sm:$0xff] (!%p244_p7)   ;;  %vm344_vm0 = vcmask (!%p244_p7), 523264  }
  0x16   : > { %349 = vmatpush1.bf16.msra.mxu0 (!%p244_p7), %v1169_v1  ;;  %v1173_v5 = vld [vmem:[%s1454_s2 + $0x24] ss:$8 sps:$4 sm:$0xff] (!%p244_p7)   ;;  %v1175_v6 = vld [vmem:[%s1454_s2 + $0x20] ss:$8 sps:$4 sm:$0xff] (!%p244_p7)   ;;  %v1176_v7 = vld [vmem:[%s1454_s2 + $0x34] ss:$8 sps:$4 sm:$0xff] (!%p244_p7)  }
  0x17   : > { %350 = vmatprep.subr.bf16.mxu0 (!%p244_p7), %v1170_v3  ;;  %v1178_v8 = vld [vmem:[%s1454_s2 + $0x30] ss:$8 sps:$4 sm:$0xff] (!%p244_p7)   ;;  %v295_v12 = vshrl.u32 (!%p244_p7), %v294_v11, 7  ;;  %v1225_v13 = vmov (!%p244_p7), 0.0   ;;  %v292_v15 = vld [vmem:[%s1455_s3] sm:$0x3] (!%p244_p7) }
  0x18   : > { %1087 = vmatprep.subr.bf16.mxu1 (!%p244_p7), %v1225_v13  ;;  %vm1226_vm1 = vmmov (!%p244_p7), 0   ;;  %s1227_s13 = smov (!%p244_p7), 48   ;;  %s1228_s14 = smov (!%p244_p7), 64   ;;  %vm405_vm2 = vcmask (!%p244_p7), 130048   ;;  %vm470_vm3 = vcmask (!%p244_p7), 1040384   ;;  %v393_v32 = vand.u32 (!%p244_p7), 127, %v294_v11 }
  0x19   : > { %v296_v14 = vsub.s32 (!%p244_p7), 0, %v295_v12  ;;  %1089 = vmatprep.mubr.msk.bf16.mxu1 (!%p244_p7), %vm1226_vm1, %v1225_v13  ;;  %v300_v23 = vsub.s32 (!%p244_p7), 1, %v295_v12  ;;  %s389_s15 = sld [smem:[#allocation3 + %s1289_s0]] (!%p244_p7)  ;;  %v1229_v34 = vmov (!%p244_p7), -1e+30   ;;  %vm452_vm7 = vcmask (!%p244_p7), 9216  }
  0x1a   : > { %351 = vmatpush1.bf16.msra.mxu0 (!%p244_p7), %v1172_v4  ;;  %vm394_vm4 = vcmp.le.s32.totalorder (!%p244_p7), %v393_v32, %v295_v12  ;;  %s1230_s16 = smov (!%p244_p7), 80   ;;  %s1232_s18 = smov (!%p244_p7), 32   ;;  %vm466_vm8 = vcmask (!%p244_p7), 15360   ;;  %vm859_vm9 = vcmask (!%p244_p7), 261120   ;;  %vm861_vm10 = vcmask (!%p244_p7), 392192  }
  0x1b   : > { %352 = vmatprep.subr.bf16.mxu0 (!%p244_p7), %v1173_v5  ;;  %v297_v16 = vrot.slane (!%p244_p7), %v292_v15, %v296_v14  ;;  %v301_v24 = vrot.slane (!%p244_p7), %v292_v15, %v300_v23  ;;  %s1233_s19 = smov (!%p244_p7), 96   ;;  %s1234_s20 = smov (!%p244_p7), 16   ;;  %vm949_vm11 = vcmask (!%p244_p7), 517120  }
  0x1c   : > { %s1304_s17 = scalar_select %p273_p8, %s1289_s0, 1 }
  0x1d   : > { %s1231_s0 = smov 112  }
  0x1e   : > { %s1037_s24 = sshll.u32 %s1304_s17, 1  ;;  %353 = vmatpush1.bf16.msra.mxu0 %v1175_v6 }
  0x1f   : > { %s276_s29 = scalar_lea.vmem %s1453_s1, %s1037_s24  ;;  %354 = vmatprep.subr.bf16.mxu0 %v1176_v7  ;;  %v395_v33 = vstv %s389_s15 }
  0x20   : > { %v1327_v9 = vld [vmem:[%s276_s29] sm:$0x3]  ;;  %vm396_vm5 = vcmp.lt.s32.totalorder %v393_v32, %v395_v33 }
  0x21   : > { %v283_v10 = vpack.c.bf16 %v1327_v9, %v1327_v9  ;;  %vm397_vm6 = vmand %vm394_vm4, %vm396_vm5 }
  0x22   : > { %355 = vmatpush1.bf16.msra.mxu0 %v1178_v8  ;;  %v1353_v35 = vsel %vm397_vm6, 0.0, %v1229_v34 }
  0x23   : > { %1111 = vmatprep.subr.bf16.mxu0 %v1225_v13 }
  0x25   : > { %1047 = vmatmul.mubr.msk.bf16.vlgmr.msra.gmra.mrb[0].mxu0 %vm344_vm0, %v283_v10 }
  0x26   : > { %1113 = vmatprep.mubr.msk.bf16.mxu0 %vm1226_vm1, %v1225_v13 }
  0xf8   : > { %v382_v17 = vpop.f32.mrb[0].mxu0 }
  0xf9   : > { %v383_v18 = vadd.f32 %v382_v17, %v297_v16  ;;  %v384_v19 = vpop.f32.mrb[1].mxu0 }
  0xfa   : > { %v386_v20 = vpop.f32.mrb[2].mxu0  ;;  %v385_v26 = vadd.f32 %v384_v19, %v301_v24 }
  0xfb   : > { %v401_v21 = vpack.c.bf16 %v383_v18, %v383_v18  ;;  %v387_v22 = vpop.f32.mrb[3].mxu0  ;;  %v399_v28 = vmul.f32 0.25, %v383_v18 }
  0xfc   : > { %v1344_v29 = vpack.c.bf16 %v385_v26, %v385_v26 }
  0xfd   : > { %517 = vrot.lane.b32.xlu1 %v401_v21, %s1227_s13  ;;  %403 = vrot.lane.b32.xlu0 %v401_v21, %s1228_s14  ;;  %v400_v30 = vpack.c.bf16 %v399_v28, %v399_v28 }
  0xfe   : > { %v472_v31 = vsel %vm470_vm3, %v1344_v29, 0 }
 0x16f   : > { %v404_v25 = vpop.permute.xlu0 %403  ;;  %v518_v47 = vpop.permute.xlu1 %517 }
 0x170   : > { %v410_v27 = vsel %vm405_vm2, %v404_v25, 0  ;;  %v523_v56 = vsel %vm405_vm2, %v518_v47, 0 }
 0x171   : > { %1088 = vmatpush3.bf16.xpose.msra.mxu1 %v410_v27 }
 0x172   : > { %1093 = vmatprep.subr.bf16.mxu1 %v1225_v13 }
 0x178   : > { %1090 = vmatmul.mubr.msk.bf16.vlgmr.msra.gmra.mrb[0].mxu1 %vm405_vm2, %v400_v30 }
 0x179   : > { %1094 = vmatpush3.bf16.msra.mxu1 %v472_v31  ;;  %1095 = vmatprep.mubr.msk.bf16.mxu1 %vm1226_vm1, %v1225_v13 }
 0x17a   : > { %1099 = vmatprep.subr.bf16.mxu1 %v1225_v13 }
 0x24b   : > { %v446_v36 = vpop.f32.mrb[0].mxu1 }
 0x24c   : > { %v447_v37 = vadd.f32 %v446_v36, %v1353_v35  ;;  %v1091_v38 = vpop.f32.mrb[1].mxu1 }
 0x24d   : > { %v449_v39 = vpop.f32.mrb[2].mxu1 }
 0x24e   : > { %v1092_v40 = vpop.f32.mrb[3].mxu1  ;;  %v453_v41 = vsel %vm452_vm7, %v447_v37, -inf }
 0x24f   : > { %454 = vmax.xlane.f32.xlu0 %v453_v41 }
 0x265   : > { %736 = vrot.lane.b32.xlu0 %v400_v30, %s1230_s16 }
 0x2dc   : > { %v455_v42 = vpop.xlane.xlu0 %454 }
 0x2dd   : > { %v456_v43 = vsub.f32 %v447_v37, %v455_v42 }
 0x2df   : > { %v457_v44 = vmul.f32 1.442695, %v456_v43 }
 0x2e0   : > { %v737_v59 = vpop.permute.xlu0 %736 }
 0x2e1   : > { %1183 = vpow2.f32 %v457_v44 }
 0x2eb   : > { %v1184_v45 = vpop.eup %1183 }
 0x2ec   : > { %v459_v46 = vsel %vm452_vm7, %v1184_v45, 0.0 }
 0x2ed   : > { %460 = vadd.xlane.f32.xlu1 %v459_v46 }
 0x2fe   : > { %515 = vrot.lane.b32.xlu1 %v400_v30, %s1231_s0 }
 0x302   : > { %628 = vrot.lane.b32.xlu1 %v401_v21, %s1232_s18 }
 0x306   : > { %626 = vrot.lane.b32.xlu1 %v400_v30, %s1233_s19 }
 0x30a   : > { %738 = vrot.lane.b32.xlu1 %v401_v21, %s1234_s20 }
 0x37a   : > { %v461_v48 = vpop.xlane.xlu1 %460 }
 0x37b   : > { %1185 = vrcp.f32 %v461_v48 }
 0x37e   : > { %v516_v49 = vpop.permute.xlu1 %515 }
 0x382   : > { %v629_v50 = vpop.permute.xlu1 %628 }
 0x383   : > { %v634_v51 = vsel %vm405_vm2, %v629_v50, 0 }
 0x384   : > { %1112 = vmatpush3.bf16.xpose.msra.mxu0 %v634_v51 }
 0x385   : > { %v1186_v52 = vpop.eup %1185  ;;  %1123 = vmatprep.subr.bf16.mxu0 %v1225_v13 }
 0x386   : > { %v463_v53 = vmul.f32 %v1186_v52, %v1184_v45  ;;  %v627_v54 = vpop.permute.xlu1 %626 }
 0x388   : > { %v464_v55 = vpack.c.bf16 %v463_v53, %v463_v53  ;;  %v1179_v53 = vld [vmem:[%s1456_s4] sm:$0xff]  }
 0x38a   : > { %1096 = vmatmul.mubr.msk.bf16.vlgmr.msra.gmra.mrb[4].mxu1 %vm466_vm8, %v464_v55  ;;  %v739_v57 = vpop.permute.xlu1 %738  ;;  %v1181_v55 = vld [vmem:[%s1456_s4 + $0x10] sm:$0xff]  }
 0x38b   : > { %1100 = vmatpush3.bf16.xpose.msra.mxu1 %v523_v56  ;;  %v744_v58 = vsel %vm405_vm2, %v739_v57, 0  ;;  %1114 = vmatmul.mubr.msk.bf16.vlgmr.msra.gmra.mrb[4].mxu0 %vm405_vm2, %v627_v54  ;;  %v1180_v54 = vld [vmem:[%s1456_s4 + $0x8] sm:$0xff]  }
 0x38c   : > { %1124 = vmatpush3.bf16.xpose.msra.mxu0 %v744_v58  ;;  %1101 = vmatprep.mubr.msk.bf16.mxu1 %vm1226_vm1, %v1225_v13 }
 0x38d   : > { %1125 = vmatprep.mubr.msk.bf16.mxu0 %vm1226_vm1, %v1225_v13  ;;  %1105 = vmatprep.subr.bf16.mxu1 %v1225_v13 }
 0x38e   : > { %1135 = vmatprep.subr.bf16.mxu0 %v1225_v13 }
 0x392   : > { %1102 = vmatmul.mubr.msk.bf16.vlgmr.msra.gmra.mrb[8].mxu1 %vm405_vm2, %v516_v49 }
 0x393   : > { %1126 = vmatmul.mubr.msk.bf16.vlgmr.msra.gmra.mrb[8].mxu0 %vm405_vm2, %v737_v59  ;;  %1107 = vmatprep.mubr.msk.bf16.mxu1 %vm1226_vm1, %v1225_v13 }
 0x394   : > { %1143 = vmatprep.mubr.msk.bf16.mxu0 %vm1226_vm1, %v1225_v13  ;;  %1136 = vmatpush3.bf16.msra.mxu0 %v1179_v53 }
 0x395   : > { %1137 = vmatprep.subr.bf16.mxu0 %v1225_v13 }
 0x398   : > { %1138 = vmatpush3.bf16.msra.mxu0 %v1180_v54 }
 0x399   : > { %1139 = vmatprep.subr.bf16.mxu0 %v1225_v13 }
 0x39c   : > { %1140 = vmatpush3.bf16.msra.mxu0 %v1181_v55 }
 0x39d   : > { %1141 = vmatprep.subr.bf16.mxu0 %v1225_v13 }
 0x45d   : > { %v1381_v60 = vpop.f32.mrb[4].mxu1 }
 0x45e   : > { %v1097_v61 = vpop.f32.mrb[5].mxu1  ;;  %v670_v62 = vpop.f32.mrb[4].mxu0 }
 0x45f   : > { %v671_v63 = vadd.f32 %v670_v62, %v1353_v35  ;;  %v511_v0 = vpop.f32.mrb[6].mxu1  ;;  %v1115_v1 = vpop.f32.mrb[5].mxu0  ;;  %v1182_v61 = vld [vmem:[%s1456_s4 + $0x18] sm:$0xff]  }
 0x460   : > { %v1098_v2 = vpop.f32.mrb[7].mxu1  ;;  %v673_v3 = vpop.f32.mrb[6].mxu0  ;;  %1142 = vmatpush3.bf16.msra.mxu0 %v1182_v61 }
 0x461   : > { %v1116_v4 = vpop.f32.mrb[7].mxu0  ;;  %v676_v5 = vsel %vm452_vm7, %v671_v63, -inf }
 0x462   : > { %677 = vmax.xlane.f32.xlu0 %v676_v5 }
 0x465   : > { %v559_v6 = vpop.f32.mrb[8].mxu1 }
 0x466   : > { %v560_v7 = vadd.f32 %v559_v6, %v1353_v35  ;;  %v1103_v8 = vpop.f32.mrb[9].mxu1  ;;  %v780_v10 = vpop.f32.mrb[8].mxu0 }
 0x467   : > { %v562_v11 = vpop.f32.mrb[10].mxu1  ;;  %v1127_v12 = vpop.f32.mrb[9].mxu0  ;;  %v781_v14 = vadd.f32 %v780_v10, %v1353_v35 }
 0x468   : > { %v1104_v15 = vpop.f32.mrb[11].mxu1  ;;  %v783_v16 = vpop.f32.mrb[10].mxu0  ;;  %v565_v17 = vsel %vm452_vm7, %v560_v7, -inf }
 0x469   : > { %v1128_v18 = vpop.f32.mrb[11].mxu0  ;;  %566 = vmax.xlane.f32.xlu1 %v565_v17  ;;  %v786_v19 = vsel %vm452_vm7, %v781_v14, -inf }
 0x46d   : > { %787 = vmax.xlane.f32.xlu1 %v786_v19 }
 0x478   : > { %578 = vrot.lane.b32.xlu0 %v1344_v29, %s1231_s0  ;;  %s280_s0 = scalar_lea.vmem %s1460_s8, %s1037_s24 }
 0x4ef   : > { %v678_v20 = vpop.xlane.xlu0 %677 }
 0x4f0   : > { %v679_v21 = vsub.f32 %v671_v63, %v678_v20 }
 0x4f2   : > { %v680_v22 = vmul.f32 1.442695, %v679_v21 }
 0x4f3   : > { %v579_v23 = vpop.permute.xlu0 %578 }
 0x4f4   : > { %1187 = vpow2.f32 %v680_v22  ;;  %v584_v24 = vsel %vm470_vm3, %v579_v23, 0 }
 0x4f5   : > { %1106 = vmatpush3.bf16.msra.mxu1 %v584_v24 }
 0x4f6   : > { %v567_v25 = vpop.xlane.xlu1 %566  ;;  %1117 = vmatprep.subr.bf16.mxu1 %v1225_v13 }
 0x4f7   : > { %v568_v26 = vsub.f32 %v560_v7, %v567_v25 }
 0x4f9   : > { %v569_v30 = vmul.f32 1.442695, %v568_v26 }
 0x4fa   : > { %v788_v27 = vpop.xlane.xlu1 %787 }
 0x4fb   : > { %v789_v28 = vsub.f32 %v781_v14, %v788_v27  ;;  %v1056_v14 = vld [vmem:[%s1457_s5] ss:$0 sm:$0xff] }
 0x4fd   : > { %v790_v31 = vmul.f32 1.442695, %v789_v28 }
 0x4fe   : > { %v1188_v32 = vpop.eup %1187 }
 0x4ff   : > { %1189 = vpow2.f32 %v790_v31  ;;  %v682_v33 = vsel %vm452_vm7, %v1188_v32, 0.0 }
 0x500   : > { %683 = vadd.xlane.f32.xlu1 %v682_v33  ;;  %1191 = vpow2.f32 %v569_v30 }
 0x509   : > { %v1190_v34 = vpop.eup %1189 }
 0x50a   : > { %v792_v35 = vsel %vm452_vm7, %v1190_v34, 0.0  ;;  %v1192_v36 = vpop.eup %1191 }
 0x50b   : > { %793 = vadd.xlane.f32.xlu1 %v792_v35  ;;  %v571_v37 = vsel %vm452_vm7, %v1192_v36, 0.0 }
 0x50f   : > { %572 = vadd.xlane.f32.xlu1 %v571_v37 }
 0x520   : > { %688 = vrot.lane.b32.xlu1 %v1344_v29, %s1233_s19 }
 0x524   : > { %798 = vrot.lane.b32.xlu1 %v1344_v29, %s1230_s16 }
 0x58d   : > { %v684_v38 = vpop.xlane.xlu1 %683 }
 0x598   : > { %v794_v39 = vpop.xlane.xlu1 %793 }
 0x59c   : > { %v573_v40 = vpop.xlane.xlu1 %572 }
 0x59d   : > { %1193 = vrcp.f32 %v573_v40 }
 0x59e   : > { %1195 = vrcp.f32 %v684_v38 }
 0x59f   : > { %1197 = vrcp.f32 %v794_v39 }
 0x5a0   : > { %v689_v43 = vpop.permute.xlu1 %688 }
 0x5a1   : > { %v694_v46 = vsel %vm470_vm3, %v689_v43, 0 }
 0x5a4   : > { %v799_v47 = vpop.permute.xlu1 %798 }
 0x5a5   : > { %v804_v50 = vsel %vm470_vm3, %v799_v47, 0 }
 0x5a7   : > { %v1194_v41 = vpop.eup %1193 }
 0x5a8   : > { %v575_v42 = vmul.f32 %v1194_v41, %v1192_v36  ;;  %v1196_v45 = vpop.eup %1195 }
 0x5a9   : > { %v686_v29 = vmul.f32 %v1196_v45, %v1188_v32  ;;  %v1198_v49 = vpop.eup %1197  ;;  %v1063_v32 = vld [vmem:[%s1459_s7] ss:$0 sm:$0xff] }
 0x5aa   : > { %v576_v44 = vpack.c.bf16 %v575_v42, %v575_v42  ;;  %v796_v51 = vmul.f32 %v1198_v49, %v1190_v34 }
 0x5ab   : > { %v687_v48 = vpack.c.bf16 %v686_v29, %v686_v29 }
 0x5ac   : > { %1108 = vmatmul.mubr.msk.bf16.vlgmr.msra.gmra.mrb[12].mxu1 %vm466_vm8, %v576_v44  ;;  %v797_v52 = vpack.c.bf16 %v796_v51, %v796_v51 }
 0x5ad   : > { %1118 = vmatpush3.bf16.msra.mxu1 %v694_v46  ;;  %1119 = vmatprep.mubr.msk.bf16.mxu1 %vm1226_vm1, %v1225_v13 }
 0x5ae   : > { %1129 = vmatprep.subr.bf16.mxu1 %v1225_v13 }
 0x5b4   : > { %1120 = vmatmul.mubr.msk.bf16.vlgmr.msra.gmra.mrb[16].mxu1 %vm466_vm8, %v687_v48 }
 0x5b5   : > { %1130 = vmatpush3.bf16.msra.mxu1 %v804_v50  ;;  %1131 = vmatprep.mubr.msk.bf16.mxu1 %vm1226_vm1, %v1225_v13 }
 0x5bc   : > { %1132 = vmatmul.mubr.msk.bf16.vlgmr.msra.gmra.mrb[20].mxu1 %vm466_vm8, %v797_v52 }
 0x67f   : > { %v620_v56 = vpop.f32.mrb[12].mxu1 }
 0x680   : > { %847 = vrot.lane.b32.xlu0 %v620_v56, %s1234_s20  ;;  %v1109_v57 = vpop.f32.mrb[13].mxu1 }
 0x681   : > { %v623_v58 = vpop.f32.mrb[14].mxu1 }
 0x682   : > { %v1110_v59 = vpop.f32.mrb[15].mxu1 }
 0x687   : > { %v730_v62 = vpop.f32.mrb[16].mxu1 }
 0x688   : > { %851 = vrot.lane.b32.xlu1 %v730_v62, %s1232_s18  ;;  %v1121_v63 = vpop.f32.mrb[17].mxu1 }
 0x689   : > { %v733_v0 = vpop.f32.mrb[18].mxu1 }
 0x68a   : > { %v1122_v1 = vpop.f32.mrb[19].mxu1 }
 0x68f   : > { %v840_v2 = vpop.f32.mrb[20].mxu1 }
 0x690   : > { %855 = vrot.lane.b32.xlu0 %v840_v2, %s1227_s13  ;;  %v1133_v3 = vpop.f32.mrb[21].mxu1 }
 0x691   : > { %v843_v4 = vpop.f32.mrb[22].mxu1 }
 0x692   : > { %v1134_v5 = vpop.f32.mrb[23].mxu1 }
 0x6f2   : > { %v848_v6 = vpop.permute.xlu0 %847 }
 0x6f3   : > { %v858_v7 = vsel %vm405_vm2, %v1381_v60, %v848_v6 }
 0x6fa   : > { %v852_v13 = vpop.permute.xlu1 %851 }
 0x6fb   : > { %v860_v8 = vsel %vm859_vm9, %v858_v7, %v852_v13 }
 0x702   : > { %v856_v10 = vpop.permute.xlu0 %855 }
 0x703   : > { %v862_v11 = vsel %vm861_vm10, %v860_v8, %v856_v10 }
 0x704   : > { %v863_v12 = vpack.c.bf16 %v862_v11, %v862_v11 }
 0x706   : > { %1144 = vmatmul.mubr.msk.bf16.vlgmr.msra.gmra.mrb[12].mxu0 %vm344_vm0, %v863_v12 }
 0x7d9   : > { %v940_v15 = vpop.f32.mrb[12].mxu0 }
 0x7da   : > { %v941_v16 = vadd.f32 %v1056_v14, %v940_v15  ;;  %v1145_v17 = vpop.f32.mrb[13].mxu0 }
 0x7db   : > { %v943_v18 = vpop.f32.mrb[14].mxu0 }
 0x7dc   : > { %v1146_v19 = vpop.f32.mrb[15].mxu0  ;;  %v946_v20 = vadd.f32 %v941_v16, %v1327_v9  ;;  %v1062_v9 = vld [vmem:[%s1458_s6] ss:$0 sm:$0xff] }
 0x7de   : > { %v950_v60 = vsel %vm949_vm11, %v946_v20, 0.0 }
 0x7df   : > { %951 = vadd.xlane.f32.xlu1 %v950_v60 }
 0x86c   : > { %v952_v21 = vpop.xlane.xlu1 %951 }
 0x86d   : > { %v954_v22 = vmul.f32 0.015625, %v952_v21 }
 0x86f   : > { %v955_v23 = vsub.f32 %v946_v20, %v954_v22 }
 0x871   : > { %v956_v24 = vmul.f32 %v955_v23, %v955_v23 }
 0x873   : > { %v957_v25 = vsel %vm949_vm11, %v956_v24, 0.0 }
 0x874   : > { %958 = vadd.xlane.f32.xlu0 %v957_v25 }
 0x901   : > { %v959_v26 = vpop.xlane.xlu0 %958 }
 0x902   : > { %v960_v27 = vmul.f32 0.015625, %v959_v26 }
 0x904   : > { %v961_v28 = vadd.f32 1e-05, %v960_v27 }
 0x906   : > { %1199 = vrsqrt.f32 %v961_v28 }
 0x910   : > { %v1200_v30 = vpop.eup %1199 }
 0x911   : > { %v963_v31 = vmul.f32 %v1200_v30, %v955_v23 }
 0x913   : > { %v970_v33 = vmul.f32 %v1062_v9, %v963_v31 }
 0x915   : > { %v977_v34 = vadd.f32 %v1063_v32, %v970_v33 }
 0x917   : > { %978 = vst.msk [vmem:[%s280_s0] sm:$0x3] %vm949_vm11, %v977_v34 }
 0x918 PF: > { %s24_s10 = sadd.s32 1, %s1221_s10  }
 0x919   : > { %p21_p9 = scmp.ge.s32.totalorder %s24_s10, 4  }
 0x91b   :  { %23 = sbr.rel (!%p21_p9) target bundleno = 16 (0x10), region = 78 }

// kernel: form_model_forward_training.16
= control target key start
LH: loop header
LB: loop body
LE: loop exit
PB: predicated region body
PF: predicated region fallthrough
CT: control target
= control target key end

     0   :  { %v390_v0 = vmov 0.0   ;;  %vm391_vm0 = vmmov 0   ;;  %vm74_vm1 = vcmask 523264   ;;  %vm242_vm2 = vcmask 519168   ;;  %s507_s1 = inlined_call_operand.vmem [shape: bf16[64,128], index: 1, kind: input, shape index: {}]   ;;  %s508_s3 = inlined_call_operand.vmem [shape: bf16[128,64], index: 3, kind: input, shape index: {}]   ;;  %s509_s0 = inlined_call_operand.vmem [shape: f32[4,64], index: 0, kind: input, shape index: {}]   ;;  %s510_s2 = inlined_call_operand.vmem [shape: f32[1,128], index: 2, kind: input, shape index: {}]   ;;  %s511_s4 = inlined_call_operand.vmem [shape: f32[1,64], index: 4, kind: input, shape index: {}]   ;;  %s512_s5 = inlined_call_operand.vmem [shape: f32[1,64], index: 5, kind: input, shape index: {}]   ;;  %s513_s6 = inlined_call_operand.vmem [shape: f32[1,64], index: 6, kind: input, shape index: {}]   ;;  %s514_s7 = inlined_call_operand.vmem [shape: f32[1,64], index: 7, kind: input, shape index: {}]   ;;  %s515_s8 = inlined_call_operand.vmem [shape: f32[1,64], index: 8, kind: input, shape index: {}]   ;;  %s516_s9 = inlined_call_operand.vmem [shape: f32[4,64], index: 9, kind: output, shape index: {}]  }
   0x1   :  { %338 = vmatprep.subr.bf16.mxu0 %v390_v0  ;;  %v372_v1 = vld [vmem:[%s507_s1] sm:$0xff]   ;;  %346 = vmatprep.mubr.msk.bf16.mxu0 %vm391_vm0, %v390_v0  ;;  %v373_v2 = vld [vmem:[%s507_s1 + $0x8] sm:$0xff]   ;;  %v374_v3 = vld [vmem:[%s507_s1 + $0x10] sm:$0xff]  }
   0x2   :  { %350 = vmatprep.subr.bf16.mxu1 %v390_v0  ;;  %366 = vmatprep.mubr.msk.bf16.mxu1 %vm391_vm0, %v390_v0  ;;  %v376_v4 = vld [vmem:[%s508_s3] sm:$0xff]   ;;  %v375_v5 = vld [vmem:[%s507_s1 + $0x18] sm:$0xff]   ;;  %v377_v8 = vld [vmem:[%s508_s3 + $0x8] sm:$0xff]  }
   0x3   :  { %339 = vmatpush3.bf16.msra.mxu0 %v372_v1  ;;  %351 = vmatpush3.bf16.msra.mxu1 %v376_v4  ;;  %v33_v6 = vld [vmem:[%s509_s0] sm:$0xf]  ;;  %v378_v9 = vld [vmem:[%s508_s3 + $0x10] sm:$0xff]   ;;  %v379_v10 = vld [vmem:[%s508_s3 + $0x18] sm:$0xff]  }
   0x4   :  { %340 = vmatprep.subr.bf16.mxu0 %v390_v0  ;;  %352 = vmatprep.subr.bf16.mxu1 %v390_v0  ;;  %v34_v7 = vpack.c.bf16 %v33_v6, %v33_v6  ;;  %v380_v11 = vld [vmem:[%s508_s3 + $0x20] sm:$0xff]   ;;  %v381_v12 = vld [vmem:[%s508_s3 + $0x28] sm:$0xff]   ;;  %v382_v13 = vld [vmem:[%s508_s3 + $0x30] sm:$0xff]  }
   0x5   :  { %v383_v14 = vld [vmem:[%s508_s3 + $0x38] sm:$0xff]   ;;  %v305_v15 = vld [vmem:[%s510_s2] ss:$0 sm:$0xff] }
   0x6   :  { %v311_v31 = vld [vmem:[%s511_s4] ss:$0 sm:$0xff] }
   0x7   :  { %341 = vmatpush3.bf16.msra.mxu0 %v373_v2  ;;  %353 = vmatpush3.bf16.msra.mxu1 %v377_v8  ;;  %v320_v48 = vld [vmem:[%s512_s5] ss:$0 sm:$0xff] }
   0x8   :  { %342 = vmatprep.subr.bf16.mxu0 %v390_v0  ;;  %354 = vmatprep.subr.bf16.mxu1 %v390_v0  ;;  %v321_v50 = vld [vmem:[%s513_s6] ss:$0 sm:$0xff] }
   0x9   :  { %v322_v63 = vld [vmem:[%s514_s7] ss:$0 sm:$0xff] }
   0xa   :  { %v323_v1 = vld [vmem:[%s515_s8] ss:$0 sm:$0xff] }
   0xb   :  { %343 = vmatpush3.bf16.msra.mxu0 %v374_v3  ;;  %355 = vmatpush3.bf16.msra.mxu1 %v378_v9 }
   0xc   :  { %344 = vmatprep.subr.bf16.mxu0 %v390_v0  ;;  %356 = vmatprep.subr.bf16.mxu1 %v390_v0 }
   0xf   :  { %345 = vmatpush3.bf16.msra.mxu0 %v375_v5  ;;  %357 = vmatpush3.bf16.msra.mxu1 %v379_v10 }
  0x10   :  { %358 = vmatprep.subr.bf16.mxu1 %v390_v0 }
  0x12   :  { %347 = vmatmul.mubr.msk.bf16.vlgmr.msra.gmra.mrb[0].mxu0 %vm74_vm1, %v34_v7 }
  0x13   :  { %359 = vmatpush3.bf16.msra.mxu1 %v380_v11 }
  0x14   :  { %360 = vmatprep.subr.bf16.mxu1 %v390_v0 }
  0x17   :  { %361 = vmatpush3.bf16.msra.mxu1 %v381_v12 }
  0x18   :  { %362 = vmatprep.subr.bf16.mxu1 %v390_v0 }
  0x1b   :  { %363 = vmatpush3.bf16.msra.mxu1 %v382_v13 }
  0x1c   :  { %364 = vmatprep.subr.bf16.mxu1 %v390_v0 }
  0x1f   :  { %365 = vmatpush3.bf16.msra.mxu1 %v383_v14 }
  0xe5   :  { %v112_v16 = vpop.f32.mrb[0].mxu0 }
  0xe6   :  { %v113_v17 = vadd.f32 %v305_v15, %v112_v16  ;;  %v348_v18 = vpop.f32.mrb[1].mxu0 }
  0xe7   :  { %v115_v19 = vpop.f32.mrb[2].mxu0 }
  0xe8   :  { %v119_v20 = vmul.f32 0.044715, %v113_v17  ;;  %v349_v21 = vpop.f32.mrb[3].mxu0  ;;  %v118_v27 = vmul.f32 0.5, %v113_v17 }
  0xea   :  { %v120_v22 = vmul.f32 %v119_v20, %v113_v17 }
  0xec   :  { %v121_v23 = vmul.f32 %v120_v22, %v113_v17 }
  0xee   :  { %v122_v24 = vadd.f32 %v121_v23, %v113_v17 }
  0xf0   :  { %v123_v25 = vmul.f32 0.7978846, %v122_v24 }
  0xf2   :  { %384 = vtanh.f32 %v123_v25 }
  0xfc   :  { %v385_v26 = vpop.eup %384 }
  0xfd   :  { %v125_v28 = vadd.f32 1.0, %v385_v26 }
  0xff   :  { %v126_v29 = vmul.f32 %v125_v28, %v118_v27 }
 0x101   :  { %v127_v30 = vpack.c.bf16 %v126_v29, %v126_v29 }
 0x103   :  { %367 = vmatmul.mubr.bf16.vlgmr.msra.gmra.mrb[0].mxu1 %v127_v30 }
 0x1d6   :  { %v233_v32 = vpop.f32.mrb[0].mxu1 }
 0x1d7   :  { %v234_v33 = vadd.f32 %v311_v31, %v233_v32  ;;  %v368_v34 = vpop.f32.mrb[1].mxu1 }
 0x1d8   :  { %v236_v35 = vpop.f32.mrb[2].mxu1 }
 0x1d9   :  { %v369_v36 = vpop.f32.mrb[3].mxu1  ;;  %v239_v37 = vadd.f32 %v234_v33, %v33_v6 }
 0x1db   :  { %v243_v38 = vsel %vm242_vm2, %v239_v37, 0.0 }
 0x1dc   :  { %244 = vadd.xlane.f32.xlu0 %v243_v38 }
 0x269   :  { %v245_v39 = vpop.xlane.xlu0 %244 }
 0x26a   :  { %v247_v40 = vmul.f32 0.015625, %v245_v39 }
 0x26c   :  { %v248_v41 = vsub.f32 %v239_v37, %v247_v40 }
 0x26e   :  { %v249_v42 = vmul.f32 %v248_v41, %v248_v41 }
 0x270   :  { %v250_v43 = vsel %vm242_vm2, %v249_v42, 0.0 }
 0x271   :  { %251 = vadd.xlane.f32.xlu0 %v250_v43 }
 0x2fe   :  { %v252_v44 = vpop.xlane.xlu0 %251 }
 0x2ff   :  { %v253_v45 = vmul.f32 0.015625, %v252_v44 }
 0x301   :  { %v254_v46 = vadd.f32 1e-05, %v253_v45 }
 0x303   :  { %386 = vrsqrt.f32 %v254_v46 }
 0x30d   :  { %v387_v47 = vpop.eup %386 }
 0x30e   :  { %v256_v49 = vmul.f32 %v387_v47, %v248_v41 }
 0x310   :  { %v263_v51 = vmul.f32 %v320_v48, %v256_v49 }
 0x312   :  { %v270_v52 = vadd.f32 %v321_v50, %v263_v51 }
 0x314   :  { %v273_v53 = vsel %vm242_vm2, %v270_v52, 0.0 }
 0x315   :  { %274 = vadd.xlane.f32.xlu1 %v273_v53 }
 0x3a2   :  { %v275_v54 = vpop.xlane.xlu1 %274 }
 0x3a3   :  { %v276_v55 = vmul.f32 0.015625, %v275_v54 }
 0x3a5   :  { %v277_v56 = vsub.f32 %v270_v52, %v276_v55 }
 0x3a7   :  { %v278_v57 = vmul.f32 %v277_v56, %v277_v56 }
 0x3a9   :  { %v279_v58 = vsel %vm242_vm2, %v278_v57, 0.0 }
 0x3aa   :  { %280 = vadd.xlane.f32.xlu1 %v279_v58 }
 0x437   :  { %v281_v59 = vpop.xlane.xlu1 %280 }
 0x438   :  { %v282_v60 = vmul.f32 0.015625, %v281_v59 }
 0x43a   :  { %v283_v61 = vadd.f32 1e-05, %v282_v60 }
 0x43c   :  { %388 = vrsqrt.f32 %v283_v61 }
 0x446   :  { %v389_v62 = vpop.eup %388 }
 0x447   :  { %v285_v0 = vmul.f32 %v389_v62, %v277_v56 }
 0x449   :  { %v292_v2 = vmul.f32 %v322_v63, %v285_v0 }
 0x44b   :  { %v299_v3 = vadd.f32 %v323_v1, %v292_v2 }
 0x44d   :  { %300 = vst.msk [vmem:[%s516_s9] sm:$0xf] %vm242_vm2, %v299_v3 }

// kernel: form_model_forward_training.19
= control target key start
LH: loop header
LB: loop body
LE: loop exit
PB: predicated region body
PF: predicated region fallthrough
CT: control target
= control target key end

     0   :  { %v772_v2 = vmov 0.0   ;;  %vm773_vm0 = vmmov 0   ;;  %s774_s27 = smov 64   ;;  %vm36_vm1 = vcmask 523264   ;;  %v775_v52 = vmov 0   ;;  %s1037_s1 = inlined_call_operand.vmem [shape: f32[16,64], index: 1, kind: input, shape index: {}]   ;;  %s1038_s2 = inlined_call_operand.vmem [shape: bf16[128,64], index: 2, kind: input, shape index: {}]   ;;  %s1039_s0 = inlined_call_operand.vmem [shape: f32[16,64], index: 0, kind: input, shape index: {}]   ;;  %s1040_s4 = inlined_call_operand.vmem [shape: bf16[128,640], index: 4, kind: input, shape index: {}]   ;;  %s1041_s3 = inlined_call_operand.vmem [shape: f32[1,64], index: 3, kind: input, shape index: {}]   ;;  %s1042_s5 = inlined_call_operand.vmem [shape: f32[1,640], index: 5, kind: input, shape index: {}]   ;;  %s1043_s6 = inlined_call_operand.vmem [shape: f32[16,640], index: 6, kind: output, shape index: {}]  }
   0x1   :  { %v26_v0 = vld [vmem:[%s1037_s1] sm:$0xff]  ;;  %v27_v1 = vld [vmem:[%s1037_s1 + $0x8] sm:$0xff]  ;;  %654 = vmatprep.subr.bf16.mxu0 %v772_v2  ;;  %670 = vmatprep.mubr.msk.bf16.mxu0 %vm773_vm0, %v772_v2  ;;  %v710_v6 = vld [vmem:[%s1038_s2 + $0x10] sm:$0xff]  }
   0x2   :  { %v698_v3 = vpack.i.bf16 %v27_v1, %v26_v0  ;;  %v708_v4 = vld [vmem:[%s1038_s2] sm:$0xff]   ;;  %v709_v5 = vld [vmem:[%s1038_s2 + $0x8] sm:$0xff]   ;;  %v711_v7 = vld [vmem:[%s1038_s2 + $0x18] sm:$0xff]   ;;  %478 = vmatprep.mubr.bf16.mxu1 %v775_v52 }
   0x3   :  { %655 = vmatpush3.bf16.msra.mxu0 %v708_v4  ;;  %v712_v8 = vld [vmem:[%s1038_s2 + $0x20] sm:$0xff]   ;;  %v713_v9 = vld [vmem:[%s1038_s2 + $0x28] sm:$0xff]   ;;  %v714_v10 = vld [vmem:[%s1038_s2 + $0x30] sm:$0xff]  }
   0x4   :  { %699 = vrot.lane.b32.xlu0 %v698_v3, %s774_s27  ;;  %656 = vmatprep.subr.bf16.mxu0 %v772_v2  ;;  %v715_v11 = vld [vmem:[%s1038_s2 + $0x38] sm:$0xff]   ;;  %v855_v13 = vld [vmem:[%s1039_s0] sm:$0xff]  ;;  %v860_v14 = vld [vmem:[%s1039_s0 + $0x8] sm:$0xff] }
   0x5   :  { %v716_v20 = vld [vmem:[%s1040_s4 + $0x4] ss:$20 sps:$4 sm:$0xff]   ;;  %v718_v21 = vld [vmem:[%s1040_s4] ss:$20 sps:$4 sm:$0xff]   ;;  %v719_v22 = vld [vmem:[%s1040_s4 + $0x8] ss:$20 sps:$4 sm:$0xff]  }
   0x6   :  { %446 = vmatprep.subr.bf16.mxu1 %v716_v20  ;;  %v721_v23 = vld [vmem:[%s1040_s4 + $0xc] ss:$20 sps:$4 sm:$0xff]   ;;  %v724_v25 = vld [vmem:[%s1040_s4 + $0x28] ss:$20 sps:$4 sm:$0xff]   ;;  %v725_v26 = vld [vmem:[%s1040_s4 + $0x30] ss:$20 sps:$4 sm:$0xff]  }
   0x7   :  { %657 = vmatpush3.bf16.msra.mxu0 %v709_v5  ;;  %447 = vmatpush1.bf16.msra.mxu1 %v718_v21  ;;  %v722_v24 = vld [vmem:[%s1040_s4 + $0x2c] ss:$20 sps:$4 sm:$0xff]   ;;  %v727_v27 = vld [vmem:[%s1040_s4 + $0x34] ss:$20 sps:$4 sm:$0xff]   ;;  %v730_v29 = vld [vmem:[%s1040_s4 + $0x50] ss:$20 sps:$4 sm:$0xff]  }
   0x8   :  { %658 = vmatprep.subr.bf16.mxu0 %v772_v2  ;;  %448 = vmatprep.subr.bf16.mxu1 %v722_v24  ;;  %v728_v28 = vld [vmem:[%s1040_s4 + $0x54] ss:$20 sps:$4 sm:$0xff]   ;;  %v733_v30 = vld [vmem:[%s1040_s4 + $0x5c] ss:$20 sps:$4 sm:$0xff]   ;;  %v731_v32 = vld [vmem:[%s1040_s4 + $0x58] ss:$20 sps:$4 sm:$0xff]  }
   0x9   :  { %v734_v31 = vld [vmem:[%s1040_s4 + $0x7c] ss:$20 sps:$4 sm:$0xff]   ;;  %v739_v33 = vld [vmem:[%s1040_s4 + $0x84] ss:$20 sps:$4 sm:$0xff]   ;;  %v737_v36 = vld [vmem:[%s1040_s4 + $0x80] ss:$20 sps:$4 sm:$0xff]  }
   0xa   :  { %v736_v34 = vld [vmem:[%s1040_s4 + $0x78] ss:$20 sps:$4 sm:$0xff]   ;;  %v742_v38 = vld [vmem:[%s1040_s4 + $0xa0] ss:$20 sps:$4 sm:$0xff]   ;;  %v743_v39 = vld [vmem:[%s1040_s4 + $0xa8] ss:$20 sps:$4 sm:$0xff]  }
   0xb   :  { %659 = vmatpush3.bf16.msra.mxu0 %v710_v6  ;;  %449 = vmatpush1.bf16.msra.mxu1 %v724_v25  ;;  %v740_v35 = vld [vmem:[%s1040_s4 + $0xa4] ss:$20 sps:$4 sm:$0xff]   ;;  %v745_v37 = vld [vmem:[%s1040_s4 + $0xac] ss:$20 sps:$4 sm:$0xff]   ;;  %v748_v41 = vld [vmem:[%s1040_s4 + $0xc8] ss:$20 sps:$4 sm:$0xff]  }
   0xc   :  { %660 = vmatprep.subr.bf16.mxu0 %v772_v2  ;;  %450 = vmatprep.subr.bf16.mxu1 %v728_v28  ;;  %v746_v40 = vld [vmem:[%s1040_s4 + $0xcc] ss:$20 sps:$4 sm:$0xff]   ;;  %v751_v42 = vld [vmem:[%s1040_s4 + $0xd4] ss:$20 sps:$4 sm:$0xff]   ;;  %v749_v44 = vld [vmem:[%s1040_s4 + $0xd0] ss:$20 sps:$4 sm:$0xff]  }
   0xd   :  { %v752_v43 = vld [vmem:[%s1040_s4 + $0xf4] ss:$20 sps:$4 sm:$0xff]   ;;  %v757_v45 = vld [vmem:[%s1040_s4 + $0xfc] ss:$20 sps:$4 sm:$0xff]   ;;  %v755_v47 = vld [vmem:[%s1040_s4 + $0xf8] ss:$20 sps:$4 sm:$0xff]  }
   0xe   :  { %v754_v46 = vld [vmem:[%s1040_s4 + $0xf0] ss:$20 sps:$4 sm:$0xff]   ;;  %v760_v49 = vld [vmem:[%s1040_s4 + $0x118] ss:$20 sps:$4 sm:$0xff]   ;;  %v761_v51 = vld [vmem:[%s1040_s4 + $0x120] ss:$20 sps:$4 sm:$0xff]  }
   0xf   :  { %661 = vmatpush3.bf16.msra.mxu0 %v711_v7  ;;  %451 = vmatpush1.bf16.msra.mxu1 %v730_v29  ;;  %v758_v48 = vld [vmem:[%s1040_s4 + $0x11c] ss:$20 sps:$4 sm:$0xff]   ;;  %v763_v50 = vld [vmem:[%s1040_s4 + $0x124] ss:$20 sps:$4 sm:$0xff]   ;;  %v587_v53 = vld [vmem:[%s1041_s3] ss:$0 sm:$0xff] }
  0x10   :  { %662 = vmatprep.subr.bf16.mxu0 %v772_v2  ;;  %452 = vmatprep.subr.bf16.mxu1 %v734_v31  ;;  %v764_v3 = vld [vmem:[%s1040_s4 + $0x10] ss:$20 sps:$4 sm:$0xff]   ;;  %v765_v5 = vld [vmem:[%s1040_s4 + $0x38] ss:$20 sps:$4 sm:$0xff]   ;;  %v766_v6 = vld [vmem:[%s1040_s4 + $0x60] ss:$20 sps:$4 sm:$0xff]  }
  0x11   :  { %v767_v7 = vld [vmem:[%s1040_s4 + $0x88] ss:$20 sps:$4 sm:$0xff]  }
  0x13   :  { %663 = vmatpush3.bf16.msra.mxu0 %v712_v8  ;;  %453 = vmatpush1.bf16.msra.mxu1 %v736_v34  ;;  %v768_v8 = vld [vmem:[%s1040_s4 + $0xb0] ss:$20 sps:$4 sm:$0xff]  }
  0x14   :  { %664 = vmatprep.subr.bf16.mxu0 %v772_v2  ;;  %454 = vmatprep.subr.bf16.mxu1 %v740_v35 }
  0x17   :  { %665 = vmatpush3.bf16.msra.mxu0 %v713_v9  ;;  %455 = vmatpush1.bf16.msra.mxu1 %v742_v38  ;;  %v769_v9 = vld [vmem:[%s1040_s4 + $0xd8] ss:$20 sps:$4 sm:$0xff]  }
  0x18   :  { %666 = vmatprep.subr.bf16.mxu0 %v772_v2  ;;  %456 = vmatprep.subr.bf16.mxu1 %v746_v40 }
  0x1b   :  { %667 = vmatpush3.bf16.msra.mxu0 %v714_v10  ;;  %457 = vmatpush1.bf16.msra.mxu1 %v748_v41  ;;  %v770_v10 = vld [vmem:[%s1040_s4 + $0x100] ss:$20 sps:$4 sm:$0xff]  }
  0x1c   :  { %668 = vmatprep.subr.bf16.mxu0 %v772_v2  ;;  %458 = vmatprep.subr.bf16.mxu1 %v752_v43 }
  0x1f   :  { %669 = vmatpush3.bf16.msra.mxu0 %v715_v11  ;;  %459 = vmatpush1.bf16.msra.mxu1 %v754_v46  ;;  %v771_v11 = vld [vmem:[%s1040_s4 + $0x128] ss:$20 sps:$4 sm:$0xff]  }
  0x20   :  { %489 = vmatprep.subr.bf16.mxu0 %v721_v23  ;;  %460 = vmatprep.subr.bf16.mxu1 %v758_v48 }
  0x23   :  { %461 = vmatpush1.bf16.msra.mxu1 %v760_v49 }
  0x24   :  { %674 = vmatprep.subr.bf16.mxu1 %v772_v2 }
  0x76   :  { %v700_v12 = vpop.permute.xlu0 %699 }
  0x77   :  { %v702_v15 = vunpack.i.h.bf16 %v700_v12  ;;  %v701_v16 = vunpack.i.l.bf16 %v700_v12  ;;  %v213_v12 = vlaneseq }
  0x79   :  { %v37_v17 = vsel %vm36_vm1, %v855_v13, %v701_v16  ;;  %v38_v18 = vsel %vm36_vm1, %v860_v14, %v702_v15  ;;  %v211_v16 = vld [vmem:[%s1042_s5] sm:$0x1f] }
  0x7a   :  { %v39_v19 = vpack.c.bf16 %v38_v18, %v37_v17 }
  0x7c   :  { %671 = vmatmul.mubr.bf16.vlgmr.msra.gmra.mrb[0].mxu0 %v39_v19 }
  0x7d   :  { %490 = vmatpush1.bf16.msra.mxu0 %v719_v22  ;;  %521 = vmatprep.mubr.bf16.mxu0 %v775_v52 }
  0x7e   :  { %491 = vmatprep.subr.bf16.mxu0 %v727_v27 }
  0x81   :  { %492 = vmatpush1.bf16.msra.mxu0 %v725_v26 }
  0x82   :  { %493 = vmatprep.subr.bf16.mxu0 %v733_v30 }
  0x85   :  { %494 = vmatpush1.bf16.msra.mxu0 %v731_v32 }
  0x86   :  { %495 = vmatprep.subr.bf16.mxu0 %v739_v33 }
  0x89   :  { %496 = vmatpush1.bf16.msra.mxu0 %v737_v36 }
  0x8a   :  { %497 = vmatprep.subr.bf16.mxu0 %v745_v37 }
  0x8d   :  { %498 = vmatpush1.bf16.msra.mxu0 %v743_v39 }
  0x8e   :  { %499 = vmatprep.subr.bf16.mxu0 %v751_v42 }
  0x91   :  { %500 = vmatpush1.bf16.msra.mxu0 %v749_v44 }
  0x92   :  { %501 = vmatprep.subr.bf16.mxu0 %v757_v45 }
  0x95   :  { %502 = vmatpush1.bf16.msra.mxu0 %v755_v47 }
  0x96   :  { %503 = vmatprep.subr.bf16.mxu0 %v763_v50 }
  0x99   :  { %504 = vmatpush1.bf16.msra.mxu0 %v761_v51 }
 0x14f   :  { %v145_v54 = vpop.f32.mrb[0].mxu0 }
 0x150   :  { %v672_v55 = vpop.f32.mrb[1].mxu0  ;;  %v146_v57 = vadd.f32 %v587_v53, %v145_v54 }
 0x151   :  { %v148_v56 = vpop.f32.mrb[2].mxu0 }
 0x152   :  { %v149_v58 = vadd.f32 %v587_v53, %v148_v56  ;;  %v673_v59 = vpop.f32.mrb[3].mxu0 }
 0x154   :  { %v703_v60 = vpack.i.bf16 %v149_v58, %v146_v57 }
 0x156   :  { %704 = vrot.lane.b32.xlu0 %v703_v60, %s774_s27 }
 0x1c8   :  { %v705_v61 = vpop.permute.xlu0 %704 }
 0x1c9   :  { %v707_v62 = vunpack.i.h.bf16 %v705_v61  ;;  %v706_v63 = vunpack.i.l.bf16 %v705_v61 }
 0x1cb   :  { %v160_v0 = vsel %vm36_vm1, %v855_v13, %v706_v63  ;;  %v161_v1 = vsel %vm36_vm1, %v860_v14, %v707_v62  ;;  %v214_v13 = vshrl.u32 %v213_v12, 7 }
 0x1cc   :  { %v162_v4 = vpack.c.bf16 %v161_v1, %v160_v0 }
 0x1cd   :  { %v215_v14 = vsub.s32 0, %v214_v13  ;;  %v223_v15 = vsub.s32 2, %v214_v13  ;;  %v219_v17 = vsub.s32 1, %v214_v13  ;;  %v227_v18 = vsub.s32 3, %v214_v13 }
 0x1ce   :  { %479 = vmatmul.mubr.bf16.vlgmr.msra.gmra.mrb[0].mxu1 %v162_v4  ;;  %522 = vmatmul.mubr.bf16.vlgmr.msra.gmra.mrb[4].mxu0 %v162_v4  ;;  %v231_v38 = vsub.s32 4, %v214_v13 }
 0x1cf   :  { %675 = vmatpush3.bf16.msra.mxu1 %v764_v3  ;;  %690 = vmatprep.mubr.msk.bf16.mxu1 %vm773_vm0, %v772_v2  ;;  %v216_v19 = vrot.slane %v211_v16, %v215_v14  ;;  %v224_v20 = vrot.slane %v211_v16, %v223_v15  ;;  %v220_v21 = vrot.slane %v211_v16, %v219_v17 }
 0x1d0   :  { %676 = vmatprep.subr.bf16.mxu1 %v772_v2  ;;  %v228_v22 = vrot.slane %v211_v16, %v227_v18  ;;  %v232_v39 = vrot.slane %v211_v16, %v231_v38 }
 0x1d3   :  { %677 = vmatpush3.bf16.msra.mxu1 %v765_v5 }
 0x1d4   :  { %678 = vmatprep.subr.bf16.mxu1 %v772_v2 }
 0x1d7   :  { %679 = vmatpush3.bf16.msra.mxu1 %v766_v6 }
 0x1d8   :  { %680 = vmatprep.subr.bf16.mxu1 %v772_v2 }
 0x1db   :  { %681 = vmatpush3.bf16.msra.mxu1 %v767_v7 }
 0x1dc   :  { %682 = vmatprep.subr.bf16.mxu1 %v772_v2 }
 0x1df   :  { %683 = vmatpush3.bf16.msra.mxu1 %v768_v8 }
 0x1e0   :  { %684 = vmatprep.subr.bf16.mxu1 %v772_v2 }
 0x1e3   :  { %685 = vmatpush3.bf16.msra.mxu1 %v769_v9 }
 0x1e4   :  { %686 = vmatprep.subr.bf16.mxu1 %v772_v2 }
 0x1e7   :  { %687 = vmatpush3.bf16.msra.mxu1 %v770_v10 }
 0x1e8   :  { %688 = vmatprep.subr.bf16.mxu1 %v772_v2 }
 0x1eb   :  { %689 = vmatpush3.bf16.msra.mxu1 %v771_v11 }
 0x1ee   :  { %691 = vmatmul.mubr.bf16.vlgmr.msra.gmra.mrb[4].mxu1 %v162_v4 }
 0x2a1   :  { %v480_v23 = vpop.f32.mrb[0].mxu1  ;;  %v523_v24 = vpop.f32.mrb[4].mxu0 }
 0x2a2   :  { %v481_v25 = vadd.f32 %v480_v23, %v216_v19  ;;  %v524_v2 = vadd.f32 %v523_v24, %v224_v20  ;;  %v482_v26 = vpop.f32.mrb[1].mxu1  ;;  %v525_v27 = vpop.f32.mrb[5].mxu0 }
 0x2a3   :  { %v483_v28 = vadd.f32 %v482_v26, %v220_v21  ;;  %v526_v29 = vadd.f32 %v525_v27, %v228_v22  ;;  %v484_v30 = vpop.f32.mrb[2].mxu1  ;;  %v527_v31 = vpop.f32.mrb[6].mxu0 }
 0x2a4   :  { %573 = vst [vmem:[%s1043_s6] sm:$0xff] %v481_v25  ;;  %575 = vst [vmem:[%s1043_s6 + $0x10] sm:$0xff] %v524_v2  ;;  %v485_v32 = vadd.f32 %v484_v30, %v216_v19  ;;  %v528_v33 = vadd.f32 %v527_v31, %v224_v20  ;;  %v486_v34 = vpop.f32.mrb[3].mxu1  ;;  %v529_v35 = vpop.f32.mrb[7].mxu0 }
 0x2a5   :  { %574 = vst [vmem:[%s1043_s6 + $0x8] sm:$0xff] %v483_v28  ;;  %576 = vst [vmem:[%s1043_s6 + $0x18] sm:$0xff] %v526_v29  ;;  %v487_v36 = vadd.f32 %v486_v34, %v220_v21  ;;  %v530_v37 = vadd.f32 %v529_v35, %v228_v22 }
 0x2a6   :  { %578 = vst [vmem:[%s1043_s6 + $0x28] sm:$0xff] %v485_v32  ;;  %580 = vst [vmem:[%s1043_s6 + $0x38] sm:$0xff] %v528_v33 }
 0x2a7   :  { %579 = vst [vmem:[%s1043_s6 + $0x30] sm:$0xff] %v487_v36  ;;  %581 = vst [vmem:[%s1043_s6 + $0x40] sm:$0xff] %v530_v37 }
 0x2c1   :  { %v566_v40 = vpop.f32.mrb[4].mxu1 }
 0x2c2   :  { %v567_v41 = vadd.f32 %v566_v40, %v232_v39  ;;  %v692_v42 = vpop.f32.mrb[5].mxu1 }
 0x2c3   :  { %v569_v43 = vpop.f32.mrb[6].mxu1 }
 0x2c4   :  { %577 = vst [vmem:[%s1043_s6 + $0x20] sm:$0xff] %v567_v41  ;;  %v570_v44 = vadd.f32 %v569_v43, %v232_v39  ;;  %v693_v45 = vpop.f32.mrb[7].mxu1 }
 0x2c6   :  { %582 = vst [vmem:[%s1043_s6 + $0x48] sm:$0xff] %v570_v44 }

</bundles_post_ra>
